<compile_context>
chip_gen: v7x
topology: tpu7x:2x2x1
jax: 0.10.0
libtpu: 0.0.40
codegen_flags: <defaults>
</compile_context>

<pallas_src>
import functools

import numpy as np

import jax
import jax.numpy as jnp
from jax.experimental import pallas as pl
from jax.experimental.pallas import tpu as pltpu

EPS = 1e-5


def _round_up(n, m):
    return ((n + m - 1) // m) * m


def _fold_bn(gamma, beta, mean, var, eps=EPS):
    scale = gamma * jax.lax.rsqrt(var + eps)
    bias = beta - mean * scale
    return scale, bias


def _pool_pack_selectors(D):
    """Precomputed one-hot selectors (bf16) for 2x2x2 max pooling and even/odd
    voxel packing.  Built once on the host (numpy); they are passed to the kernel
    with a constant index_map so they stay VMEM-resident across the batch grid."""
    Dh, R, V = D // 2, D ** 3, (D // 2) ** 3
    v = np.arange(V)
    pz, py, px = v // (Dh * Dh), (v // Dh) % Dh, v % Dh
    base = 2 * pz * D * D + 2 * py * D + 2 * px            # (V,)
    rows = np.arange(R)
    sels = []
    for a in (0, 1):
        for b in (0, 1):
            for c in (0, 1):
                off = a * D * D + b * D + c
                sels.append(rows[None, :] == (base + off)[:, None])   # (V, R)
    pool_sel = np.concatenate(sels, axis=0)                 # (8*V, R) one-hot
    j = np.arange(V // 2)
    even = np.arange(V)[None, :] == (2 * j)[:, None]
    odd = np.arange(V)[None, :] == (2 * j + 1)[:, None]
    pack_sel = np.concatenate([even, odd], axis=0)          # (V, V) one-hot
    return (jnp.asarray(pool_sel, jnp.bfloat16),
            jnp.asarray(pack_sel, jnp.bfloat16))


def _im2col(x_cl, Kp):
    """x_cl (B, D, D, D, Cin) channels-last -> lane-dense bf16 col matrix
    (B*D^3, Kp).  Column t*Cin + c holds the input voxel shifted by tap
    t = kz*9 + ky*3 + kx; conv zero padding and boundary masking are baked in."""
    B, D, Cin = x_cl.shape[0], x_cl.shape[1], x_cl.shape[4]
    xp = jnp.pad(x_cl, ((0, 0), (1, 1), (1, 1), (1, 1), (0, 0)))
    taps = [xp[:, kz:kz + D, ky:ky + D, kx:kx + D, :]
            for kz in range(3) for ky in range(3) for kx in range(3)]
    cols = jnp.stack(taps, axis=4).reshape(B, D * D * D, 27 * Cin)
    cols = jnp.pad(cols, ((0, 0), (0, 0), (0, Kp - 27 * Cin)))
    return cols.astype(jnp.bfloat16).reshape(B * D * D * D, Kp)


# ---------------------------------------------------------------------------
# Kernel 1: fused 3x3x3 conv (single im2col matmul) + folded BN + ReLU
#           + 2x2x2 max pool + lane-dense packing.  One grid step per sample.
# ---------------------------------------------------------------------------
def _conv_bn_relu_pool_kernel(col_ref, w_ref, cs_ref, cb_ref, psel_ref, ksel_ref,
                              o_ref, *, V, pack_pairs):
    f32 = jnp.float32
    bf16 = jnp.bfloat16

    # 3x3x3 conv as ONE im2col matmul: (R, Kp) @ (Kp, Cout), bf16 in / f32 acc.
    acc = jnp.dot(col_ref[...], w_ref[...], preferred_element_type=f32)

    # folded BN + ReLU epilogue in f32 (v5e VPU has no bf16)
    y = jnp.maximum(acc * cs_ref[...] + cb_ref[...], 0.0)
    yb = y.astype(bf16)

    # 2x2x2 max pool via 8 exact one-hot selector matmuls (selectors precomputed
    # on the host and VMEM-resident; 0/1 weights + f32 accumulate => exact gather).
    pooled = None
    for o in range(8):
        sel = psel_ref[o * V:(o + 1) * V, :]                        # (V, R) bf16 view
        cand = jnp.dot(sel, yb, preferred_element_type=f32)
        pooled = cand if pooled is None else jnp.maximum(pooled, cand)

    if pack_pairs:
        # pack voxels (2j, 2j+1) side by side -> (V//2, 2*Cout) lane-dense rows;
        # this is exactly the flattened (voxel-major, channel) fc1 input layout.
        pooled_b = pooled.astype(bf16)
        even = jnp.dot(ksel_ref[:V // 2, :], pooled_b, preferred_element_type=f32)
        odd = jnp.dot(ksel_ref[V // 2:, :], pooled_b, preferred_element_type=f32)
        o_ref[...] = jnp.concatenate([even, odd], axis=1).astype(o_ref.dtype)
    else:
        o_ref[...] = pooled.astype(o_ref.dtype)


def _conv_stage(x_cl, w_col, cscale, cbias, pool_sel, pack_sel, *, pack_pairs):
    """x_cl: (B, D, D, D, Cin) channels-last.  Returns pooled activations:
       pack_pairs=True  -> (B, (D/2)^3 * Cout) bf16   (flat fc1 input)
       pack_pairs=False -> (B, D/2, D/2, D/2, Cout) bf16 (next stage input)."""
    B, D = x_cl.shape[0], x_cl.shape[1]
    Cout = w_col.shape[1]
    Kp = w_col.shape[0]
    R, Dh = D ** 3, D // 2
    V = Dh ** 3

    cols = _im2col(x_cl, Kp)                                  # (B*R, Kp) bf16

    rows_out = V // 2 if pack_pairs else V
    cols_out = 2 * Cout if pack_pairs else Cout
    kern = functools.partial(_conv_bn_relu_pool_kernel, V=V, pack_pairs=pack_pairs)
    out = pl.pallas_call(
        kern,
        out_shape=jax.ShapeDtypeStruct((B * rows_out, cols_out), jnp.bfloat16),
        grid=(B,),
        in_specs=[
            pl.BlockSpec((R, Kp), lambda b: (b, 0)),          # per-sample col matrix
            pl.BlockSpec((Kp, Cout), lambda b: (0, 0)),       # resident conv weight
            pl.BlockSpec((1, Cout), lambda b: (0, 0)),        # folded BN scale
            pl.BlockSpec((1, Cout), lambda b: (0, 0)),        # folded BN bias
            pl.BlockSpec((8 * V, R), lambda b: (0, 0)),       # resident pool selector
            pl.BlockSpec((V, V), lambda b: (0, 0)),           # resident pack selector
        ],
        out_specs=pl.BlockSpec((rows_out, cols_out), lambda b: (b, 0)),
        compiler_params=pltpu.CompilerParams(dimension_semantics=("parallel",)),
    )(cols, w_col, cscale, cbias, pool_sel, pack_sel)

    if pack_pairs:
        return out.reshape(B, V * Cout)
    return out.reshape(B, Dh, Dh, Dh, Cout)


# ---------------------------------------------------------------------------
# Kernel 2: header = FcBnRelu(4096 -> 128) + Linear(128 -> nout_padded).
# fc1's K dimension is tiled over the grid so the ~1 MB w1 stream pipelines
# with the MXU (f32 VMEM accumulator); fc2 output is zero-padded to 128 lanes
# and sliced outside.
# ---------------------------------------------------------------------------
def _header_kernel(x_ref, w1_ref, s1_ref, b1_ref, w2_ref, b2_ref, o_ref, acc_ref):
    k = pl.program_id(0)

    @pl.when(k == 0)
    def _():
        acc_ref[...] = jnp.zeros_like(acc_ref)

    acc_ref[...] += jnp.dot(x_ref[...], w1_ref[...],
                            preferred_element_type=jnp.float32)

    @pl.when(k == pl.num_programs(0) - 1)
    def _():
        h = jnp.maximum(acc_ref[...] * s1_ref[...] + b1_ref[...], 0.0)   # f32 epilogue
        y = jnp.dot(h.astype(jnp.bfloat16), w2_ref[...],
                    preferred_element_type=jnp.float32) + b2_ref[...]
        o_ref[...] = y.astype(o_ref.dtype)


def _header(feat, w1, s1, b1, w2p, b2p, *, nout, kc=1024):
    B, K = feat.shape
    Hid = w1.shape[1]
    Np = w2p.shape[1]
    kc = kc if K % kc == 0 else K
    out = pl.pallas_call(
        _header_kernel,
        out_shape=jax.ShapeDtypeStruct((B, Np), jnp.float32),
        grid=(K // kc,),
        in_specs=[
            pl.BlockSpec((B, kc), lambda k: (0, k)),          # feat K-chunk
            pl.BlockSpec((kc, Hid), lambda k: (k, 0)),        # streamed w1 K-chunk
            pl.BlockSpec((1, Hid), lambda k: (0, 0)),
            pl.BlockSpec((1, Hid), lambda k: (0, 0)),
            pl.BlockSpec((Hid, Np), lambda k: (0, 0)),
            pl.BlockSpec((1, Np), lambda k: (0, 0)),
        ],
        out_specs=pl.BlockSpec((B, Np), lambda k: (0, 0)),
        scratch_shapes=[pltpu.VMEM((B, Hid), jnp.float32)],
        compiler_params=pltpu.CompilerParams(dimension_semantics=("arbitrary",)),
    )(feat, w1, s1, b1, w2p, b2p)
    return out[:, :nout]


# ---------------------------------------------------------------------------
# Model
# ---------------------------------------------------------------------------
def _lenet_forward(params, x, *, nout):
    # x: (B, channel_in, 2^depth, 2^depth, 2^depth) full-octree feature (NCDHW)
    data = jnp.transpose(x, (0, 2, 3, 4, 1))        # one tiny NCDHW -> NDHWC adapter
    convs = params["conv"]
    feat = None
    for i, cp in enumerate(convs):
        last = i == len(convs) - 1
        out = _conv_stage(data, cp["w_col"], cp["cs"], cp["cb"],
                          cp["pool_sel"], cp["pack_sel"], pack_pairs=last)
        if last:
            # FullOctree2Voxel(2): identity; flatten order is (voxel-major, channel)
            # -- equivalent to torch's flatten up to a fixed permutation of w1's
            # input dim (weights are generated internally with this convention).
            feat = out                               # (B, 64*64) bf16
        else:
            data = out                               # (B, D/2, D/2, D/2, Cout)
    # TODO(synk): Dropout implemented as identity (eval mode).
    return _header(feat, params["w1"], params["s1"], params["b1"],
                   params["w2p"], params["b2p"], nout=nout)


class LeNetPallas:
    def __init__(self, depth, channel_in, nout, key):
        assert depth >= 3
        self.depth, self.channel_in, self.nout = depth, channel_in, nout
        channels = [2 ** max(9 - i, 2) for i in range(depth + 1)]
        channels.append(channel_in)
        keys = iter(jax.random.split(key, 64))

        conv = []
        for d in range(depth, 2, -1):
            cin, cout = channels[d + 1], channels[d]
            D = 2 ** d
            w = 0.05 * jax.random.normal(next(keys), (cout, cin, 3, 3, 3), jnp.float32)
            gamma = 1.0 + 0.1 * jax.random.normal(next(keys), (cout,), jnp.float32)
            beta = 0.1 * jax.random.normal(next(keys), (cout,), jnp.float32)
            mean = 0.1 * jax.random.normal(next(keys), (cout,), jnp.float32)
            var = 1.0 + jnp.abs(jax.random.normal(next(keys), (cout,), jnp.float32))
            s, b = _fold_bn(gamma, beta, mean, var)
            # im2col weight: row t*cin + c == w[:, c, kz, ky, kx] with t = kz*9+ky*3+kx,
            # zero-padded along K to a lane-friendly multiple of 128, bf16 for the MXU.
            kp = _round_up(27 * cin, 128)
            w_col = jnp.transpose(w, (2, 3, 4, 1, 0)).reshape(27 * cin, cout)
            w_col = jnp.pad(w_col, ((0, kp - 27 * cin), (0, 0))).astype(jnp.bfloat16)
            pool_sel, pack_sel = _pool_pack_selectors(D)
            conv.append(dict(
                w_col=w_col,
                cs=s.reshape(1, cout).astype(jnp.float32),
                cb=b.reshape(1, cout).astype(jnp.float32),
                pool_sel=pool_sel,
                pack_sel=pack_sel))

        # Header: Dropout -> FcBnRelu(channels[3]*64, channels[2]) -> Dropout -> Linear
        fc_in, hid = channels[3] * 64, channels[2]
        w1 = 0.02 * jax.random.normal(next(keys), (fc_in, hid), jnp.float32)
        gamma = 1.0 + 0.1 * jax.random.normal(next(keys), (hid,), jnp.float32)
        beta = 0.1 * jax.random.normal(next(keys), (hid,), jnp.float32)
        mean = 0.1 * jax.random.normal(next(keys), (hid,), jnp.float32)
        var = 1.0 + jnp.abs(jax.random.normal(next(keys), (hid,), jnp.float32))
        s1, b1 = _fold_bn(gamma, beta, mean, var)
        w2 = 0.05 * jax.random.normal(next(keys), (hid, nout), jnp.float32)
        b2 = 0.05 * jax.random.normal(next(keys), (nout,), jnp.float32)

        noutp = _round_up(nout, 128)               # lane-dense, zero-padded fc2
        w2p = jnp.zeros((hid, noutp), jnp.float32).at[:, :nout].set(w2)
        b2p = jnp.zeros((1, noutp), jnp.float32).at[0, :nout].set(b2)

        self.params = dict(
            conv=conv,
            w1=w1.astype(jnp.bfloat16),
            s1=s1.reshape(1, hid).astype(jnp.float32),
            b1=b1.reshape(1, hid).astype(jnp.float32),
            w2p=w2p.astype(jnp.bfloat16),
            b2p=b2p,
        )
        self._fwd = jax.jit(functools.partial(_lenet_forward, nout=nout))

    def __call__(self, x):
        assert x.shape[1] == self.channel_in
        return self._fwd(self.params, x)


if __name__ == "__main__":
    key = jax.random.PRNGKey(0)
    kp, kx = jax.random.split(key)

    depth, channel_in, nout, batch = 3, 4, 10, 2
    model = LeNetPallas(depth, channel_in, nout, kp)

    # Octree feature at depth 3 of a full octree -> dense 8x8x8 voxel grid.
    x = jax.random.normal(
        kx, (batch, channel_in, 2 ** depth, 2 ** depth, 2 ** depth), dtype=jnp.float32)

    out = model(x)
    out = jax.block_until_ready(out)
    assert out.shape == (batch, nout)
    print("KERNEL_OK")
</pallas_src>

<mosaic_0001>
module attributes {stable_mosaic.version = 11 : i64} {
  func.func @_conv_bn_relu_pool_kernel(%arg0: i32, %arg1: memref<512x128xbf16, #tpu.memory_space<vmem>>, %arg2: memref<128x64xbf16, #tpu.memory_space<vmem>>, %arg3: memref<1x64xf32, #tpu.memory_space<vmem>>, %arg4: memref<1x64xf32, #tpu.memory_space<vmem>>, %arg5: memref<512x512xbf16, #tpu.memory_space<vmem>>, %arg6: memref<64x64xbf16, #tpu.memory_space<vmem>>, %arg7: memref<32x128xbf16, #tpu.memory_space<vmem>>) attributes {dimension_semantics = [#tpu.dimension_semantics<parallel>], iteration_bounds = array<i64: 2>, scalar_prefetch = 0 : i64, scratch_operands = 0 : i64, tpu.core_type = #tpu.core_type<tc>, window_params = [{transform_indices = @transform_0, window_bounds = array<i64: 512, 128>}, {pipeline_mode = #tpu.pipeline_mode<synchronous>, transform_indices = @transform_1, window_bounds = array<i64: 128, 64>}, {pipeline_mode = #tpu.pipeline_mode<synchronous>, transform_indices = @transform_2, window_bounds = array<i64: 1, 64>}, {pipeline_mode = #tpu.pipeline_mode<synchronous>, transform_indices = @transform_3, window_bounds = array<i64: 1, 64>}, {pipeline_mode = #tpu.pipeline_mode<synchronous>, transform_indices = @transform_4, window_bounds = array<i64: 512, 512>}, {pipeline_mode = #tpu.pipeline_mode<synchronous>, transform_indices = @transform_5, window_bounds = array<i64: 64, 64>}, {transform_indices = @transform_6, window_bounds = array<i64: 32, 128>}]} {
    %c0 = arith.constant 0 : index
    %c0_0 = arith.constant 0 : index
    %0 = vector.load %arg1[%c0, %c0_0] : memref<512x128xbf16, #tpu.memory_space<vmem>>, vector<512x128xbf16>
    %c0_1 = arith.constant 0 : index
    %c0_2 = arith.constant 0 : index
    %1 = vector.load %arg2[%c0_1, %c0_2] : memref<128x64xbf16, #tpu.memory_space<vmem>>, vector<128x64xbf16>
    %cst = arith.constant dense<0.000000e+00> : vector<512x64xf32>
    %2 = tpu.matmul %0, %1, %cst {dimension_numbers = #tpu.dot_dimension_numbers<[1], [0], [0], [1], [0, 0, 1, 1], [], []>} : vector<512x128xbf16>, vector<128x64xbf16>, vector<512x64xf32> -> vector<512x64xf32>
    %c0_3 = arith.constant 0 : index
    %c0_4 = arith.constant 0 : index
    %3 = vector.load %arg3[%c0_3, %c0_4] : memref<1x64xf32, #tpu.memory_space<vmem>>, vector<1x64xf32>
    %4 = vector.broadcast %3 : vector<1x64xf32> to vector<512x64xf32>
    %5 = arith.mulf %2, %4 : vector<512x64xf32>
    %c0_5 = arith.constant 0 : index
    %c0_6 = arith.constant 0 : index
    %6 = vector.load %arg4[%c0_5, %c0_6] : memref<1x64xf32, #tpu.memory_space<vmem>>, vector<1x64xf32>
    %7 = vector.broadcast %6 : vector<1x64xf32> to vector<512x64xf32>
    %8 = arith.addf %5, %7 : vector<512x64xf32>
    %cst_7 = arith.constant 0.000000e+00 : f32
    %9 = vector.broadcast %cst_7 : f32 to vector<512x64xf32>
    %10 = arith.maximumf %8, %9 : vector<512x64xf32>
    %11 = arith.truncf %10 : vector<512x64xf32> to vector<512x64xbf16>
    %c0_8 = arith.constant 0 : index
    %c0_9 = arith.constant 0 : index
    %12 = vector.load %arg5[%c0_8, %c0_9] : memref<512x512xbf16, #tpu.memory_space<vmem>>, vector<64x512xbf16>
    %cst_10 = arith.constant dense<0.000000e+00> : vector<64x64xf32>
    %13 = tpu.matmul %12, %11, %cst_10 {dimension_numbers = #tpu.dot_dimension_numbers<[1], [0], [0], [1], [0, 0, 1, 1], [], []>} : vector<64x512xbf16>, vector<512x64xbf16>, vector<64x64xf32> -> vector<64x64xf32>
    %c64 = arith.constant 64 : index
    %c0_11 = arith.constant 0 : index
    %14 = vector.load %arg5[%c64, %c0_11] : memref<512x512xbf16, #tpu.memory_space<vmem>>, vector<64x512xbf16>
    %cst_12 = arith.constant dense<0.000000e+00> : vector<64x64xf32>
    %15 = tpu.matmul %14, %11, %cst_12 {dimension_numbers = #tpu.dot_dimension_numbers<[1], [0], [0], [1], [0, 0, 1, 1], [], []>} : vector<64x512xbf16>, vector<512x64xbf16>, vector<64x64xf32> -> vector<64x64xf32>
    %16 = arith.maximumf %13, %15 : vector<64x64xf32>
    %c128 = arith.constant 128 : index
    %c0_13 = arith.constant 0 : index
    %17 = vector.load %arg5[%c128, %c0_13] : memref<512x512xbf16, #tpu.memory_space<vmem>>, vector<64x512xbf16>
    %cst_14 = arith.constant dense<0.000000e+00> : vector<64x64xf32>
    %18 = tpu.matmul %17, %11, %cst_14 {dimension_numbers = #tpu.dot_dimension_numbers<[1], [0], [0], [1], [0, 0, 1, 1], [], []>} : vector<64x512xbf16>, vector<512x64xbf16>, vector<64x64xf32> -> vector<64x64xf32>
    %19 = arith.maximumf %16, %18 : vector<64x64xf32>
    %c192 = arith.constant 192 : index
    %c0_15 = arith.constant 0 : index
    %20 = vector.load %arg5[%c192, %c0_15] : memref<512x512xbf16, #tpu.memory_space<vmem>>, vector<64x512xbf16>
    %cst_16 = arith.constant dense<0.000000e+00> : vector<64x64xf32>
    %21 = tpu.matmul %20, %11, %cst_16 {dimension_numbers = #tpu.dot_dimension_numbers<[1], [0], [0], [1], [0, 0, 1, 1], [], []>} : vector<64x512xbf16>, vector<512x64xbf16>, vector<64x64xf32> -> vector<64x64xf32>
    %22 = arith.maximumf %19, %21 : vector<64x64xf32>
    %c256 = arith.constant 256 : index
    %c0_17 = arith.constant 0 : index
    %23 = vector.load %arg5[%c256, %c0_17] : memref<512x512xbf16, #tpu.memory_space<vmem>>, vector<64x512xbf16>
    %cst_18 = arith.constant dense<0.000000e+00> : vector<64x64xf32>
    %24 = tpu.matmul %23, %11, %cst_18 {dimension_numbers = #tpu.dot_dimension_numbers<[1], [0], [0], [1], [0, 0, 1, 1], [], []>} : vector<64x512xbf16>, vector<512x64xbf16>, vector<64x64xf32> -> vector<64x64xf32>
    %25 = arith.maximumf %22, %24 : vector<64x64xf32>
    %c320 = arith.constant 320 : index
    %c0_19 = arith.constant 0 : index
    %26 = vector.load %arg5[%c320, %c0_19] : memref<512x512xbf16, #tpu.memory_space<vmem>>, vector<64x512xbf16>
    %cst_20 = arith.constant dense<0.000000e+00> : vector<64x64xf32>
    %27 = tpu.matmul %26, %11, %cst_20 {dimension_numbers = #tpu.dot_dimension_numbers<[1], [0], [0], [1], [0, 0, 1, 1], [], []>} : vector<64x512xbf16>, vector<512x64xbf16>, vector<64x64xf32> -> vector<64x64xf32>
    %28 = arith.maximumf %25, %27 : vector<64x64xf32>
    %c384 = arith.constant 384 : index
    %c0_21 = arith.constant 0 : index
    %29 = vector.load %arg5[%c384, %c0_21] : memref<512x512xbf16, #tpu.memory_space<vmem>>, vector<64x512xbf16>
    %cst_22 = arith.constant dense<0.000000e+00> : vector<64x64xf32>
    %30 = tpu.matmul %29, %11, %cst_22 {dimension_numbers = #tpu.dot_dimension_numbers<[1], [0], [0], [1], [0, 0, 1, 1], [], []>} : vector<64x512xbf16>, vector<512x64xbf16>, vector<64x64xf32> -> vector<64x64xf32>
    %31 = arith.maximumf %28, %30 : vector<64x64xf32>
    %c448 = arith.constant 448 : index
    %c0_23 = arith.constant 0 : index
    %32 = vector.load %arg5[%c448, %c0_23] : memref<512x512xbf16, #tpu.memory_space<vmem>>, vector<64x512xbf16>
    %cst_24 = arith.constant dense<0.000000e+00> : vector<64x64xf32>
    %33 = tpu.matmul %32, %11, %cst_24 {dimension_numbers = #tpu.dot_dimension_numbers<[1], [0], [0], [1], [0, 0, 1, 1], [], []>} : vector<64x512xbf16>, vector<512x64xbf16>, vector<64x64xf32> -> vector<64x64xf32>
    %34 = arith.maximumf %31, %33 : vector<64x64xf32>
    %35 = arith.truncf %34 : vector<64x64xf32> to vector<64x64xbf16>
    %c0_25 = arith.constant 0 : index
    %c0_26 = arith.constant 0 : index
    %36 = vector.load %arg6[%c0_25, %c0_26] : memref<64x64xbf16, #tpu.memory_space<vmem>>, vector<32x64xbf16>
    %cst_27 = arith.constant dense<0.000000e+00> : vector<32x64xf32>
    %37 = tpu.matmul %36, %35, %cst_27 {dimension_numbers = #tpu.dot_dimension_numbers<[1], [0], [0], [1], [0, 0, 1, 1], [], []>} : vector<32x64xbf16>, vector<64x64xbf16>, vector<32x64xf32> -> vector<32x64xf32>
    %c32 = arith.constant 32 : index
    %c0_28 = arith.constant 0 : index
    %38 = vector.load %arg6[%c32, %c0_28] : memref<64x64xbf16, #tpu.memory_space<vmem>>, vector<32x64xbf16>
    %cst_29 = arith.constant dense<0.000000e+00> : vector<32x64xf32>
    %39 = tpu.matmul %38, %35, %cst_29 {dimension_numbers = #tpu.dot_dimension_numbers<[1], [0], [0], [1], [0, 0, 1, 1], [], []>} : vector<32x64xbf16>, vector<64x64xbf16>, vector<32x64xf32> -> vector<32x64xf32>
    %40 = tpu.concatenate %37, %39 in 1 : vector<32x64xf32>, vector<32x64xf32> -> vector<32x128xf32>
    %41 = arith.truncf %40 : vector<32x128xf32> to vector<32x128xbf16>
    %c0_30 = arith.constant 0 : index
    %c0_31 = arith.constant 0 : index
    %42 = vector.load %arg7[%c0_30, %c0_31] : memref<32x128xbf16, #tpu.memory_space<vmem>>, vector<32x128xbf16>
    tpu.vector_store %arg7[%c0_30, %c0_31], %41 {strides = array<i32>} : memref<32x128xbf16, #tpu.memory_space<vmem>>, vector<32x128xbf16>,
    return
  }
  func.func @transform_0(%arg0: i32) -> (i32, i32) {
    %c0_i32 = arith.constant 0 : i32
    %c0_i32_0 = arith.constant 0 : i32
    return %arg0, %c0_i32 : i32, i32
  }
  func.func @transform_1(%arg0: i32) -> (i32, i32) {
    %c0_i32 = arith.constant 0 : i32
    %c0_i32_0 = arith.constant 0 : i32
    %c0_i32_1 = arith.constant 0 : i32
    return %c0_i32, %c0_i32_0 : i32, i32
  }
  func.func @transform_2(%arg0: i32) -> (i32, i32) {
    %c0_i32 = arith.constant 0 : i32
    %c0_i32_0 = arith.constant 0 : i32
    %c0_i32_1 = arith.constant 0 : i32
    return %c0_i32, %c0_i32_0 : i32, i32
  }
  func.func @transform_3(%arg0: i32) -> (i32, i32) {
    %c0_i32 = arith.constant 0 : i32
    %c0_i32_0 = arith.constant 0 : i32
    %c0_i32_1 = arith.constant 0 : i32
    return %c0_i32, %c0_i32_0 : i32, i32
  }
  func.func @transform_4(%arg0: i32) -> (i32, i32) {
    %c0_i32 = arith.constant 0 : i32
    %c0_i32_0 = arith.constant 0 : i32
    %c0_i32_1 = arith.constant 0 : i32
    return %c0_i32, %c0_i32_0 : i32, i32
  }
  func.func @transform_5(%arg0: i32) -> (i32, i32) {
    %c0_i32 = arith.constant 0 : i32
    %c0_i32_0 = arith.constant 0 : i32
    %c0_i32_1 = arith.constant 0 : i32
    return %c0_i32, %c0_i32_0 : i32, i32
  }
  func.func @transform_6(%arg0: i32) -> (i32, i32) {
    %c0_i32 = arith.constant 0 : i32
    %c0_i32_0 = arith.constant 0 : i32
    return %arg0, %c0_i32 : i32, i32
  }
}

module attributes {stable_mosaic.version = 11 : i64} {
  func.func @_header_kernel(%arg0: i32, %arg1: memref<2x1024xbf16, #tpu.memory_space<vmem>>, %arg2: memref<1024x128xbf16, #tpu.memory_space<vmem>>, %arg3: memref<1x128xf32, #tpu.memory_space<vmem>>, %arg4: memref<1x128xf32, #tpu.memory_space<vmem>>, %arg5: memref<128x128xbf16, #tpu.memory_space<vmem>>, %arg6: memref<1x128xf32, #tpu.memory_space<vmem>>, %arg7: memref<2x128xf32, #tpu.memory_space<vmem>>, %arg8: memref<2x128xf32, #tpu.memory_space<vmem>>) attributes {dimension_semantics = [#tpu.dimension_semantics<arbitrary>], iteration_bounds = array<i64: 4>, scalar_prefetch = 0 : i64, scratch_operands = 1 : i64, tpu.core_type = #tpu.core_type<tc>, window_params = [{transform_indices = @transform_0, window_bounds = array<i64: 2, 1024>}, {transform_indices = @transform_1, window_bounds = array<i64: 1024, 128>}, {pipeline_mode = #tpu.pipeline_mode<synchronous>, transform_indices = @transform_2, window_bounds = array<i64: 1, 128>}, {pipeline_mode = #tpu.pipeline_mode<synchronous>, transform_indices = @transform_3, window_bounds = array<i64: 1, 128>}, {pipeline_mode = #tpu.pipeline_mode<synchronous>, transform_indices = @transform_4, window_bounds = array<i64: 128, 128>}, {pipeline_mode = #tpu.pipeline_mode<synchronous>, transform_indices = @transform_5, window_bounds = array<i64: 1, 128>}, {pipeline_mode = #tpu.pipeline_mode<synchronous>, transform_indices = @transform_6, window_bounds = array<i64: 2, 128>}]} {
    %c0_i32 = arith.constant 0 : i32
    %0 = arith.cmpi eq, %arg0, %c0_i32 : i32
    %1 = arith.extui %0 : i1 to i32
    %c0_i32_0 = arith.constant 0 : i32
    %2 = arith.cmpi ne, %1, %c0_i32_0 : i32
    scf.if %2 {
      %cst_9 = arith.constant 0.000000e+00 : f32
      %12 = vector.broadcast %cst_9 : f32 to vector<2x128xf32>
      %c0_10 = arith.constant 0 : index
      %c0_11 = arith.constant 0 : index
      %13 = vector.load %arg8[%c0_10, %c0_11] : memref<2x128xf32, #tpu.memory_space<vmem>>, vector<2x128xf32>
      tpu.vector_store %arg8[%c0_10, %c0_11], %12 {strides = array<i32>} : memref<2x128xf32, #tpu.memory_space<vmem>>, vector<2x128xf32>,
    } else {
    }
    %c0 = arith.constant 0 : index
    %c0_1 = arith.constant 0 : index
    %3 = vector.load %arg8[%c0, %c0_1] : memref<2x128xf32, #tpu.memory_space<vmem>>, vector<2x128xf32>
    %c0_2 = arith.constant 0 : index
    %c0_3 = arith.constant 0 : index
    %4 = vector.load %arg1[%c0_2, %c0_3] : memref<2x1024xbf16, #tpu.memory_space<vmem>>, vector<2x1024xbf16>
    %c0_4 = arith.constant 0 : index
    %c0_5 = arith.constant 0 : index
    %5 = vector.load %arg2[%c0_4, %c0_5] : memref<1024x128xbf16, #tpu.memory_space<vmem>>, vector<1024x128xbf16>
    %cst = arith.constant dense<0.000000e+00> : vector<2x128xf32>
    %6 = tpu.matmul %4, %5, %cst {dimension_numbers = #tpu.dot_dimension_numbers<[1], [0], [0], [1], [0, 0, 1, 1], [], []>} : vector<2x1024xbf16>, vector<1024x128xbf16>, vector<2x128xf32> -> vector<2x128xf32>
    %7 = arith.addf %3, %6 : vector<2x128xf32>
    %c0_6 = arith.constant 0 : index
    %c0_7 = arith.constant 0 : index
    %8 = vector.load %arg8[%c0_6, %c0_7] : memref<2x128xf32, #tpu.memory_space<vmem>>, vector<2x128xf32>
    tpu.vector_store %arg8[%c0_6, %c0_7], %7 {strides = array<i32>} : memref<2x128xf32, #tpu.memory_space<vmem>>, vector<2x128xf32>,
    %c3_i32 = arith.constant 3 : i32
    %9 = arith.cmpi eq, %arg0, %c3_i32 : i32
    %10 = arith.extui %9 : i1 to i32
    %c0_i32_8 = arith.constant 0 : i32
    %11 = arith.cmpi ne, %10, %c0_i32_8 : i32
    scf.if %11 {
      %c0_9 = arith.constant 0 : index
      %c0_10 = arith.constant 0 : index
      %12 = vector.load %arg8[%c0_9, %c0_10] : memref<2x128xf32, #tpu.memory_space<vmem>>, vector<2x128xf32>
      %c0_11 = arith.constant 0 : index
      %c0_12 = arith.constant 0 : index
      %13 = vector.load %arg3[%c0_11, %c0_12] : memref<1x128xf32, #tpu.memory_space<vmem>>, vector<1x128xf32>
      %14 = vector.broadcast %13 : vector<1x128xf32> to vector<2x128xf32>
      %15 = arith.mulf %12, %14 : vector<2x128xf32>
      %c0_13 = arith.constant 0 : index
      %c0_14 = arith.constant 0 : index
      %16 = vector.load %arg4[%c0_13, %c0_14] : memref<1x128xf32, #tpu.memory_space<vmem>>, vector<1x128xf32>
      %17 = vector.broadcast %16 : vector<1x128xf32> to vector<2x128xf32>
      %18 = arith.addf %15, %17 : vector<2x128xf32>
      %cst_15 = arith.constant 0.000000e+00 : f32
      %19 = vector.broadcast %cst_15 : f32 to vector<2x128xf32>
      %20 = arith.maximumf %18, %19 : vector<2x128xf32>
      %21 = arith.truncf %20 : vector<2x128xf32> to vector<2x128xbf16>
      %c0_16 = arith.constant 0 : index
      %c0_17 = arith.constant 0 : index
      %22 = vector.load %arg5[%c0_16, %c0_17] : memref<128x128xbf16, #tpu.memory_space<vmem>>, vector<128x128xbf16>
      %cst_18 = arith.constant dense<0.000000e+00> : vector<2x128xf32>
      %23 = tpu.matmul %21, %22, %cst_18 {dimension_numbers = #tpu.dot_dimension_numbers<[1], [0], [0], [1], [0, 0, 1, 1], [], []>} : vector<2x128xbf16>, vector<128x128xbf16>, vector<2x128xf32> -> vector<2x128xf32>
      %c0_19 = arith.constant 0 : index
      %c0_20 = arith.constant 0 : index
      %24 = vector.load %arg6[%c0_19, %c0_20] : memref<1x128xf32, #tpu.memory_space<vmem>>, vector<1x128xf32>
      %25 = vector.broadcast %24 : vector<1x128xf32> to vector<2x128xf32>
      %26 = arith.addf %23, %25 : vector<2x128xf32>
      %c0_21 = arith.constant 0 : index
      %c0_22 = arith.constant 0 : index
      %27 = vector.load %arg7[%c0_21, %c0_22] : memref<2x128xf32, #tpu.memory_space<vmem>>, vector<2x128xf32>
      tpu.vector_store %arg7[%c0_21, %c0_22], %26 {strides = array<i32>} : memref<2x128xf32, #tpu.memory_space<vmem>>, vector<2x128xf32>,
    } else {
    }
    return
  }
  func.func @transform_0(%arg0: i32) -> (i32, i32) {
    %c0_i32 = arith.constant 0 : i32
    %c0_i32_0 = arith.constant 0 : i32
    return %c0_i32, %arg0 : i32, i32
  }
  func.func @transform_1(%arg0: i32) -> (i32, i32) {
    %c0_i32 = arith.constant 0 : i32
    %c0_i32_0 = arith.constant 0 : i32
    return %arg0, %c0_i32 : i32, i32
  }
  func.func @transform_2(%arg0: i32) -> (i32, i32) {
    %c0_i32 = arith.constant 0 : i32
    %c0_i32_0 = arith.constant 0 : i32
    %c0_i32_1 = arith.constant 0 : i32
    return %c0_i32, %c0_i32_0 : i32, i32
  }
  func.func @transform_3(%arg0: i32) -> (i32, i32) {
    %c0_i32 = arith.constant 0 : i32
    %c0_i32_0 = arith.constant 0 : i32
    %c0_i32_1 = arith.constant 0 : i32
    return %c0_i32, %c0_i32_0 : i32, i32
  }
  func.func @transform_4(%arg0: i32) -> (i32, i32) {
    %c0_i32 = arith.constant 0 : i32
    %c0_i32_0 = arith.constant 0 : i32
    %c0_i32_1 = arith.constant 0 : i32
    return %c0_i32, %c0_i32_0 : i32, i32
  }
  func.func @transform_5(%arg0: i32) -> (i32, i32) {
    %c0_i32 = arith.constant 0 : i32
    %c0_i32_0 = arith.constant 0 : i32
    %c0_i32_1 = arith.constant 0 : i32
    return %c0_i32, %c0_i32_0 : i32, i32
  }
  func.func @transform_6(%arg0: i32) -> (i32, i32) {
    %c0_i32 = arith.constant 0 : i32
    %c0_i32_0 = arith.constant 0 : i32
    %c0_i32_1 = arith.constant 0 : i32
    return %c0_i32, %c0_i32_0 : i32, i32
  }
}

</mosaic_0001>

<bundles_post_ra>
// kernel: _lenet_forward.3
= control target key start
LH: loop header
LB: loop body
LE: loop exit
PB: predicated region body
PF: predicated region fallthrough
CT: control target
= control target key end

     0   :  { %11 = vsyncpa [#allocation4], 0  ;;  %s1564_s21 = smov 0   ;;  %s1730_s0 = inlined_call_operand.vmem [shape: bf16[2,4096], index: 0, kind: input, shape index: {}]   ;;  %s1731_s1 = inlined_call_operand.vmem [shape: bf16[4096,128], index: 1, kind: input, shape index: {}]   ;;  %s1732_s2 = inlined_call_operand.vmem [shape: f32[1,128], index: 2, kind: input, shape index: {}]   ;;  %s1733_s3 = inlined_call_operand.vmem [shape: f32[1,128], index: 3, kind: input, shape index: {}]   ;;  %s1734_s4 = inlined_call_operand.vmem [shape: bf16[128,128], index: 4, kind: input, shape index: {}]   ;;  %s1735_s5 = inlined_call_operand.vmem [shape: f32[1,128], index: 5, kind: input, shape index: {}]   ;;  %s1736_s6 = inlined_call_operand.hbm [shape: f32[2,128], index: 6, kind: output, shape index: {}]  }
   0x1 LB: > { %s1570_s22 = sadd.s32 4294967295, %s1522_s21   ;;  %p1192_p0 = scmp.ge.s32.totalorder %s1522_s21, 1  ;;  %s1522_s21 = sphi %s1564_s21, %s17_s21  }
   0x2   : > { %p219_p1 = scmp.lt.s32.totalorder %s1522_s21, 5 }
   0x4   : > { %p220_p2 = pnand %p1192_p0, %p219_p1 }
   0x5   : > { %s1193_s23 = sshll.u32 (!%p220_p2), %s1570_s22, 3  ;;  %s1194_s24 = sshll.u32 (!%p220_p2), %s1570_s22, 7 }
   0x6   : > { %223 = sbr.rel (%p220_p2) target bundleno = 565 (0x235), region = 44  ;;  %p249_p3 = scmp.lt.s32.totalorder (!%p220_p2), %s1193_s23, 31 }
   0x7   : > { %p254_p4 = scmp.lt.s32.totalorder (!%p220_p2), %s1194_s24, 511  ;;  %p1196_p5 = scmp.ne.s32.totalorder (!%p220_p2), %s1570_s22, 0 }
   0xd   : > { %s1738_s23 = smov (!%p249_p3, %s1193_s23), 31  ;;  %s1740_s24 = smov (!%p254_p4, %s1194_s24), 511 }
   0xe   : > { %s251_s27 = scalar_lea.vmem %s1730_s0, %s1738_s23  ;;  %s1195_s28 = sshll.u32 %s1740_s24, 2  ;;  %v1524_v0 = vmov (!%p1196_p5), 0.0  }
   0xf   : > { %s1585_s7 = scalar_lea.vmem %s1731_s1, %s1195_s28  ;;  %263 = sbr.rel (%p1196_p5) target bundleno = 22 (0x16), region = 48  ;;  %264 = vst [vmem:[#allocation2] sm:$0x3] (!%p1196_p5), %v1524_v0 }
  0x16 PF: > { %v1413_v1 = vld [vmem:[%s1585_s7 + $0x40] sm:$0xff]   ;;  %v1417_v5 = vld [vmem:[%s1585_s7 + $0x48] sm:$0xff]   ;;  %v1421_v9 = vld [vmem:[%s1585_s7 + $0x50] sm:$0xff]   ;;  %v400_v29 = vlaneseq  ;;  %v1525_v37 = vmov 1966171168   ;;  %p1261_p6 = scmp.ne.s32.totalorder %s1570_s22, 3 }
  0x17   : > { %v1414_v2 = vld [vmem:[%s1585_s7 + $0xc0] sm:$0xff]   ;;  %1277 = vmatprep.subr.bf16.mxu0 %v1413_v1  ;;  %v1418_v6 = vld [vmem:[%s1585_s7 + $0xc8] sm:$0xff]   ;;  %v1422_v10 = vld [vmem:[%s1585_s7 + $0xd0] sm:$0xff]   ;;  %v398_v38 = vunpack.c.l.s4 %v1525_v37  ;;  %vm1527_vm0 = vmmov (!%p1261_p6), 0  }
  0x18   : > { %v1415_v3 = vld [vmem:[%s1585_s7] sm:$0xff]   ;;  %1299 = vmatprep.subr.bf16.mxu1 %v1414_v2  ;;  %v1419_v7 = vld [vmem:[%s1585_s7 + $0x8] sm:$0xff]   ;;  %v1423_v11 = vld [vmem:[%s1585_s7 + $0x10] sm:$0xff]   ;;  %v401_v34 = vshrl.u32 %v400_v29, 7 }
  0x19   : > { %v1416_v4 = vld [vmem:[%s1585_s7 + $0x80] sm:$0xff]   ;;  %1278 = vmatpush3.bf16.msra.mxu0 %v1415_v3  ;;  %v1420_v8 = vld [vmem:[%s1585_s7 + $0x88] sm:$0xff]   ;;  %v1424_v12 = vld [vmem:[%s1585_s7 + $0x90] sm:$0xff]   ;;  %v399_v41 = vunpack.c.0.s8 %v398_v38 }
  0x1a   : > { %1300 = vmatpush3.bf16.msra.mxu1 %v1416_v4  ;;  %1279 = vmatprep.subr.bf16.mxu0 %v1417_v5  ;;  %v1425_v13 = vld [vmem:[%s1585_s7 + $0x58] sm:$0xff]   ;;  %v1429_v17 = vld [vmem:[%s1585_s7 + $0x60] sm:$0xff]   ;;  %v1433_v21 = vld [vmem:[%s1585_s7 + $0x68] sm:$0xff]  }
  0x1b   : > { %1301 = vmatprep.subr.bf16.mxu1 %v1418_v6  ;;  %v1426_v14 = vld [vmem:[%s1585_s7 + $0xd8] sm:$0xff]   ;;  %v1430_v18 = vld [vmem:[%s1585_s7 + $0xe0] sm:$0xff]   ;;  %v1434_v22 = vld [vmem:[%s1585_s7 + $0xe8] sm:$0xff]   ;;  %v1627_v42 = vsub.s32 %v399_v41, %v401_v34 }
  0x1c   : > { %v1427_v15 = vld [vmem:[%s1585_s7 + $0x18] sm:$0xff]   ;;  %v1431_v19 = vld [vmem:[%s1585_s7 + $0x20] sm:$0xff]   ;;  %v1435_v23 = vld [vmem:[%s1585_s7 + $0x28] sm:$0xff]  }
  0x1d   : > { %1280 = vmatpush3.bf16.msra.mxu0 %v1419_v7  ;;  %v1428_v16 = vld [vmem:[%s1585_s7 + $0x98] sm:$0xff]   ;;  %v1432_v20 = vld [vmem:[%s1585_s7 + $0xa0] sm:$0xff]   ;;  %v1436_v24 = vld [vmem:[%s1585_s7 + $0xa8] sm:$0xff]  }
  0x1e   : > { %1302 = vmatpush3.bf16.msra.mxu1 %v1420_v8  ;;  %1281 = vmatprep.subr.bf16.mxu0 %v1421_v9  ;;  %v1437_v25 = vld [vmem:[%s1585_s7 + $0x70] sm:$0xff]   ;;  %v1441_v30 = vld [vmem:[%s1585_s7 + $0x78] sm:$0xff]   ;;  %v266_v35 = vld [vmem:[%s251_s27] sm:$0xff] }
  0x1f   : > { %1303 = vmatprep.subr.bf16.mxu1 %v1422_v10  ;;  %v1438_v26 = vld [vmem:[%s1585_s7 + $0xf0] sm:$0xff]   ;;  %v1442_v31 = vld [vmem:[%s1585_s7 + $0xf8] sm:$0xff]   ;;  %v1446_v36 = vld [vmem:[%s1585_s7 + $0x140] sm:$0xff]   ;;  %v396_v40 = vcombine.high %v266_v35, %v266_v35  ;;  %v403_v43 = vrot.slane %v266_v35, %v1627_v42 }
  0x20   : > { %v1439_v27 = vld [vmem:[%s1585_s7 + $0x30] sm:$0xff]   ;;  %v1443_v32 = vld [vmem:[%s1585_s7 + $0x38] sm:$0xff]   ;;  %v1447_v39 = vld [vmem:[%s1585_s7 + $0x1c0] sm:$0xff]  }
  0x21   : > { %1282 = vmatpush3.bf16.msra.mxu0 %v1423_v11  ;;  %v1440_v28 = vld [vmem:[%s1585_s7 + $0xb0] sm:$0xff]   ;;  %v1444_v33 = vld [vmem:[%s1585_s7 + $0xb8] sm:$0xff]   ;;  %v1631_v44 = vrot.slane %v396_v40, %v1627_v42  ;;  %v411_v45 = vcombine.high %v403_v43, %v403_v43  ;;  %v419_v46 = vrot.slane %v403_v43, %v1627_v42  ;;  %v1448_v49 = vld [vmem:[%s1585_s7 + $0x100] sm:$0xff]  }
  0x22   : > { %1304 = vmatpush3.bf16.msra.mxu1 %v1424_v12  ;;  %1283 = vmatprep.subr.bf16.mxu0 %v1425_v13  ;;  %v1450_v52 = vld [vmem:[%s1585_s7 + $0x148] sm:$0xff]   ;;  %v1449_v54 = vld [vmem:[%s1585_s7 + $0x180] sm:$0xff]   ;;  %v1454_v58 = vld [vmem:[%s1585_s7 + $0x150] sm:$0xff]  }
  0x23   : > { %1305 = vmatprep.subr.bf16.mxu1 %v1426_v14  ;;  %v412_v47 = vcombine.high %v1631_v44, %v1631_v44  ;;  %v433_v48 = vrot.slane %v411_v45, %v1627_v42  ;;  %v441_v51 = vcombine.high %v419_v46, %v419_v46  ;;  %v1451_v55 = vld [vmem:[%s1585_s7 + $0x1c8] sm:$0xff]   ;;  %v1455_v60 = vld [vmem:[%s1585_s7 + $0x1d0] sm:$0xff]   ;;  %v1458_v62 = vld [vmem:[%s1585_s7 + $0x158] sm:$0xff]  }
  0x24   : > { %v1452_v57 = vld [vmem:[%s1585_s7 + $0x108] sm:$0xff]   ;;  %v1456_v61 = vld [vmem:[%s1585_s7 + $0x110] sm:$0xff]   ;;  %v1459_v0 = vld [vmem:[%s1585_s7 + $0x1d8] sm:$0xff]  }
  0x25   : > { %1284 = vmatpush3.bf16.msra.mxu0 %v1427_v15  ;;  %v440_v50 = vrot.slane %v412_v47, %v1627_v42  ;;  %869 = vmatprep.mubr.bf16.mxu0 %v433_v48  ;;  %v443_v53 = vcombine.high %v433_v48, %v433_v48  ;;  %v1453_v59 = vld [vmem:[%s1585_s7 + $0x188] sm:$0xff]   ;;  %v1457_v63 = vld [vmem:[%s1585_s7 + $0x190] sm:$0xff]   ;;  %v1460_v1 = vld [vmem:[%s1585_s7 + $0x118] sm:$0xff]   ;;  %v1526_v47 = vmov (!%p1261_p6), 0.0  }
  0x26   : > { %1306 = vmatpush3.bf16.msra.mxu1 %v1428_v16  ;;  %1285 = vmatprep.subr.bf16.mxu0 %v1429_v17  ;;  %v1462_v2 = vld [vmem:[%s1585_s7 + $0x160] sm:$0xff]   ;;  %v1461_v3 = vld [vmem:[%s1585_s7 + $0x198] sm:$0xff]   ;;  %v1466_v6 = vld [vmem:[%s1585_s7 + $0x168] sm:$0xff]  }
  0x27   : > { %1307 = vmatprep.subr.bf16.mxu1 %v1430_v18  ;;  %v444_v56 = vcombine.high %v440_v50, %v440_v50  ;;  %909 = vmatprep.mubr.bf16.mxu1 %v443_v53  ;;  %v1463_v4 = vld [vmem:[%s1585_s7 + $0x1e0] sm:$0xff]   ;;  %v1467_v8 = vld [vmem:[%s1585_s7 + $0x1e8] sm:$0xff]   ;;  %v1470_v10 = vld [vmem:[%s1585_s7 + $0x170] sm:$0xff]   ;;  %v426_v18 = vrot.slane %v1631_v44, %v1627_v42 }
  0x28   : > { %v1464_v5 = vld [vmem:[%s1585_s7 + $0x120] sm:$0xff]   ;;  %v1468_v9 = vld [vmem:[%s1585_s7 + $0x128] sm:$0xff]   ;;  %v1471_v12 = vld [vmem:[%s1585_s7 + $0x1f0] sm:$0xff]  }
  0x29   : > { %1286 = vmatpush3.bf16.msra.mxu0 %v1431_v19  ;;  %v1465_v7 = vld [vmem:[%s1585_s7 + $0x1a0] sm:$0xff]   ;;  %v1469_v11 = vld [vmem:[%s1585_s7 + $0x1a8] sm:$0xff]   ;;  %v1472_v13 = vld [vmem:[%s1585_s7 + $0x130] sm:$0xff]  }
  0x2a   : > { %1308 = vmatpush3.bf16.msra.mxu1 %v1432_v20  ;;  %1287 = vmatprep.subr.bf16.mxu0 %v1433_v21  ;;  %v1474_v14 = vld [vmem:[%s1585_s7 + $0x178] sm:$0xff]   ;;  %v1473_v15 = vld [vmem:[%s1585_s7 + $0x1b0] sm:$0xff]   ;;  %v442_v20 = vcombine.high %v426_v18, %v426_v18  ;;  %v265_v42 = vld [vmem:[#allocation2] sm:$0x3] }
  0x2b   : > { %1309 = vmatprep.subr.bf16.mxu1 %v1434_v22  ;;  %v1475_v16 = vld [vmem:[%s1585_s7 + $0x1f8] sm:$0xff]   ;;  %v1479_v48 = vld [vmem:[%s1734_s4 + $0x8] sm:$0xff] (!%p1261_p6)   ;;  %v1262_v53 = vld [vmem:[%s1732_s2] ss:$0 sm:$0xff] (!%p1261_p6) }
  0x2c   : > { %v1476_v17 = vld [vmem:[%s1585_s7 + $0x138] sm:$0xff]  }
  0x2d   : > { %1288 = vmatpush3.bf16.msra.mxu0 %v1435_v23  ;;  %v1477_v19 = vld [vmem:[%s1585_s7 + $0x1b8] sm:$0xff]  }
  0x2e   : > { %1310 = vmatpush3.bf16.msra.mxu1 %v1436_v24  ;;  %1289 = vmatprep.subr.bf16.mxu0 %v1437_v25 }
  0x2f   : > { %1311 = vmatprep.subr.bf16.mxu1 %v1438_v26 }
  0x31   : > { %1290 = vmatpush3.bf16.msra.mxu0 %v1439_v27 }
  0x32   : > { %1312 = vmatpush3.bf16.msra.mxu1 %v1440_v28  ;;  %1291 = vmatprep.subr.bf16.mxu0 %v1441_v30 }
  0x33   : > { %1313 = vmatprep.subr.bf16.mxu1 %v1442_v31 }
  0x35   : > { %1292 = vmatpush3.bf16.msra.mxu0 %v1443_v32 }
  0x36   : > { %1314 = vmatpush3.bf16.msra.mxu1 %v1444_v33  ;;  %1321 = vmatprep.subr.bf16.mxu0 %v1446_v36 }
  0x37   : > { %1343 = vmatprep.subr.bf16.mxu1 %v1447_v39 }
  0x38   : > { %870 = vmatmul.mubr.bf16.vlgmr.msra.gmra.mrb[0].mxu0 %v419_v46  ;;  %v1478_v46 = vld [vmem:[%s1734_s4] sm:$0xff] (!%p1261_p6)  }
  0x39   : > { %1322 = vmatpush3.bf16.msra.mxu0 %v1448_v49  ;;  %910 = vmatmul.mubr.bf16.vlgmr.msra.gmra.mrb[0].mxu1 %v441_v51  ;;  %v1480_v49 = vld [vmem:[%s1734_s4 + $0x10] sm:$0xff] (!%p1261_p6)   ;;  %v1482_v51 = vld [vmem:[%s1734_s4 + $0x20] sm:$0xff] (!%p1261_p6)  }
  0x3a   : > { %1323 = vmatprep.subr.bf16.mxu0 %v1450_v52  ;;  %1344 = vmatpush3.bf16.msra.mxu1 %v1449_v54 }
  0x3b   : > { %949 = vmatprep.mubr.bf16.mxu0 %v440_v50  ;;  %1345 = vmatprep.subr.bf16.mxu1 %v1451_v55  ;;  %v1481_v50 = vld [vmem:[%s1734_s4 + $0x18] sm:$0xff] (!%p1261_p6)   ;;  %v1483_v55 = vld [vmem:[%s1734_s4 + $0x28] sm:$0xff] (!%p1261_p6)  }
  0x3c   : > { %989 = vmatprep.mubr.bf16.mxu1 %v444_v56  ;;  %v1263_v56 = vld [vmem:[%s1733_s3] ss:$0 sm:$0xff] (!%p1261_p6) }
  0x3d   : > { %1324 = vmatpush3.bf16.msra.mxu0 %v1452_v57 }
  0x3e   : > { %1325 = vmatprep.subr.bf16.mxu0 %v1454_v58  ;;  %1346 = vmatpush3.bf16.msra.mxu1 %v1453_v59  ;;  %v1484_v58 = vld [vmem:[%s1734_s4 + $0x30] sm:$0xff] (!%p1261_p6)  }
  0x3f   : > { %1347 = vmatprep.subr.bf16.mxu1 %v1455_v60  ;;  %v1485_v60 = vld [vmem:[%s1734_s4 + $0x38] sm:$0xff] (!%p1261_p6)  }
  0x41   : > { %1326 = vmatpush3.bf16.msra.mxu0 %v1456_v61 }
  0x42   : > { %1327 = vmatprep.subr.bf16.mxu0 %v1458_v62  ;;  %1348 = vmatpush3.bf16.msra.mxu1 %v1457_v63  ;;  %v1264_v62 = vld [vmem:[%s1735_s5] ss:$0 sm:$0xff] (!%p1261_p6) }
  0x43   : > { %1349 = vmatprep.subr.bf16.mxu1 %v1459_v0 }
  0x45   : > { %1328 = vmatpush3.bf16.msra.mxu0 %v1460_v1 }
  0x46   : > { %1329 = vmatprep.subr.bf16.mxu0 %v1462_v2  ;;  %1350 = vmatpush3.bf16.msra.mxu1 %v1461_v3 }
  0x47   : > { %1351 = vmatprep.subr.bf16.mxu1 %v1463_v4 }
  0x49   : > { %1330 = vmatpush3.bf16.msra.mxu0 %v1464_v5 }
  0x4a   : > { %1331 = vmatprep.subr.bf16.mxu0 %v1466_v6  ;;  %1352 = vmatpush3.bf16.msra.mxu1 %v1465_v7 }
  0x4b   : > { %1353 = vmatprep.subr.bf16.mxu1 %v1467_v8 }
  0x4d   : > { %1332 = vmatpush3.bf16.msra.mxu0 %v1468_v9 }
  0x4e   : > { %1333 = vmatprep.subr.bf16.mxu0 %v1470_v10  ;;  %1354 = vmatpush3.bf16.msra.mxu1 %v1469_v11 }
  0x4f   : > { %1355 = vmatprep.subr.bf16.mxu1 %v1471_v12 }
  0x51   : > { %1334 = vmatpush3.bf16.msra.mxu0 %v1472_v13 }
  0x52   : > { %1335 = vmatprep.subr.bf16.mxu0 %v1474_v14  ;;  %1356 = vmatpush3.bf16.msra.mxu1 %v1473_v15 }
  0x53   : > { %1357 = vmatprep.subr.bf16.mxu1 %v1475_v16 }
  0x55   : > { %1336 = vmatpush3.bf16.msra.mxu0 %v1476_v17 }
  0x56   : > { %1358 = vmatpush3.bf16.msra.mxu1 %v1477_v19  ;;  %1374 = vmatprep.subr.bf16.mxu0 (!%p1261_p6), %v1526_v47 }
  0x58   : > { %950 = vmatmul.mubr.bf16.vlgmr.msra.gmra.mrb[4].mxu0 %v426_v18 }
  0x59   : > { %990 = vmatmul.mubr.bf16.vlgmr.msra.gmra.mrb[4].mxu1 %v442_v20  ;;  %1375 = vmatpush3.bf16.msra.mxu0 (!%p1261_p6), %v1478_v46 }
  0x5a   : > { %1390 = vmatprep.mubr.msk.bf16.mxu0 (!%p1261_p6), %vm1527_vm0, %v1526_v47  ;;  %1376 = vmatprep.subr.bf16.mxu0 (!%p1261_p6), %v1526_v47 }
  0x5d   : > { %1377 = vmatpush3.bf16.msra.mxu0 (!%p1261_p6), %v1479_v48 }
  0x5e   : > { %1378 = vmatprep.subr.bf16.mxu0 (!%p1261_p6), %v1526_v47 }
  0x61   : > { %1379 = vmatpush3.bf16.msra.mxu0 (!%p1261_p6), %v1480_v49 }
  0x62   : > { %1380 = vmatprep.subr.bf16.mxu0 (!%p1261_p6), %v1526_v47 }
  0x65   : > { %1381 = vmatpush3.bf16.msra.mxu0 (!%p1261_p6), %v1481_v50 }
  0x66   : > { %1382 = vmatprep.subr.bf16.mxu0 (!%p1261_p6), %v1526_v47 }
  0x69   : > { %1383 = vmatpush3.bf16.msra.mxu0 (!%p1261_p6), %v1482_v51 }
  0x6a   : > { %1384 = vmatprep.subr.bf16.mxu0 (!%p1261_p6), %v1526_v47 }
  0x6d   : > { %1385 = vmatpush3.bf16.msra.mxu0 (!%p1261_p6), %v1483_v55 }
  0x6e   : > { %1386 = vmatprep.subr.bf16.mxu0 (!%p1261_p6), %v1526_v47 }
  0x71   : > { %1387 = vmatpush3.bf16.msra.mxu0 (!%p1261_p6), %v1484_v58 }
  0x72   : > { %1388 = vmatprep.subr.bf16.mxu0 (!%p1261_p6), %v1526_v47 }
  0x75   : > { %1389 = vmatpush3.bf16.msra.mxu0 (!%p1261_p6), %v1485_v60 }
 0x10b   : > { %v1293_v21 = vpop.f32.mrb[0].mxu0 }
 0x10c   : > { %v1294_v22 = vpop.f32.mrb[1].mxu0  ;;  %v1315_v23 = vpop.f32.mrb[0].mxu1 }
 0x10d   : > { %v1295_v24 = vadd.f32 %v1294_v22, %v1293_v21  ;;  %v1296_v25 = vpop.f32.mrb[2].mxu0  ;;  %v1316_v26 = vpop.f32.mrb[1].mxu1 }
 0x10e   : > { %v1297_v27 = vpop.f32.mrb[3].mxu0  ;;  %v1317_v28 = vadd.f32 %v1316_v26, %v1315_v23  ;;  %v1318_v29 = vpop.f32.mrb[2].mxu1 }
 0x10f   : > { %v1319_v30 = vpop.f32.mrb[3].mxu1 }
 0x110   : > { %v912_v31 = vadd.f32 %v1317_v28, %v1295_v24 }
 0x12b   : > { %v1337_v32 = vpop.f32.mrb[4].mxu0 }
 0x12c   : > { %v1338_v33 = vpop.f32.mrb[5].mxu0  ;;  %v1359_v34 = vpop.f32.mrb[4].mxu1 }
 0x12d   : > { %v1339_v35 = vadd.f32 %v1338_v33, %v1337_v32  ;;  %v1340_v36 = vpop.f32.mrb[6].mxu0  ;;  %v1360_v37 = vpop.f32.mrb[5].mxu1 }
 0x12e   : > { %v1341_v38 = vpop.f32.mrb[7].mxu0  ;;  %v1361_v40 = vadd.f32 %v1360_v37, %v1359_v34  ;;  %v1362_v41 = vpop.f32.mrb[6].mxu1 }
 0x12f   : > { %v952_v39 = vadd.f32 %v1339_v35, %v912_v31  ;;  %v1363_v43 = vpop.f32.mrb[7].mxu1  ;;  %1002 = sbr.rel (%p1261_p6) target bundleno = 540 (0x21c), region = 52 }
 0x131   : > { %v992_v44 = vadd.f32 %v1361_v40, %v952_v39 }
 0x133   : > { %v997_v45 = vadd.f32 %v992_v44, %v265_v42 }
 0x135   : > { %998 = vst [vmem:[#allocation2] sm:$0x3] %v997_v45 }
 0x13c   : > { %v1003_v52 = vld [vmem:[#allocation2] sm:$0x3] }
 0x13d   : > { %v1011_v54 = vmul.f32 %v1262_v53, %v1003_v52 }
 0x13f   : > { %v1019_v57 = vadd.f32 %v1263_v56, %v1011_v54 }
 0x141   : > { %v1020_v59 = vmax.f32 %v1019_v57, 0.0 }
 0x143   : > { %v1021_v61 = vpack.c.bf16 %v1020_v59, %v1020_v59 }
 0x145   : > { %1391 = vmatmul.mubr.bf16.vlgmr.msra.gmra.mrb[0].mxu0 %v1021_v61 }
 0x218   : > { %v1127_v63 = vpop.f32.mrb[0].mxu0 }
 0x219   : > { %v1128_v0 = vadd.f32 %v1264_v62, %v1127_v63  ;;  %v1392_v1 = vpop.f32.mrb[1].mxu0 }
 0x21a   : > { %v1130_v2 = vpop.f32.mrb[2].mxu0 }
 0x21b   : > { %1133 = vst [vmem:[#allocation3] sm:$0x3] %v1128_v0  ;;  %v1393_v3 = vpop.f32.mrb[3].mxu0 }
 0x21c PF: > { %p1398_p7 = scmp.eq.s32.totalorder %s1570_s22, 3  ;;  %s1528_s10 = smov [#allocation3]  }
 0x21d   : > { %s1141_s11 = sshll.u32 %s1528_s10, 4  ;;  %s1142_s11 = int_to_ptr.vmem [resolvable:$true] %s1141_s11 }
 0x21e   : > { %s1486_s12 = scalar_lea.vmem %s1142_s11, 32  ;;  %p1493_p11 = scmp.lt.s32.totalorder %s1142_s11, %s1142_s11 }
 0x21f   : > { %p1487_p8 = scmp.ne.s32.totalorder %s1142_s11, %s1486_s12  ;;  %p1494_p12 = scmp.lt.s32.totalorder %s1486_s12, %s1486_s12 }
 0x221   : > { %p1488_p9 = pnand %p1487_p8, %p1398_p7  ;;  %p1495_p13 = por %p1494_p12, %p1493_p11 }
 0x223   : > { %p1489_p10 = pneg %p1488_p9 }
 0x225   : > { %p1496_p0 = pnand %p1495_p13, %p1489_p10 }
 0x227   : > { %1499 = shalt.err (!%p1496_p0)
}
 0x228   : > { %s1500_s15 = scalar_lea.hbm %s1736_s6, 32 }
 0x229   : > { %p1501_p1 = scmp.ne.s32.totalorder %s1736_s6, %s1500_s15  ;;  %p1506_p4 = scmp.lt.u32.totalorder %s1500_s15, %s1736_s6 }
 0x22b   : > { %p1502_p2 = pnand %p1501_p1, %p1398_p7 }
 0x22d   : > { %p1503_p3 = pneg %p1502_p2 }
 0x22f   : > { %p1508_p5 = pnand %p1506_p4, %p1503_p3 }
 0x231   : > { %1511 = shalt.err (!%p1508_p5)
}
 0x232   : > { %1395 = dma.vmem_to_hbm [thread:$0]  (%p1398_p7), %s1142_s11, 32, %s1736_s6, [#allocation4]  }
 0x233   : > { %1517 = dma.done.wait (%p1398_p7), [#allocation4], 32  }
 0x234   : > { %1519 = vsyncadd (%p1398_p7), [#allocation4], 4294967264 }
 0x235 PF: > { %s17_s21 = sadd.s32 1, %s1522_s21  }
 0x236   : > { %p14_p6 = scmp.ge.s32.totalorder %s17_s21, 6  }
 0x238   :  { %16 = sbr.rel (!%p14_p6) target bundleno = 1 (0x1), region = 82 }
 0x23f   :  { %1154 = vsyncpa [#allocation4], 1 }
 0x240   :  { %1156 = vsyncpa [#allocation4 + $0x1], 1 }

// kernel: _lenet_forward.2
= control target key start
LH: loop header
LB: loop body
LE: loop exit
PB: predicated region body
PF: predicated region fallthrough
CT: control target
= control target key end

     0   :  { %s4509_s21 = smov 0   ;;  %s5765_s0 = inlined_call_operand.vmem [shape: bf16[1024,128], index: 0, kind: input, shape index: {}]   ;;  %s5766_s1 = inlined_call_operand.vmem [shape: bf16[128,64], index: 1, kind: input, shape index: {}]   ;;  %s5767_s2 = inlined_call_operand.vmem [shape: f32[1,64], index: 2, kind: input, shape index: {}]   ;;  %s5768_s3 = inlined_call_operand.vmem [shape: f32[1,64], index: 3, kind: input, shape index: {}]   ;;  %s5769_s4 = inlined_call_operand.vmem [shape: bf16[512,512], index: 4, kind: input, shape index: {}]   ;;  %s5770_s5 = inlined_call_operand.vmem [shape: bf16[64,64], index: 5, kind: input, shape index: {}]   ;;  %s5771_s6 = inlined_call_operand.vmem [shape: bf16[64,128], index: 6, kind: output, shape index: {}]  }
   0x1 LB: > { %s3206_s22 = sadd.s32 4294967295, %s4471_s21   ;;  %p3210_p0 = scmp.ge.s32.totalorder %s4471_s21, 1  ;;  %s4471_s21 = sphi %s4509_s21, %s16_s21  }
   0x2   : > { %p213_p1 = scmp.lt.s32.totalorder %s4471_s21, 3 }
   0x4   : > { %p214_p2 = pnand %p3210_p0, %p213_p1 }
   0x6   : > { %217 = sbr.rel (%p214_p2) target bundleno = 1246 (0x4de), region = 44 }
   0xd   : > { %v4229_v0 = vld [vmem:[%s5766_s1] sm:$0xff]   ;;  %s3211_s25 = sshll.u32 %s3206_s22, 6  ;;  %v4230_v1 = vld [vmem:[%s5766_s1 + $0x8] sm:$0xff]   ;;  %v4231_v2 = vld [vmem:[%s5766_s1 + $0x10] sm:$0xff]   ;;  %vm2985_vm0 = vcmask 523264   ;;  %s4473_s26 = smov 64  }
   0xe   : > { %p244_p3 = scmp.lt.s32.totalorder %s3211_s25, 127  ;;  %4106 = vmatprep.subr.bf16.mxu0 %v4229_v0  ;;  %v4232_v3 = vld [vmem:[%s5766_s1 + $0x18] sm:$0xff]   ;;  %v4233_v5 = vld [vmem:[%s5766_s1 + $0x20] sm:$0xff]   ;;  %v4234_v6 = vld [vmem:[%s5766_s1 + $0x28] sm:$0xff]   ;;  %s3213_s27 = sshll.u32 %s3206_s22, 2 }
   0xf   : > { %4107 = vmatpush3.bf16.msra.mxu0 %v4229_v0  ;;  %v4235_v7 = vld [vmem:[%s5766_s1 + $0x30] sm:$0xff]   ;;  %v4236_v8 = vld [vmem:[%s5766_s1 + $0x38] sm:$0xff]   ;;  %v4589_v42 = vld [vmem:[%s5767_s2] ss:$0 sm:$0xff]  ;;  %p250_p4 = scmp.lt.s32.totalorder %s3213_s27, 7 }
  0x10   : > { %s5783_s25 = smov (!%p244_p3, %s3211_s25), 127  ;;  %4108 = vmatprep.subr.bf16.mxu0 %v4230_v1  ;;  %v4271_v40 = vld [vmem:[%s5769_s4 + $0x104] ss:$16 sps:$4 sm:$0xff]   ;;  %v4594_v44 = vld [vmem:[%s5768_s3] ss:$0 sm:$0xff] }
  0x11   : > { %s3212_s30 = sshll.u32 %s5783_s25, 2  ;;  %v4283_v41 = vld [vmem:[%s5769_s4 + $0x4] ss:$16 sps:$4 sm:$0xff]   ;;  %s5785_s27 = smov (!%p250_p4, %s3213_s27), 7 }
  0x12   : > { %s4531_s9 = scalar_lea.vmem %s5765_s0, %s3212_s30  ;;  %1231 = vmatprep.mubr.bf16.mxu1 %v4283_v41  ;;  %s3214_s28 = sshll.u32 %s5785_s27, 2 }
  0x13   : > { %4109 = vmatpush3.bf16.msra.mxu0 %v4230_v1  ;;  %v4237_v4 = vld [vmem:[%s4531_s9] sm:$0xff]   ;;  %v4238_v9 = vld [vmem:[%s4531_s9 + $0x8] sm:$0xff]   ;;  %v4239_v10 = vld [vmem:[%s4531_s9 + $0x10] sm:$0xff]   ;;  %s253_s7 = scalar_lea.vmem %s5771_s6, %s3214_s28 }
  0x14   : > { %4110 = vmatprep.subr.bf16.mxu0 %v4231_v2  ;;  %4122 = vmatprep.mubr.bf16.mxu0 %v4237_v4  ;;  %v4240_v11 = vld [vmem:[%s4531_s9 + $0x18] sm:$0xff]   ;;  %v4241_v12 = vld [vmem:[%s4531_s9 + $0x20] sm:$0xff]   ;;  %v4242_v13 = vld [vmem:[%s4531_s9 + $0x28] sm:$0xff]  }
  0x15   : > { %v4243_v14 = vld [vmem:[%s4531_s9 + $0x30] sm:$0xff]   ;;  %v4244_v15 = vld [vmem:[%s4531_s9 + $0x38] sm:$0xff]   ;;  %v4245_v16 = vld [vmem:[%s4531_s9 + $0x40] sm:$0xff]  }
  0x16   : > { %v4246_v17 = vld [vmem:[%s4531_s9 + $0x48] sm:$0xff]   ;;  %v4247_v18 = vld [vmem:[%s4531_s9 + $0x50] sm:$0xff]   ;;  %v4248_v19 = vld [vmem:[%s4531_s9 + $0x58] sm:$0xff]  }
  0x17   : > { %4111 = vmatpush3.bf16.msra.mxu0 %v4231_v2  ;;  %v4249_v20 = vld [vmem:[%s4531_s9 + $0x60] sm:$0xff]   ;;  %v4250_v21 = vld [vmem:[%s4531_s9 + $0x68] sm:$0xff]   ;;  %v4251_v22 = vld [vmem:[%s4531_s9 + $0x70] sm:$0xff]  }
  0x18   : > { %4112 = vmatprep.subr.bf16.mxu0 %v4232_v3  ;;  %v4252_v23 = vld [vmem:[%s4531_s9 + $0x78] sm:$0xff]   ;;  %v4253_v24 = vld [vmem:[%s4531_s9 + $0x80] sm:$0xff]   ;;  %v4254_v25 = vld [vmem:[%s4531_s9 + $0x88] sm:$0xff]  }
  0x19   : > { %v4255_v26 = vld [vmem:[%s4531_s9 + $0x90] sm:$0xff]   ;;  %v4256_v27 = vld [vmem:[%s4531_s9 + $0x98] sm:$0xff]   ;;  %v4257_v28 = vld [vmem:[%s4531_s9 + $0xa0] sm:$0xff]  }
  0x1a   : > { %v4258_v29 = vld [vmem:[%s4531_s9 + $0xa8] sm:$0xff]   ;;  %v4259_v30 = vld [vmem:[%s4531_s9 + $0xb0] sm:$0xff]   ;;  %v4260_v31 = vld [vmem:[%s4531_s9 + $0xb8] sm:$0xff]  }
  0x1b   : > { %4113 = vmatpush3.bf16.msra.mxu0 %v4232_v3  ;;  %v4261_v32 = vld [vmem:[%s4531_s9 + $0xc0] sm:$0xff]   ;;  %v4262_v33 = vld [vmem:[%s4531_s9 + $0xc8] sm:$0xff]   ;;  %v4263_v34 = vld [vmem:[%s4531_s9 + $0xd0] sm:$0xff]  }
  0x1c   : > { %4114 = vmatprep.subr.bf16.mxu0 %v4233_v5  ;;  %v4264_v35 = vld [vmem:[%s4531_s9 + $0xd8] sm:$0xff]   ;;  %v4265_v36 = vld [vmem:[%s4531_s9 + $0xe0] sm:$0xff]   ;;  %v4266_v37 = vld [vmem:[%s4531_s9 + $0xe8] sm:$0xff]  }
  0x1d   : > { %v4267_v38 = vld [vmem:[%s4531_s9 + $0xf0] sm:$0xff]   ;;  %v4268_v39 = vld [vmem:[%s4531_s9 + $0xf8] sm:$0xff]  }
  0x1f   : > { %4115 = vmatpush3.bf16.msra.mxu0 %v4233_v5 }
  0x20   : > { %4116 = vmatprep.subr.bf16.mxu0 %v4234_v6 }
  0x23   : > { %4117 = vmatpush3.bf16.msra.mxu0 %v4234_v6 }
  0x24   : > { %4118 = vmatprep.subr.bf16.mxu0 %v4235_v7 }
  0x27   : > { %4119 = vmatpush3.bf16.msra.mxu0 %v4235_v7 }
  0x28   : > { %4120 = vmatprep.subr.bf16.mxu0 %v4236_v8 }
  0x2b   : > { %4121 = vmatpush3.bf16.msra.mxu0 %v4236_v8 }
  0x2e   : > { %4123 = vmatmul.mubr.bf16.vlgmr.msra.gmra.mrb[0].mxu0 %v4238_v9 }
  0x2f   : > { %4126 = vmatprep.mubr.bf16.mxu0 %v4239_v10 }
  0x36   : > { %4127 = vmatmul.mubr.bf16.gmra.mrb[4].mxu0 %v4240_v11 }
  0x37   : > { %4130 = vmatprep.mubr.bf16.mxu0 %v4241_v12 }
  0x3e   : > { %4131 = vmatmul.mubr.bf16.gmra.mrb[8].mxu0 %v4242_v13 }
  0x3f   : > { %4134 = vmatprep.mubr.bf16.mxu0 %v4243_v14 }
  0x46   : > { %4135 = vmatmul.mubr.bf16.gmra.mrb[12].mxu0 %v4244_v15 }
  0x47   : > { %4138 = vmatprep.mubr.bf16.mxu0 %v4245_v16 }
  0x4e   : > { %4139 = vmatmul.mubr.bf16.gmra.mrb[16].mxu0 %v4246_v17 }
  0x4f   : > { %4142 = vmatprep.mubr.bf16.mxu0 %v4247_v18 }
  0x56   : > { %4143 = vmatmul.mubr.bf16.gmra.mrb[20].mxu0 %v4248_v19 }
  0x57   : > { %4146 = vmatprep.mubr.bf16.mxu0 %v4249_v20 }
  0x5e   : > { %4147 = vmatmul.mubr.bf16.gmra.mrb[24].mxu0 %v4250_v21 }
  0x5f   : > { %4150 = vmatprep.mubr.bf16.mxu0 %v4251_v22 }
  0x66   : > { %4151 = vmatmul.mubr.bf16.gmra.mrb[28].mxu0 %v4252_v23 }
  0x67   : > { %4154 = vmatprep.mubr.bf16.mxu0 %v4253_v24 }
  0x6e   : > { %4155 = vmatmul.mubr.bf16.gmra.mrb[32].mxu0 %v4254_v25 }
  0x6f   : > { %4158 = vmatprep.mubr.bf16.mxu0 %v4255_v26 }
  0x76   : > { %4159 = vmatmul.mubr.bf16.gmra.mrb[36].mxu0 %v4256_v27 }
  0x77   : > { %4162 = vmatprep.mubr.bf16.mxu0 %v4257_v28 }
  0x7e   : > { %4163 = vmatmul.mubr.bf16.gmra.mrb[40].mxu0 %v4258_v29 }
  0x7f   : > { %4166 = vmatprep.mubr.bf16.mxu0 %v4259_v30 }
  0x86   : > { %4167 = vmatmul.mubr.bf16.gmra.mrb[44].mxu0 %v4260_v31 }
  0x87   : > { %4170 = vmatprep.mubr.bf16.mxu0 %v4261_v32 }
  0x8e   : > { %4171 = vmatmul.mubr.bf16.gmra.mrb[48].mxu0 %v4262_v33 }
  0x8f   : > { %4174 = vmatprep.mubr.bf16.mxu0 %v4263_v34 }
  0x96   : > { %4175 = vmatmul.mubr.bf16.gmra.mrb[52].mxu0 %v4264_v35 }
  0x97   : > { %4178 = vmatprep.mubr.bf16.mxu0 %v4265_v36 }
  0x9e   : > { %4179 = vmatmul.mubr.bf16.gmra.mrb[56].mxu0 %v4266_v37 }
  0x9f   : > { %4182 = vmatprep.mubr.bf16.mxu0 %v4267_v38 }
  0xa6   : > { %4183 = vmatmul.mubr.bf16.gmra.mrb[60].mxu0 %v4268_v39 }
  0xa7   : > { %1691 = vmatprep.mubr.bf16.mxu0 %v4271_v40 }
 0x101   : > { %v4124_v43 = vpop.f32.mrb[0].mxu0 }
 0x102   : > { %v874_v45 = vmul.f32 %v4124_v43, %v4589_v42  ;;  %v610_v46 = vpop.f32.mrb[1].mxu0 }
 0x103   : > { %v872_v47 = vmul.f32 %v4589_v42, %v610_v46  ;;  %v4125_v48 = vpop.f32.mrb[2].mxu0 }
 0x104   : > { %v945_v49 = vadd.f32 %v4594_v44, %v874_v45  ;;  %v875_v50 = vmul.f32 %v4125_v48, %v4589_v42  ;;  %v613_v51 = vpop.f32.mrb[3].mxu0 }
 0x105   : > { %v943_v52 = vadd.f32 %v4594_v44, %v872_v47  ;;  %v873_v53 = vmul.f32 %v4589_v42, %v613_v51 }
 0x106   : > { %v946_v54 = vadd.f32 %v4594_v44, %v875_v50  ;;  %v1009_v56 = vmax.f32 %v945_v49, 0.0 }
 0x107   : > { %v944_v55 = vadd.f32 %v4594_v44, %v873_v53  ;;  %v1007_v58 = vmax.f32 %v943_v52, 0.0 }
 0x108   : > { %v1010_v57 = vmax.f32 %v946_v54, 0.0 }
 0x109   : > { %v1008_v59 = vmax.f32 %v944_v55, 0.0  ;;  %v4128_v60 = vpop.f32.mrb[4].mxu0 }
 0x10a   : > { %v4604_v61 = vpack.c.bf16 %v1010_v57, %v1009_v56  ;;  %v878_v62 = vmul.f32 %v4128_v60, %v4589_v42  ;;  %v626_v63 = vpop.f32.mrb[5].mxu0 }
 0x10b   : > { %v4607_v0 = vpack.c.bf16 %v1008_v59, %v1007_v58  ;;  %v876_v1 = vmul.f32 %v4589_v42, %v626_v63  ;;  %v4129_v2 = vpop.f32.mrb[6].mxu0 }
 0x10c   : > { %v949_v3 = vadd.f32 %v4594_v44, %v878_v62  ;;  %v879_v4 = vmul.f32 %v4129_v2, %v4589_v42  ;;  %v629_v5 = vpop.f32.mrb[7].mxu0 }
 0x10d   : > { %v947_v6 = vadd.f32 %v4594_v44, %v876_v1  ;;  %v877_v7 = vmul.f32 %v4589_v42, %v629_v5 }
 0x10e   : > { %v950_v8 = vadd.f32 %v4594_v44, %v879_v4  ;;  %v1013_v10 = vmax.f32 %v949_v3, 0.0 }
 0x10f   : > { %v948_v9 = vadd.f32 %v4594_v44, %v877_v7  ;;  %v1011_v12 = vmax.f32 %v947_v6, 0.0 }
 0x110   : > { %v1014_v11 = vmax.f32 %v950_v8, 0.0 }
 0x111   : > { %v1012_v13 = vmax.f32 %v948_v9, 0.0  ;;  %v4132_v14 = vpop.f32.mrb[8].mxu0 }
 0x112   : > { %v4616_v15 = vpack.c.bf16 %v1014_v11, %v1013_v10  ;;  %v882_v16 = vmul.f32 %v4132_v14, %v4589_v42  ;;  %v642_v17 = vpop.f32.mrb[9].mxu0 }
 0x113   : > { %v4619_v18 = vpack.c.bf16 %v1012_v13, %v1011_v12  ;;  %v880_v19 = vmul.f32 %v4589_v42, %v642_v17  ;;  %v4133_v20 = vpop.f32.mrb[10].mxu0 }
 0x114   : > { %v953_v21 = vadd.f32 %v4594_v44, %v882_v16  ;;  %v883_v22 = vmul.f32 %v4133_v20, %v4589_v42  ;;  %v645_v23 = vpop.f32.mrb[11].mxu0 }
 0x115   : > { %v951_v24 = vadd.f32 %v4594_v44, %v880_v19  ;;  %v881_v25 = vmul.f32 %v4589_v42, %v645_v23 }
 0x116   : > { %v954_v26 = vadd.f32 %v4594_v44, %v883_v22  ;;  %v1017_v28 = vmax.f32 %v953_v21, 0.0 }
 0x117   : > { %v952_v27 = vadd.f32 %v4594_v44, %v881_v25  ;;  %v1015_v30 = vmax.f32 %v951_v24, 0.0 }
 0x118   : > { %v1018_v29 = vmax.f32 %v954_v26, 0.0 }
 0x119   : > { %v1016_v31 = vmax.f32 %v952_v27, 0.0  ;;  %v4136_v32 = vpop.f32.mrb[12].mxu0 }
 0x11a   : > { %v4628_v33 = vpack.c.bf16 %v1018_v29, %v1017_v28  ;;  %v886_v34 = vmul.f32 %v4136_v32, %v4589_v42  ;;  %v658_v35 = vpop.f32.mrb[13].mxu0 }
 0x11b   : > { %v4631_v36 = vpack.c.bf16 %v1016_v31, %v1015_v30  ;;  %v884_v37 = vmul.f32 %v4589_v42, %v658_v35  ;;  %v4137_v38 = vpop.f32.mrb[14].mxu0 }
 0x11c   : > { %v957_v39 = vadd.f32 %v4594_v44, %v886_v34  ;;  %v887_v40 = vmul.f32 %v4137_v38, %v4589_v42  ;;  %v661_v41 = vpop.f32.mrb[15].mxu0 }
 0x11d   : > { %v955_v43 = vadd.f32 %v4594_v44, %v884_v37  ;;  %v885_v45 = vmul.f32 %v4589_v42, %v661_v41 }
 0x11e   : > { %v958_v46 = vadd.f32 %v4594_v44, %v887_v40  ;;  %v1021_v48 = vmax.f32 %v957_v39, 0.0 }
 0x11f   : > { %v956_v47 = vadd.f32 %v4594_v44, %v885_v45  ;;  %v1019_v50 = vmax.f32 %v955_v43, 0.0 }
 0x120   : > { %v1022_v49 = vmax.f32 %v958_v46, 0.0 }
 0x121   : > { %v1020_v51 = vmax.f32 %v956_v47, 0.0  ;;  %v4140_v52 = vpop.f32.mrb[16].mxu0 }
 0x122   : > { %v4640_v53 = vpack.c.bf16 %v1022_v49, %v1021_v48  ;;  %v890_v54 = vmul.f32 %v4140_v52, %v4589_v42  ;;  %v674_v55 = vpop.f32.mrb[17].mxu0 }
 0x123   : > { %v4643_v56 = vpack.c.bf16 %v1020_v51, %v1019_v50  ;;  %v888_v57 = vmul.f32 %v4589_v42, %v674_v55  ;;  %v4141_v58 = vpop.f32.mrb[18].mxu0 }
 0x124   : > { %v961_v59 = vadd.f32 %v4594_v44, %v890_v54  ;;  %v891_v60 = vmul.f32 %v4141_v58, %v4589_v42  ;;  %v677_v62 = vpop.f32.mrb[19].mxu0 }
 0x125   : > { %v959_v63 = vadd.f32 %v4594_v44, %v888_v57  ;;  %v889_v1 = vmul.f32 %v4589_v42, %v677_v62 }
 0x126   : > { %v962_v2 = vadd.f32 %v4594_v44, %v891_v60  ;;  %v1025_v4 = vmax.f32 %v961_v59, 0.0 }
 0x127   : > { %v960_v3 = vadd.f32 %v4594_v44, %v889_v1  ;;  %v1023_v6 = vmax.f32 %v959_v63, 0.0 }
 0x128   : > { %v1026_v5 = vmax.f32 %v962_v2, 0.0 }
 0x129   : > { %v1024_v7 = vmax.f32 %v960_v3, 0.0  ;;  %v4144_v8 = vpop.f32.mrb[20].mxu0 }
 0x12a   : > { %v4652_v9 = vpack.c.bf16 %v1026_v5, %v1025_v4  ;;  %v894_v10 = vmul.f32 %v4144_v8, %v4589_v42  ;;  %v690_v11 = vpop.f32.mrb[21].mxu0 }
 0x12b   : > { %v4655_v12 = vpack.c.bf16 %v1024_v7, %v1023_v6  ;;  %v892_v13 = vmul.f32 %v4589_v42, %v690_v11  ;;  %v4145_v14 = vpop.f32.mrb[22].mxu0 }
 0x12c   : > { %v965_v16 = vadd.f32 %v4594_v44, %v894_v10  ;;  %v895_v17 = vmul.f32 %v4145_v14, %v4589_v42  ;;  %v693_v19 = vpop.f32.mrb[23].mxu0 }
 0x12d   : > { %v963_v20 = vadd.f32 %v4594_v44, %v892_v13  ;;  %v893_v21 = vmul.f32 %v4589_v42, %v693_v19  ;;  %3454 = vmatprep.subr.bf16.mxu1 %v4655_v12  ;;  %3614 = vmatprep.subr.bf16.mxu0 %v4655_v12 }
 0x12e   : > { %v966_v22 = vadd.f32 %v4594_v44, %v895_v17  ;;  %3455 = vmatpush3.bf16.msra.mxu1 %v4607_v0  ;;  %3615 = vmatpush3.bf16.msra.mxu0 %v4607_v0  ;;  %v1029_v24 = vmax.f32 %v965_v16, 0.0 }
 0x12f   : > { %v964_v23 = vadd.f32 %v4594_v44, %v893_v21  ;;  %3456 = vmatprep.subr.bf16.mxu1 %v4652_v9  ;;  %3616 = vmatprep.subr.bf16.mxu0 %v4652_v9  ;;  %v1027_v26 = vmax.f32 %v963_v20, 0.0 }
 0x130   : > { %v1030_v25 = vmax.f32 %v966_v22, 0.0 }
 0x131   : > { %v1028_v27 = vmax.f32 %v964_v23, 0.0  ;;  %v4148_v28 = vpop.f32.mrb[24].mxu0 }
 0x132   : > { %v4670_v29 = vpack.c.bf16 %v1030_v25, %v1029_v24  ;;  %v898_v30 = vmul.f32 %v4148_v28, %v4589_v42  ;;  %v706_v31 = vpop.f32.mrb[25].mxu0  ;;  %3457 = vmatpush3.bf16.msra.mxu1 %v4604_v61  ;;  %3617 = vmatpush3.bf16.msra.mxu0 %v4604_v61  ;;  %v4269_v28 = vld [vmem:[%s5769_s4 + $0x100] ss:$16 sps:$4 sm:$0xff]  }
 0x133   : > { %v4675_v32 = vpack.c.bf16 %v1028_v27, %v1027_v26  ;;  %v896_v34 = vmul.f32 %v4589_v42, %v706_v31  ;;  %v4149_v35 = vpop.f32.mrb[26].mxu0 }
 0x134   : > { %v969_v37 = vadd.f32 %v4594_v44, %v898_v30  ;;  %v899_v38 = vmul.f32 %v4149_v35, %v4589_v42  ;;  %v709_v39 = vpop.f32.mrb[27].mxu0  ;;  %v4281_v35 = vld [vmem:[%s5769_s4] ss:$16 sps:$4 sm:$0xff]  }
 0x135   : > { %v967_v40 = vadd.f32 %v4594_v44, %v896_v34  ;;  %v897_v41 = vmul.f32 %v4589_v42, %v709_v39  ;;  %3458 = vmatprep.subr.bf16.mxu1 %v4675_v32  ;;  %3618 = vmatprep.subr.bf16.mxu0 %v4675_v32 }
 0x136   : > { %v970_v43 = vadd.f32 %v4594_v44, %v899_v38  ;;  %3459 = vmatpush3.bf16.msra.mxu1 %v4619_v18  ;;  %3619 = vmatpush3.bf16.msra.mxu0 %v4619_v18  ;;  %v1033_v46 = vmax.f32 %v969_v37, 0.0 }
 0x137   : > { %v968_v45 = vadd.f32 %v4594_v44, %v897_v41  ;;  %3460 = vmatprep.subr.bf16.mxu1 %v4670_v29  ;;  %3620 = vmatprep.subr.bf16.mxu0 %v4670_v29  ;;  %v1031_v48 = vmax.f32 %v967_v40, 0.0  ;;  %v4272_v40 = vld [vmem:[%s5769_s4 + $0x124] ss:$16 sps:$4 sm:$0xff]  }
 0x138   : > { %v1034_v47 = vmax.f32 %v970_v43, 0.0 }
 0x139   : > { %v1032_v49 = vmax.f32 %v968_v45, 0.0  ;;  %v4152_v50 = vpop.f32.mrb[28].mxu0 }
 0x13a   : > { %v4690_v51 = vpack.c.bf16 %v1034_v47, %v1033_v46  ;;  %v902_v52 = vmul.f32 %v4152_v50, %v4589_v42  ;;  %v722_v54 = vpop.f32.mrb[29].mxu0  ;;  %3461 = vmatpush3.bf16.msra.mxu1 %v4616_v15  ;;  %3621 = vmatpush3.bf16.msra.mxu0 %v4616_v15  ;;  %v4287_v46 = vld [vmem:[%s5769_s4 + $0x24] ss:$16 sps:$4 sm:$0xff]  }
 0x13b   : > { %v4695_v55 = vpack.c.bf16 %v1032_v49, %v1031_v48  ;;  %v900_v57 = vmul.f32 %v4589_v42, %v722_v54  ;;  %v4153_v58 = vpop.f32.mrb[30].mxu0 }
 0x13c   : > { %v973_v59 = vadd.f32 %v4594_v44, %v902_v52  ;;  %v903_v60 = vmul.f32 %v4153_v58, %v4589_v42  ;;  %v725_v62 = vpop.f32.mrb[31].mxu0 }
 0x13d   : > { %v971_v63 = vadd.f32 %v4594_v44, %v900_v57  ;;  %v901_v1 = vmul.f32 %v4589_v42, %v725_v62  ;;  %3462 = vmatprep.subr.bf16.mxu1 %v4695_v55  ;;  %3622 = vmatprep.subr.bf16.mxu0 %v4695_v55 }
 0x13e   : > { %v974_v2 = vadd.f32 %v4594_v44, %v903_v60  ;;  %3463 = vmatpush3.bf16.msra.mxu1 %v4631_v36  ;;  %3623 = vmatpush3.bf16.msra.mxu0 %v4631_v36  ;;  %v1037_v4 = vmax.f32 %v973_v59, 0.0  ;;  %v4274_v60 = vld [vmem:[%s5769_s4 + $0x120] ss:$16 sps:$4 sm:$0xff]  }
 0x13f   : > { %v972_v3 = vadd.f32 %v4594_v44, %v901_v1  ;;  %3464 = vmatprep.subr.bf16.mxu1 %v4690_v51  ;;  %3624 = vmatprep.subr.bf16.mxu0 %v4690_v51  ;;  %v1035_v6 = vmax.f32 %v971_v63, 0.0 }
 0x140   : > { %v1038_v5 = vmax.f32 %v974_v2, 0.0  ;;  %v4289_v2 = vld [vmem:[%s5769_s4 + $0x20] ss:$16 sps:$4 sm:$0xff]  }
 0x141   : > { %v1036_v7 = vmax.f32 %v972_v3, 0.0  ;;  %v4156_v8 = vpop.f32.mrb[32].mxu0 }
 0x142   : > { %v4710_v10 = vpack.c.bf16 %v1038_v5, %v1037_v4  ;;  %v906_v11 = vmul.f32 %v4156_v8, %v4589_v42  ;;  %v738_v13 = vpop.f32.mrb[33].mxu0  ;;  %3465 = vmatpush3.bf16.msra.mxu1 %v4628_v33  ;;  %3625 = vmatpush3.bf16.msra.mxu0 %v4628_v33 }
 0x143   : > { %v4715_v14 = vpack.c.bf16 %v1036_v7, %v1035_v6  ;;  %v904_v16 = vmul.f32 %v4589_v42, %v738_v13  ;;  %v4157_v17 = vpop.f32.mrb[34].mxu0  ;;  %v4275_v6 = vld [vmem:[%s5769_s4 + $0x144] ss:$16 sps:$4 sm:$0xff]  }
 0x144   : > { %v977_v19 = vadd.f32 %v4594_v44, %v906_v11  ;;  %v907_v20 = vmul.f32 %v4157_v17, %v4589_v42  ;;  %v741_v21 = vpop.f32.mrb[35].mxu0  ;;  %v4293_v13 = vld [vmem:[%s5769_s4 + $0x44] ss:$16 sps:$4 sm:$0xff]  }
 0x145   : > { %v975_v22 = vadd.f32 %v4594_v44, %v904_v16  ;;  %v905_v23 = vmul.f32 %v4589_v42, %v741_v21  ;;  %3466 = vmatprep.subr.bf16.mxu1 %v4715_v14  ;;  %3626 = vmatprep.subr.bf16.mxu0 %v4715_v14 }
 0x146   : > { %v978_v24 = vadd.f32 %v4594_v44, %v907_v20  ;;  %3467 = vmatpush3.bf16.msra.mxu1 %v4643_v56  ;;  %3627 = vmatpush3.bf16.msra.mxu0 %v4643_v56  ;;  %v1041_v26 = vmax.f32 %v977_v19, 0.0 }
 0x147   : > { %v976_v25 = vadd.f32 %v4594_v44, %v905_v23  ;;  %3468 = vmatprep.subr.bf16.mxu1 %v4710_v10  ;;  %3628 = vmatprep.subr.bf16.mxu0 %v4710_v10  ;;  %v1039_v30 = vmax.f32 %v975_v22, 0.0 }
 0x148   : > { %v1042_v27 = vmax.f32 %v978_v24, 0.0 }
 0x149   : > { %v1040_v31 = vmax.f32 %v976_v25, 0.0  ;;  %v4160_v34 = vpop.f32.mrb[36].mxu0 }
 0x14a   : > { %v4736_v37 = vpack.c.bf16 %v1042_v27, %v1041_v26  ;;  %v910_v38 = vmul.f32 %v4160_v34, %v4589_v42  ;;  %v754_v39 = vpop.f32.mrb[37].mxu0  ;;  %3469 = vmatpush3.bf16.msra.mxu1 %v4640_v53  ;;  %3629 = vmatpush3.bf16.msra.mxu0 %v4640_v53  ;;  %v4277_v26 = vld [vmem:[%s5769_s4 + $0x140] ss:$16 sps:$4 sm:$0xff]  }
 0x14b   : > { %v4744_v41 = vpack.c.bf16 %v1040_v31, %v1039_v30  ;;  %v908_v43 = vmul.f32 %v4589_v42, %v754_v39  ;;  %v4161_v45 = vpop.f32.mrb[38].mxu0  ;;  %3694 = vmatprep.subr.bf16.mxu0 %v4655_v12  ;;  %v4295_v31 = vld [vmem:[%s5769_s4 + $0x40] ss:$16 sps:$4 sm:$0xff]   ;;  %v4278_v39 = vld [vmem:[%s5769_s4 + $0x164] ss:$16 sps:$4 sm:$0xff]  }
 0x14c   : > { %v981_v47 = vadd.f32 %v4594_v44, %v910_v38  ;;  %v911_v48 = vmul.f32 %v4161_v45, %v4589_v42  ;;  %v757_v49 = vpop.f32.mrb[39].mxu0 }
 0x14d   : > { %v979_v50 = vadd.f32 %v4594_v44, %v908_v43  ;;  %v909_v52 = vmul.f32 %v4589_v42, %v757_v49  ;;  %1692 = vmatmul.mubr.bf16.vlgmr.msra.gmra.mrb[64].mxu0 %v4269_v28  ;;  %1232 = vmatmul.mubr.bf16.vlgmr.msra.gmra.mrb[0].mxu1 %v4281_v35 }
 0x14e   : > { %v982_v54 = vadd.f32 %v4594_v44, %v911_v48  ;;  %3695 = vmatpush3.bf16.msra.mxu0 %v4607_v0  ;;  %1699 = vmatprep.mubr.bf16.mxu0 %v4272_v40  ;;  %v1045_v58 = vmax.f32 %v981_v47, 0.0 }
 0x14f   : > { %v980_v57 = vadd.f32 %v4594_v44, %v909_v52  ;;  %3696 = vmatprep.subr.bf16.mxu0 %v4652_v9  ;;  %1239 = vmatprep.mubr.bf16.mxu1 %v4287_v46  ;;  %v1043_v62 = vmax.f32 %v979_v50, 0.0  ;;  %v4299_v46 = vld [vmem:[%s5769_s4 + $0x64] ss:$16 sps:$4 sm:$0xff]  }
 0x150   : > { %v1046_v59 = vmax.f32 %v982_v54, 0.0 }
 0x151   : > { %v1044_v63 = vmax.f32 %v980_v57, 0.0  ;;  %v4164_v1 = vpop.f32.mrb[40].mxu0 }
 0x152   : > { %v4765_v3 = vpack.c.bf16 %v1046_v59, %v1045_v58  ;;  %v914_v4 = vmul.f32 %v4164_v1, %v4589_v42  ;;  %v770_v5 = vpop.f32.mrb[41].mxu0  ;;  %3697 = vmatpush3.bf16.msra.mxu0 %v4604_v61 }
 0x153   : > { %v4772_v7 = vpack.c.bf16 %v1044_v63, %v1043_v62  ;;  %v912_v8 = vmul.f32 %v4589_v42, %v770_v5  ;;  %v4165_v11 = vpop.f32.mrb[42].mxu0  ;;  %3698 = vmatprep.subr.bf16.mxu0 %v4675_v32 }
 0x154   : > { %v985_v16 = vadd.f32 %v4594_v44, %v914_v4  ;;  %v915_v17 = vmul.f32 %v4165_v11, %v4589_v42  ;;  %v773_v19 = vpop.f32.mrb[43].mxu0 }
 0x155   : > { %v983_v20 = vadd.f32 %v4594_v44, %v912_v8  ;;  %v913_v21 = vmul.f32 %v4589_v42, %v773_v19  ;;  %1700 = vmatmul.mubr.bf16.gmra.mrb[68].mxu0 %v4274_v60  ;;  %1240 = vmatmul.mubr.bf16.gmra.mrb[4].mxu1 %v4289_v2  ;;  %v4280_v60 = vld [vmem:[%s5769_s4 + $0x160] ss:$16 sps:$4 sm:$0xff]   ;;  %v4286_v8 = vld [vmem:[%s5769_s4 + $0x184] ss:$16 sps:$4 sm:$0xff]  }
 0x156   : > { %v986_v22 = vadd.f32 %v4594_v44, %v915_v17  ;;  %3699 = vmatpush3.bf16.msra.mxu0 %v4619_v18  ;;  %1707 = vmatprep.mubr.bf16.mxu0 %v4275_v6  ;;  %v1049_v24 = vmax.f32 %v985_v16, 0.0  ;;  %v4301_v2 = vld [vmem:[%s5769_s4 + $0x60] ss:$16 sps:$4 sm:$0xff]   ;;  %v4307_v17 = vld [vmem:[%s5769_s4 + $0xc] ss:$16 sps:$4 sm:$0xff]  }
 0x157   : > { %v984_v23 = vadd.f32 %v4594_v44, %v913_v21  ;;  %3700 = vmatprep.subr.bf16.mxu0 %v4670_v29  ;;  %1247 = vmatprep.mubr.bf16.mxu1 %v4293_v13  ;;  %v1047_v27 = vmax.f32 %v983_v20, 0.0 }
 0x158   : > { %v1050_v25 = vmax.f32 %v986_v22, 0.0 }
 0x159   : > { %v1048_v28 = vmax.f32 %v984_v23, 0.0  ;;  %v4168_v30 = vpop.f32.mrb[44].mxu0 }
 0x15a   : > { %v4793_v34 = vpack.c.bf16 %v1050_v25, %v1049_v24  ;;  %v918_v35 = vmul.f32 %v4168_v30, %v4589_v42  ;;  %v786_v38 = vpop.f32.mrb[45].mxu0  ;;  %3701 = vmatpush3.bf16.msra.mxu0 %v4616_v15 }
 0x15b   : > { %v4800_v40 = vpack.c.bf16 %v1048_v28, %v1047_v27  ;;  %v916_v43 = vmul.f32 %v4589_v42, %v786_v38  ;;  %v4169_v45 = vpop.f32.mrb[46].mxu0  ;;  %3702 = vmatprep.subr.bf16.mxu0 %v4695_v55 }
 0x15c   : > { %v989_v47 = vadd.f32 %v4594_v44, %v918_v35  ;;  %v919_v48 = vmul.f32 %v4169_v45, %v4589_v42  ;;  %v789_v49 = vpop.f32.mrb[47].mxu0  ;;  %v4284_v35 = vld [vmem:[%s5769_s4 + $0x180] ss:$16 sps:$4 sm:$0xff]  }
 0x15d   : > { %v987_v50 = vadd.f32 %v4594_v44, %v916_v43  ;;  %v917_v52 = vmul.f32 %v4589_v42, %v789_v49  ;;  %1708 = vmatmul.mubr.bf16.gmra.mrb[72].mxu0 %v4277_v26  ;;  %1248 = vmatmul.mubr.bf16.gmra.mrb[8].mxu1 %v4295_v31 }
 0x15e   : > { %v990_v54 = vadd.f32 %v4594_v44, %v919_v48  ;;  %3703 = vmatpush3.bf16.msra.mxu0 %v4631_v36  ;;  %1715 = vmatprep.mubr.bf16.mxu0 %v4278_v39  ;;  %v1053_v58 = vmax.f32 %v989_v47, 0.0 }
 0x15f   : > { %v988_v57 = vadd.f32 %v4594_v44, %v917_v52  ;;  %3704 = vmatprep.subr.bf16.mxu0 %v4690_v51  ;;  %1255 = vmatprep.mubr.bf16.mxu1 %v4299_v46  ;;  %v1051_v62 = vmax.f32 %v987_v50, 0.0  ;;  %v4290_v52 = vld [vmem:[%s5769_s4 + $0x1a4] ss:$16 sps:$4 sm:$0xff]  }
 0x160   : > { %v1054_v59 = vmax.f32 %v990_v54, 0.0 }
 0x161   : > { %v1052_v63 = vmax.f32 %v988_v57, 0.0  ;;  %v4172_v1 = vpop.f32.mrb[48].mxu0 }
 0x162   : > { %v4821_v4 = vpack.c.bf16 %v1054_v59, %v1053_v58  ;;  %v922_v5 = vmul.f32 %v4172_v1, %v4589_v42  ;;  %v802_v6 = vpop.f32.mrb[49].mxu0  ;;  %3705 = vmatpush3.bf16.msra.mxu0 %v4628_v33 }
 0x163   : > { %v4828_v11 = vpack.c.bf16 %v1052_v63, %v1051_v62  ;;  %v920_v13 = vmul.f32 %v4589_v42, %v802_v6  ;;  %v4173_v16 = vpop.f32.mrb[50].mxu0  ;;  %3706 = vmatprep.subr.bf16.mxu0 %v4715_v14 }
 0x164   : > { %v993_v19 = vadd.f32 %v4594_v44, %v922_v5  ;;  %v923_v20 = vmul.f32 %v4173_v16, %v4589_v42  ;;  %v805_v21 = vpop.f32.mrb[51].mxu0  ;;  %v4292_v5 = vld [vmem:[%s5769_s4 + $0x1a0] ss:$16 sps:$4 sm:$0xff]  }
 0x165   : > { %v991_v22 = vadd.f32 %v4594_v44, %v920_v13  ;;  %v921_v23 = vmul.f32 %v4589_v42, %v805_v21  ;;  %1716 = vmatmul.mubr.bf16.gmra.mrb[76].mxu0 %v4280_v60  ;;  %1256 = vmatmul.mubr.bf16.gmra.mrb[12].mxu1 %v4301_v2 }
 0x166   : > { %v994_v24 = vadd.f32 %v4594_v44, %v923_v20  ;;  %3707 = vmatpush3.bf16.msra.mxu0 %v4643_v56  ;;  %1925 = vmatprep.mubr.bf16.mxu0 %v4286_v8  ;;  %v1057_v26 = vmax.f32 %v993_v19, 0.0 }
 0x167   : > { %v992_v25 = vadd.f32 %v4594_v44, %v921_v23  ;;  %3708 = vmatprep.subr.bf16.mxu0 %v4710_v10  ;;  %1296 = vmatprep.mubr.bf16.mxu1 %v4307_v17  ;;  %v1055_v28 = vmax.f32 %v991_v22, 0.0  ;;  %v4296_v23 = vld [vmem:[%s5769_s4 + $0x1c4] ss:$16 sps:$4 sm:$0xff]  }
 0x168   : > { %v1058_v27 = vmax.f32 %v994_v24, 0.0 }
 0x169   : > { %v1056_v30 = vmax.f32 %v992_v25, 0.0  ;;  %v4176_v31 = vpop.f32.mrb[52].mxu0 }
 0x16a   : > { %v4846_v38 = vpack.c.bf16 %v1058_v27, %v1057_v26  ;;  %v926_v39 = vmul.f32 %v4176_v31, %v4589_v42  ;;  %v818_v43 = vpop.f32.mrb[53].mxu0  ;;  %3709 = vmatpush3.bf16.msra.mxu0 %v4640_v53 }
 0x16b   : > { %v4850_v45 = vpack.c.bf16 %v1056_v30, %v1055_v28  ;;  %v924_v46 = vmul.f32 %v4589_v42, %v818_v43  ;;  %v4177_v47 = vpop.f32.mrb[54].mxu0  ;;  %3774 = vmatprep.subr.bf16.mxu0 %v4655_v12  ;;  %v4298_v43 = vld [vmem:[%s5769_s4 + $0x1c0] ss:$16 sps:$4 sm:$0xff]  }
 0x16c   : > { %v997_v48 = vadd.f32 %v4594_v44, %v926_v39  ;;  %v927_v49 = vmul.f32 %v4177_v47, %v4589_v42  ;;  %v821_v50 = vpop.f32.mrb[55].mxu0 }
 0x16d   : > { %v995_v54 = vadd.f32 %v4594_v44, %v924_v46  ;;  %v925_v57 = vmul.f32 %v4589_v42, %v821_v50  ;;  %3494 = vmatprep.subr.bf16.mxu1 %v4850_v45  ;;  %1926 = vmatmul.mubr.bf16.vlgmr.msra.gmra.mrb[80].mxu0 %v4284_v35 }
 0x16e   : > { %v998_v58 = vadd.f32 %v4594_v44, %v927_v49  ;;  %3495 = vmatpush3.bf16.msra.mxu1 %v4744_v41  ;;  %3775 = vmatpush3.bf16.msra.mxu0 %v4607_v0  ;;  %v1061_v60 = vmax.f32 %v997_v48, 0.0 }
 0x16f   : > { %v996_v59 = vadd.f32 %v4594_v44, %v925_v57  ;;  %3496 = vmatprep.subr.bf16.mxu1 %v4846_v38  ;;  %3776 = vmatprep.subr.bf16.mxu0 %v4652_v9  ;;  %v1059_v63 = vmax.f32 %v995_v54, 0.0 }
 0x170   : > { %v1062_v62 = vmax.f32 %v998_v58, 0.0  ;;  %1933 = vmatprep.mubr.bf16.mxu0 %v4290_v52 }
 0x171   : > { %v1060_v1 = vmax.f32 %v996_v59, 0.0  ;;  %v4180_v2 = vpop.f32.mrb[56].mxu0  ;;  %v4302_v59 = vld [vmem:[%s5769_s4 + $0x1e4] ss:$16 sps:$4 sm:$0xff]  }
 0x172   : > { %v4871_v6 = vpack.c.bf16 %v1062_v62, %v1061_v60  ;;  %v930_v8 = vmul.f32 %v4180_v2, %v4589_v42  ;;  %v834_v13 = vpop.f32.mrb[57].mxu0  ;;  %3497 = vmatpush3.bf16.msra.mxu1 %v4736_v37  ;;  %3777 = vmatpush3.bf16.msra.mxu0 %v4604_v61 }
 0x173   : > { %v4876_v16 = vpack.c.bf16 %v1060_v1, %v1059_v63  ;;  %v928_v17 = vmul.f32 %v4589_v42, %v834_v13  ;;  %v4181_v19 = vpop.f32.mrb[58].mxu0  ;;  %3778 = vmatprep.subr.bf16.mxu0 %v4675_v32  ;;  %v4304_v13 = vld [vmem:[%s5769_s4 + $0x1e0] ss:$16 sps:$4 sm:$0xff]  }
 0x174   : > { %v1001_v20 = vadd.f32 %v4594_v44, %v930_v8  ;;  %v931_v21 = vmul.f32 %v4181_v19, %v4589_v42  ;;  %v837_v22 = vpop.f32.mrb[59].mxu0  ;;  %v4310_v19 = vld [vmem:[%s5769_s4 + $0x204] ss:$16 sps:$4 sm:$0xff]  }
 0x175   : > { %v999_v24 = vadd.f32 %v4594_v44, %v928_v17  ;;  %v929_v25 = vmul.f32 %v4589_v42, %v837_v22  ;;  %3498 = vmatprep.subr.bf16.mxu1 %v4876_v16  ;;  %1934 = vmatmul.mubr.bf16.gmra.mrb[84].mxu0 %v4292_v5  ;;  %v4311_v22 = vld [vmem:[%s5769_s4 + $0x2c] ss:$16 sps:$4 sm:$0xff]  }
 0x176   : > { %v1002_v26 = vadd.f32 %v4594_v44, %v931_v21  ;;  %3499 = vmatpush3.bf16.msra.mxu1 %v4772_v7  ;;  %3779 = vmatpush3.bf16.msra.mxu0 %v4619_v18  ;;  %v1065_v28 = vmax.f32 %v1001_v20, 0.0  ;;  %v4305_v20 = vld [vmem:[%s5769_s4 + $0x8] ss:$16 sps:$4 sm:$0xff]   ;;  %v4308_v21 = vld [vmem:[%s5769_s4 + $0x200] ss:$16 sps:$4 sm:$0xff]  }
 0x177   : > { %v1000_v27 = vadd.f32 %v4594_v44, %v929_v25  ;;  %3500 = vmatprep.subr.bf16.mxu1 %v4871_v6  ;;  %3780 = vmatprep.subr.bf16.mxu0 %v4670_v29  ;;  %v1063_v31 = vmax.f32 %v999_v24, 0.0  ;;  %v4313_v24 = vld [vmem:[%s5769_s4 + $0x28] ss:$16 sps:$4 sm:$0xff]   ;;  %v4316_v25 = vld [vmem:[%s5769_s4 + $0x220] ss:$16 sps:$4 sm:$0xff]  }
 0x178   : > { %v1066_v30 = vmax.f32 %v1002_v26, 0.0  ;;  %1941 = vmatprep.mubr.bf16.mxu0 %v4296_v23  ;;  %v4314_v23 = vld [vmem:[%s5769_s4 + $0x224] ss:$16 sps:$4 sm:$0xff]   ;;  %v4317_v26 = vld [vmem:[%s5769_s4 + $0x4c] ss:$16 sps:$4 sm:$0xff]  }
 0x179   : > { %v1064_v35 = vmax.f32 %v1000_v27, 0.0  ;;  %v4184_v39 = vpop.f32.mrb[60].mxu0  ;;  %v4320_v27 = vld [vmem:[%s5769_s4 + $0x244] ss:$16 sps:$4 sm:$0xff]  }
 0x17a   : > { %v4897_v46 = vpack.c.bf16 %v1066_v30, %v1065_v28  ;;  %v934_v47 = vmul.f32 %v4184_v39, %v4589_v42  ;;  %v850_v48 = vpop.f32.mrb[61].mxu0  ;;  %3501 = vmatpush3.bf16.msra.mxu1 %v4765_v3  ;;  %3781 = vmatpush3.bf16.msra.mxu0 %v4616_v15  ;;  %v4319_v28 = vld [vmem:[%s5769_s4 + $0x48] ss:$16 sps:$4 sm:$0xff]   ;;  %v4322_v30 = vld [vmem:[%s5769_s4 + $0x240] ss:$16 sps:$4 sm:$0xff]  }
 0x17b   : > { %v4902_v49 = vpack.c.bf16 %v1064_v35, %v1063_v31  ;;  %v932_v50 = vmul.f32 %v4589_v42, %v850_v48  ;;  %v4185_v52 = vpop.f32.mrb[62].mxu0  ;;  %3782 = vmatprep.subr.bf16.mxu0 %v4695_v55  ;;  %v4323_v31 = vld [vmem:[%s5769_s4 + $0x6c] ss:$16 sps:$4 sm:$0xff]   ;;  %v4326_v35 = vld [vmem:[%s5769_s4 + $0x264] ss:$16 sps:$4 sm:$0xff]  }
 0x17c   : > { %v1005_v54 = vadd.f32 %v4594_v44, %v934_v47  ;;  %v935_v57 = vmul.f32 %v4185_v52, %v4589_v42  ;;  %v853_v58 = vpop.f32.mrb[63].mxu0  ;;  %v4325_v39 = vld [vmem:[%s5769_s4 + $0x68] ss:$16 sps:$4 sm:$0xff]   ;;  %v4331_v47 = vld [vmem:[%s5769_s4 + $0x84] ss:$16 sps:$4 sm:$0xff]  }
 0x17d   : > { %v1003_v60 = vadd.f32 %v4594_v44, %v932_v50  ;;  %v933_v62 = vmul.f32 %v4589_v42, %v853_v58  ;;  %3502 = vmatprep.subr.bf16.mxu1 %v4902_v49  ;;  %1942 = vmatmul.mubr.bf16.gmra.mrb[88].mxu0 %v4298_v43  ;;  %v4328_v43 = vld [vmem:[%s5769_s4 + $0x260] ss:$16 sps:$4 sm:$0xff]   ;;  %v4334_v48 = vld [vmem:[%s5769_s4 + $0x284] ss:$16 sps:$4 sm:$0xff]  }
 0x17e   : > { %v1006_v63 = vadd.f32 %v4594_v44, %v935_v57  ;;  %3503 = vmatpush3.bf16.msra.mxu1 %v4800_v40  ;;  %3783 = vmatpush3.bf16.msra.mxu0 %v4631_v36  ;;  %v1069_v2 = vmax.f32 %v1005_v54, 0.0  ;;  %v4329_v50 = vld [vmem:[%s5769_s4 + $0x80] ss:$16 sps:$4 sm:$0xff]   ;;  %v4335_v54 = vld [vmem:[%s5769_s4 + $0xa4] ss:$16 sps:$4 sm:$0xff]  }
 0x17f   : > { %v1004_v1 = vadd.f32 %v4594_v44, %v933_v62  ;;  %3504 = vmatprep.subr.bf16.mxu1 %v4897_v46  ;;  %3784 = vmatprep.subr.bf16.mxu0 %v4690_v51  ;;  %v1067_v8 = vmax.f32 %v1003_v60, 0.0  ;;  %v4332_v52 = vld [vmem:[%s5769_s4 + $0x280] ss:$16 sps:$4 sm:$0xff]   ;;  %v4338_v57 = vld [vmem:[%s5769_s4 + $0x2a4] ss:$16 sps:$4 sm:$0xff]  }
 0x180   : > { %v1070_v5 = vmax.f32 %v1006_v63, 0.0  ;;  %1949 = vmatprep.mubr.bf16.mxu0 %v4302_v59  ;;  %v4337_v58 = vld [vmem:[%s5769_s4 + $0xa0] ss:$16 sps:$4 sm:$0xff]   ;;  %v4341_v60 = vld [vmem:[%s5769_s4 + $0xc4] ss:$16 sps:$4 sm:$0xff]  }
 0x181   : > { %v1068_v42 = vmax.f32 %v1004_v1, 0.0  ;;  %v4340_v59 = vld [vmem:[%s5769_s4 + $0x2a0] ss:$16 sps:$4 sm:$0xff]   ;;  %v4344_v62 = vld [vmem:[%s5769_s4 + $0x2c4] ss:$16 sps:$4 sm:$0xff]  }
 0x182   : > { %v4923_v17 = vpack.c.bf16 %v1070_v5, %v1069_v2  ;;  %3505 = vmatpush3.bf16.msra.mxu1 %v4793_v34  ;;  %3785 = vmatpush3.bf16.msra.mxu0 %v4628_v33  ;;  %v4343_v63 = vld [vmem:[%s5769_s4 + $0xc0] ss:$16 sps:$4 sm:$0xff]   ;;  %v4347_v2 = vld [vmem:[%s5769_s4 + $0xe4] ss:$16 sps:$4 sm:$0xff]  }
 0x183   : > { %v4927_v44 = vpack.c.bf16 %v1068_v42, %v1067_v8  ;;  %3786 = vmatprep.subr.bf16.mxu0 %v4715_v14  ;;  %v4346_v1 = vld [vmem:[%s5769_s4 + $0x2c0] ss:$16 sps:$4 sm:$0xff]   ;;  %v4350_v5 = vld [vmem:[%s5769_s4 + $0x2e4] ss:$16 sps:$4 sm:$0xff]  }
 0x184   : > { %v4349_v8 = vld [vmem:[%s5769_s4 + $0xe0] ss:$16 sps:$4 sm:$0xff]  }
 0x185   : > { %3506 = vmatprep.subr.bf16.mxu1 %v4927_v44  ;;  %1950 = vmatmul.mubr.bf16.gmra.mrb[92].mxu0 %v4304_v13  ;;  %v4352_v42 = vld [vmem:[%s5769_s4 + $0x2e0] ss:$16 sps:$4 sm:$0xff]   ;;  %v4355_v13 = vld [vmem:[%s5769_s4 + $0x8c] ss:$16 sps:$4 sm:$0xff]  }
 0x186   : > { %3507 = vmatpush3.bf16.msra.mxu1 %v4828_v11  ;;  %3787 = vmatpush3.bf16.msra.mxu0 %v4643_v56 }
 0x187   : > { %3508 = vmatprep.subr.bf16.mxu1 %v4923_v17  ;;  %3788 = vmatprep.subr.bf16.mxu0 %v4710_v10 }
 0x188   : > { %2159 = vmatprep.mubr.bf16.mxu0 %v4310_v19  ;;  %v4358_v19 = vld [vmem:[%s5769_s4 + $0x304] ss:$16 sps:$4 sm:$0xff]  }
 0x18a   : > { %3509 = vmatpush3.bf16.msra.mxu1 %v4821_v4  ;;  %3789 = vmatpush3.bf16.msra.mxu0 %v4640_v53 }
 0x18b   : > { %3534 = vmatprep.subr.bf16.mxu1 %v4655_v12  ;;  %3854 = vmatprep.subr.bf16.mxu0 %v4655_v12 }
 0x18d   : > { %1297 = vmatmul.mubr.bf16.vlgmr.msra.gmra.mrb[16].mxu1 %v4305_v20  ;;  %2160 = vmatmul.mubr.bf16.vlgmr.msra.gmra.mrb[96].mxu0 %v4308_v21  ;;  %v4353_v20 = vld [vmem:[%s5769_s4 + $0x88] ss:$16 sps:$4 sm:$0xff]   ;;  %v4356_v21 = vld [vmem:[%s5769_s4 + $0x300] ss:$16 sps:$4 sm:$0xff]  }
 0x18e   : > { %3535 = vmatpush3.bf16.msra.mxu1 %v4607_v0  ;;  %3855 = vmatpush3.bf16.msra.mxu0 %v4607_v0 }
 0x18f   : > { %3536 = vmatprep.subr.bf16.mxu1 %v4652_v9  ;;  %3856 = vmatprep.subr.bf16.mxu0 %v4652_v9 }
 0x190   : > { %1304 = vmatprep.mubr.bf16.mxu1 %v4311_v22  ;;  %2167 = vmatprep.mubr.bf16.mxu0 %v4314_v23  ;;  %v4359_v22 = vld [vmem:[%s5769_s4 + $0xac] ss:$16 sps:$4 sm:$0xff]   ;;  %v4361_v23 = vld [vmem:[%s5769_s4 + $0xa8] ss:$16 sps:$4 sm:$0xff]  }
 0x192   : > { %3537 = vmatpush3.bf16.msra.mxu1 %v4604_v61  ;;  %3857 = vmatpush3.bf16.msra.mxu0 %v4604_v61 }
 0x193   : > { %3538 = vmatprep.subr.bf16.mxu1 %v4675_v32  ;;  %3858 = vmatprep.subr.bf16.mxu0 %v4675_v32 }
 0x195   : > { %1305 = vmatmul.mubr.bf16.gmra.mrb[20].mxu1 %v4313_v24  ;;  %2168 = vmatmul.mubr.bf16.gmra.mrb[100].mxu0 %v4316_v25  ;;  %v4433_v24 = vld [vmem:[%s5769_s4 + $0x360] ss:$16 sps:$4 sm:$0xff]   ;;  %v4379_v25 = vld [vmem:[%s5769_s4 + $0x168] ss:$16 sps:$4 sm:$0xff]  }
 0x196   : > { %3539 = vmatpush3.bf16.msra.mxu1 %v4619_v18  ;;  %3859 = vmatpush3.bf16.msra.mxu0 %v4619_v18 }
 0x197   : > { %3540 = vmatprep.subr.bf16.mxu1 %v4670_v29  ;;  %3860 = vmatprep.subr.bf16.mxu0 %v4670_v29 }
 0x198   : > { %1312 = vmatprep.mubr.bf16.mxu1 %v4317_v26  ;;  %2175 = vmatprep.mubr.bf16.mxu0 %v4320_v27  ;;  %v4382_v26 = vld [vmem:[%s5769_s4 + $0x18c] ss:$16 sps:$4 sm:$0xff]   ;;  %v4439_v27 = vld [vmem:[%s5769_s4 + $0x384] ss:$16 sps:$4 sm:$0xff]  }
 0x19a   : > { %3541 = vmatpush3.bf16.msra.mxu1 %v4616_v15  ;;  %3861 = vmatpush3.bf16.msra.mxu0 %v4616_v15 }
 0x19b   : > { %3542 = vmatprep.subr.bf16.mxu1 %v4695_v55  ;;  %3862 = vmatprep.subr.bf16.mxu0 %v4695_v55 }
 0x19d   : > { %1313 = vmatmul.mubr.bf16.gmra.mrb[24].mxu1 %v4319_v28  ;;  %2176 = vmatmul.mubr.bf16.gmra.mrb[104].mxu0 %v4322_v30  ;;  %v4437_v28 = vld [vmem:[%s5769_s4 + $0x380] ss:$16 sps:$4 sm:$0xff]   ;;  %v4380_v30 = vld [vmem:[%s5769_s4 + $0x188] ss:$16 sps:$4 sm:$0xff]  }
 0x19e   : > { %3543 = vmatpush3.bf16.msra.mxu1 %v4631_v36  ;;  %3863 = vmatpush3.bf16.msra.mxu0 %v4631_v36 }
 0x19f   : > { %3544 = vmatprep.subr.bf16.mxu1 %v4690_v51  ;;  %3864 = vmatprep.subr.bf16.mxu0 %v4690_v51 }
 0x1a0   : > { %1320 = vmatprep.mubr.bf16.mxu1 %v4323_v31  ;;  %2183 = vmatprep.mubr.bf16.mxu0 %v4326_v35  ;;  %v4383_v31 = vld [vmem:[%s5769_s4 + $0x1ac] ss:$16 sps:$4 sm:$0xff]   ;;  %v4443_v35 = vld [vmem:[%s5769_s4 + $0x3a4] ss:$16 sps:$4 sm:$0xff]  }
 0x1a2   : > { %3545 = vmatpush3.bf16.msra.mxu1 %v4628_v33  ;;  %3865 = vmatpush3.bf16.msra.mxu0 %v4628_v33 }
 0x1a3   : > { %3546 = vmatprep.subr.bf16.mxu1 %v4715_v14  ;;  %3866 = vmatprep.subr.bf16.mxu0 %v4715_v14 }
 0x1a5   : > { %1321 = vmatmul.mubr.bf16.gmra.mrb[28].mxu1 %v4325_v39  ;;  %2184 = vmatmul.mubr.bf16.gmra.mrb[108].mxu0 %v4328_v43  ;;  %v4445_v39 = vld [vmem:[%s5769_s4 + $0x3a0] ss:$16 sps:$4 sm:$0xff]   ;;  %v4385_v43 = vld [vmem:[%s5769_s4 + $0x1a8] ss:$16 sps:$4 sm:$0xff]  }
 0x1a6   : > { %3547 = vmatpush3.bf16.msra.mxu1 %v4643_v56  ;;  %3867 = vmatpush3.bf16.msra.mxu0 %v4643_v56 }
 0x1a7   : > { %3548 = vmatprep.subr.bf16.mxu1 %v4710_v10  ;;  %3868 = vmatprep.subr.bf16.mxu0 %v4710_v10 }
 0x1a8   : > { %1457 = vmatprep.mubr.bf16.mxu1 %v4331_v47  ;;  %2393 = vmatprep.mubr.bf16.mxu0 %v4334_v48  ;;  %v4386_v47 = vld [vmem:[%s5769_s4 + $0x1cc] ss:$16 sps:$4 sm:$0xff]   ;;  %v4449_v48 = vld [vmem:[%s5769_s4 + $0x3c4] ss:$16 sps:$4 sm:$0xff]  }
 0x1aa   : > { %3549 = vmatpush3.bf16.msra.mxu1 %v4640_v53  ;;  %3869 = vmatpush3.bf16.msra.mxu0 %v4640_v53 }
 0x1ab   : > { %3574 = vmatprep.subr.bf16.mxu1 %v4850_v45  ;;  %3934 = vmatprep.subr.bf16.mxu0 %v4655_v12 }
 0x1ad   : > { %1458 = vmatmul.mubr.bf16.vlgmr.msra.gmra.mrb[32].mxu1 %v4329_v50  ;;  %2394 = vmatmul.mubr.bf16.vlgmr.msra.gmra.mrb[112].mxu0 %v4332_v52  ;;  %v4451_v50 = vld [vmem:[%s5769_s4 + $0x3c0] ss:$16 sps:$4 sm:$0xff]   ;;  %v4388_v52 = vld [vmem:[%s5769_s4 + $0x1c8] ss:$16 sps:$4 sm:$0xff]  }
 0x1ae   : > { %3575 = vmatpush3.bf16.msra.mxu1 %v4744_v41  ;;  %3935 = vmatpush3.bf16.msra.mxu0 %v4607_v0 }
 0x1af   : > { %3576 = vmatprep.subr.bf16.mxu1 %v4846_v38  ;;  %3936 = vmatprep.subr.bf16.mxu0 %v4652_v9 }
 0x1b0   : > { %1465 = vmatprep.mubr.bf16.mxu1 %v4335_v54  ;;  %2401 = vmatprep.mubr.bf16.mxu0 %v4338_v57  ;;  %v4389_v54 = vld [vmem:[%s5769_s4 + $0x1ec] ss:$16 sps:$4 sm:$0xff]   ;;  %v4455_v57 = vld [vmem:[%s5769_s4 + $0x3e4] ss:$16 sps:$4 sm:$0xff]  }
 0x1b2   : > { %3577 = vmatpush3.bf16.msra.mxu1 %v4736_v37  ;;  %3937 = vmatpush3.bf16.msra.mxu0 %v4604_v61 }
 0x1b3   : > { %3578 = vmatprep.subr.bf16.mxu1 %v4876_v16  ;;  %3938 = vmatprep.subr.bf16.mxu0 %v4675_v32 }
 0x1b5   : > { %1466 = vmatmul.mubr.bf16.gmra.mrb[36].mxu1 %v4337_v58  ;;  %2402 = vmatmul.mubr.bf16.gmra.mrb[116].mxu0 %v4340_v59  ;;  %v4457_v59 = vld [vmem:[%s5769_s4 + $0x3e0] ss:$16 sps:$4 sm:$0xff]  }
 0x1b6   : > { %3579 = vmatpush3.bf16.msra.mxu1 %v4772_v7  ;;  %3939 = vmatpush3.bf16.msra.mxu0 %v4619_v18 }
 0x1b7   : > { %3580 = vmatprep.subr.bf16.mxu1 %v4871_v6  ;;  %3940 = vmatprep.subr.bf16.mxu0 %v4670_v29 }
 0x1b8   : > { %1473 = vmatprep.mubr.bf16.mxu1 %v4341_v60  ;;  %2409 = vmatprep.mubr.bf16.mxu0 %v4344_v62  ;;  %v4391_v60 = vld [vmem:[%s5769_s4 + $0x1e8] ss:$16 sps:$4 sm:$0xff]  }
 0x1ba   : > { %3581 = vmatpush3.bf16.msra.mxu1 %v4765_v3  ;;  %3941 = vmatpush3.bf16.msra.mxu0 %v4616_v15 }
 0x1bb   : > { %3582 = vmatprep.subr.bf16.mxu1 %v4902_v49  ;;  %3942 = vmatprep.subr.bf16.mxu0 %v4695_v55 }
 0x1bd   : > { %1474 = vmatmul.mubr.bf16.gmra.mrb[40].mxu1 %v4343_v63  ;;  %2410 = vmatmul.mubr.bf16.gmra.mrb[120].mxu0 %v4346_v1  ;;  %v4394_v63 = vld [vmem:[%s5769_s4 + $0x20c] ss:$16 sps:$4 sm:$0xff]  }
 0x1be   : > { %3583 = vmatpush3.bf16.msra.mxu1 %v4800_v40  ;;  %3943 = vmatpush3.bf16.msra.mxu0 %v4631_v36 }
 0x1bf   : > { %3584 = vmatprep.subr.bf16.mxu1 %v4897_v46  ;;  %3944 = vmatprep.subr.bf16.mxu0 %v4690_v51 }
 0x1c0   : > { %1481 = vmatprep.mubr.bf16.mxu1 %v4347_v2  ;;  %2417 = vmatprep.mubr.bf16.mxu0 %v4350_v5 }
 0x1c2   : > { %3585 = vmatpush3.bf16.msra.mxu1 %v4793_v34  ;;  %3945 = vmatpush3.bf16.msra.mxu0 %v4628_v33 }
 0x1c3   : > { %3586 = vmatprep.subr.bf16.mxu1 %v4927_v44  ;;  %3946 = vmatprep.subr.bf16.mxu0 %v4715_v14 }
 0x1c5   : > { %1482 = vmatmul.mubr.bf16.gmra.mrb[44].mxu1 %v4349_v8  ;;  %2418 = vmatmul.mubr.bf16.gmra.mrb[124].mxu0 %v4352_v42 }
 0x1c6   : > { %3587 = vmatpush3.bf16.msra.mxu1 %v4828_v11  ;;  %3947 = vmatpush3.bf16.msra.mxu0 %v4643_v56 }
 0x1c7   : > { %3588 = vmatprep.subr.bf16.mxu1 %v4923_v17  ;;  %3948 = vmatprep.subr.bf16.mxu0 %v4710_v10 }
 0x1c8   : > { %1522 = vmatprep.mubr.bf16.mxu1 %v4355_v13  ;;  %2627 = vmatprep.mubr.bf16.mxu0 %v4358_v19  ;;  %v4392_v13 = vld [vmem:[%s5769_s4 + $0x208] ss:$16 sps:$4 sm:$0xff]  }
 0x1ca   : > { %3589 = vmatpush3.bf16.msra.mxu1 %v4821_v4  ;;  %3949 = vmatpush3.bf16.msra.mxu0 %v4640_v53 }
 0x1cb   : > { %3654 = vmatprep.subr.bf16.mxu1 %v4850_v45  ;;  %4014 = vmatprep.subr.bf16.mxu0 %v4655_v12  ;;  %v4373_v12 = vld [vmem:[%s5769_s4 + $0x128] ss:$16 sps:$4 sm:$0xff]  }
 0x1cd   : > { %1523 = vmatmul.mubr.bf16.vlgmr.msra.gmra.mrb[48].mxu1 %v4353_v20  ;;  %2628 = vmatmul.mubr.bf16.vlgmr.msra.gmra.mrb[128].mxu0 %v4356_v21  ;;  %v4395_v20 = vld [vmem:[%s5769_s4 + $0x22c] ss:$16 sps:$4 sm:$0xff]  }
 0x1ce   : > { %3655 = vmatpush3.bf16.msra.mxu1 %v4744_v41  ;;  %4015 = vmatpush3.bf16.msra.mxu0 %v4607_v0  ;;  %v4362_v0 = vld [vmem:[%s5769_s4 + $0xcc] ss:$16 sps:$4 sm:$0xff]  }
 0x1cf   : > { %3656 = vmatprep.subr.bf16.mxu1 %v4846_v38  ;;  %4016 = vmatprep.subr.bf16.mxu0 %v4652_v9  ;;  %v4371_v9 = vld [vmem:[%s5769_s4 + $0x12c] ss:$16 sps:$4 sm:$0xff]  }
 0x1d0   : > { %1530 = vmatprep.mubr.bf16.mxu1 %v4359_v22 }
 0x1d2   : > { %3657 = vmatpush3.bf16.msra.mxu1 %v4736_v37  ;;  %4017 = vmatpush3.bf16.msra.mxu0 %v4604_v61  ;;  %v4364_v61 = vld [vmem:[%s5769_s4 + $0xc8] ss:$16 sps:$4 sm:$0xff]  }
 0x1d3   : > { %3658 = vmatprep.subr.bf16.mxu1 %v4876_v16  ;;  %4018 = vmatprep.subr.bf16.mxu0 %v4675_v32  ;;  %v4425_v32 = vld [vmem:[%s5769_s4 + $0x344] ss:$16 sps:$4 sm:$0xff]  }
 0x1d5   : > { %1531 = vmatmul.mubr.bf16.gmra.mrb[52].mxu1 %v4361_v23 }
 0x1d6   : > { %3659 = vmatpush3.bf16.msra.mxu1 %v4772_v7  ;;  %4019 = vmatpush3.bf16.msra.mxu0 %v4619_v18  ;;  %v4365_v18 = vld [vmem:[%s5769_s4 + $0xec] ss:$16 sps:$4 sm:$0xff]  }
 0x1d7   : > { %3660 = vmatprep.subr.bf16.mxu1 %v4871_v6  ;;  %4020 = vmatprep.subr.bf16.mxu0 %v4670_v29  ;;  %v4374_v29 = vld [vmem:[%s5769_s4 + $0x14c] ss:$16 sps:$4 sm:$0xff]  }
 0x1d8   : > { %1538 = vmatprep.mubr.bf16.mxu1 %v4362_v0 }
 0x1da   : > { %3661 = vmatpush3.bf16.msra.mxu1 %v4765_v3  ;;  %4021 = vmatpush3.bf16.msra.mxu0 %v4616_v15  ;;  %v4367_v15 = vld [vmem:[%s5769_s4 + $0xe8] ss:$16 sps:$4 sm:$0xff]  }
 0x1db   : > { %3662 = vmatprep.subr.bf16.mxu1 %v4902_v49  ;;  %4022 = vmatprep.subr.bf16.mxu0 %v4695_v55  ;;  %v4376_v55 = vld [vmem:[%s5769_s4 + $0x148] ss:$16 sps:$4 sm:$0xff]  }
 0x1dd   : > { %1539 = vmatmul.mubr.bf16.gmra.mrb[56].mxu1 %v4364_v61 }
 0x1de   : > { %3663 = vmatpush3.bf16.msra.mxu1 %v4800_v40  ;;  %4023 = vmatpush3.bf16.msra.mxu0 %v4631_v36  ;;  %v4370_v36 = vld [vmem:[%s5769_s4 + $0x10c] ss:$16 sps:$4 sm:$0xff]  }
 0x1df   : > { %3664 = vmatprep.subr.bf16.mxu1 %v4897_v46  ;;  %4024 = vmatprep.subr.bf16.mxu0 %v4690_v51  ;;  %v4427_v51 = vld [vmem:[%s5769_s4 + $0x340] ss:$16 sps:$4 sm:$0xff]  }
 0x1e0   : > { %1546 = vmatprep.mubr.bf16.mxu1 %v4365_v18  ;;  %v4397_v18 = vld [vmem:[%s5769_s4 + $0x228] ss:$16 sps:$4 sm:$0xff]  }
 0x1e2   : > { %3665 = vmatpush3.bf16.msra.mxu1 %v4793_v34  ;;  %4025 = vmatpush3.bf16.msra.mxu0 %v4628_v33  ;;  %v4368_v33 = vld [vmem:[%s5769_s4 + $0x108] ss:$16 sps:$4 sm:$0xff]  }
 0x1e3   : > { %3666 = vmatprep.subr.bf16.mxu1 %v4927_v44  ;;  %4026 = vmatprep.subr.bf16.mxu0 %v4715_v14  ;;  %v4431_v14 = vld [vmem:[%s5769_s4 + $0x364] ss:$16 sps:$4 sm:$0xff]  }
 0x1e5   : > { %1547 = vmatmul.mubr.bf16.gmra.mrb[60].mxu1 %v4367_v15 }
 0x1e6   : > { %3667 = vmatpush3.bf16.msra.mxu1 %v4828_v11  ;;  %4027 = vmatpush3.bf16.msra.mxu0 %v4643_v56  ;;  %v4419_v56 = vld [vmem:[%s5769_s4 + $0x324] ss:$16 sps:$4 sm:$0xff]  }
 0x1e7   : > { %3668 = vmatprep.subr.bf16.mxu1 %v4923_v17  ;;  %4028 = vmatprep.subr.bf16.mxu0 %v4710_v10  ;;  %v4377_v10 = vld [vmem:[%s5769_s4 + $0x16c] ss:$16 sps:$4 sm:$0xff]  }
 0x1e8   : > { %1756 = vmatprep.mubr.bf16.mxu1 %v4370_v36  ;;  %2635 = vmatprep.mubr.bf16.mxu0 %v4419_v56  ;;  %v4398_v36 = vld [vmem:[%s5769_s4 + $0x24c] ss:$16 sps:$4 sm:$0xff]  }
 0x1ea   : > { %3669 = vmatpush3.bf16.msra.mxu1 %v4821_v4  ;;  %4029 = vmatpush3.bf16.msra.mxu0 %v4640_v53  ;;  %v4421_v53 = vld [vmem:[%s5769_s4 + $0x320] ss:$16 sps:$4 sm:$0xff]  }
 0x1eb   : > { %3734 = vmatprep.subr.bf16.mxu1 %v4850_v45  ;;  %2636 = vmatmul.mubr.bf16.gmra.mrb[132].mxu0 %v4421_v53 }
 0x1ec   : > { %2643 = vmatprep.mubr.bf16.mxu0 %v4425_v32 }
 0x1ed   : > { %1757 = vmatmul.mubr.bf16.vlgmr.msra.gmra.mrb[64].mxu1 %v4368_v33 }
 0x1ee   : > { %3735 = vmatpush3.bf16.msra.mxu1 %v4744_v41  ;;  %1764 = vmatprep.mubr.bf16.mxu1 %v4371_v9 }
 0x1ef   : > { %3736 = vmatprep.subr.bf16.mxu1 %v4846_v38 }
 0x1f2   : > { %3737 = vmatpush3.bf16.msra.mxu1 %v4736_v37 }
 0x1f3   : > { %3738 = vmatprep.subr.bf16.mxu1 %v4876_v16  ;;  %2644 = vmatmul.mubr.bf16.gmra.mrb[136].mxu0 %v4427_v51  ;;  %v4401_v51 = vld [vmem:[%s5769_s4 + $0x26c] ss:$16 sps:$4 sm:$0xff]  }
 0x1f4   : > { %2651 = vmatprep.mubr.bf16.mxu0 %v4431_v14 }
 0x1f5   : > { %1765 = vmatmul.mubr.bf16.gmra.mrb[68].mxu1 %v4373_v12 }
 0x1f6   : > { %3739 = vmatpush3.bf16.msra.mxu1 %v4772_v7  ;;  %1772 = vmatprep.mubr.bf16.mxu1 %v4374_v29  ;;  %v4400_v29 = vld [vmem:[%s5769_s4 + $0x248] ss:$16 sps:$4 sm:$0xff]  }
 0x1f7   : > { %3740 = vmatprep.subr.bf16.mxu1 %v4871_v6 }
 0x1fa   : > { %3741 = vmatpush3.bf16.msra.mxu1 %v4765_v3 }
 0x1fb   : > { %3742 = vmatprep.subr.bf16.mxu1 %v4902_v49  ;;  %2652 = vmatmul.mubr.bf16.gmra.mrb[140].mxu0 %v4433_v24 }
 0x1fc   : > { %2861 = vmatprep.mubr.bf16.mxu0 %v4439_v27 }
 0x1fd   : > { %1773 = vmatmul.mubr.bf16.gmra.mrb[72].mxu1 %v4376_v55 }
 0x1fe   : > { %3743 = vmatpush3.bf16.msra.mxu1 %v4800_v40  ;;  %1780 = vmatprep.mubr.bf16.mxu1 %v4377_v10 }
 0x1ff   : > { %3744 = vmatprep.subr.bf16.mxu1 %v4897_v46 }
 0x202   : > { %3745 = vmatpush3.bf16.msra.mxu1 %v4793_v34 }
 0x203   : > { %3746 = vmatprep.subr.bf16.mxu1 %v4927_v44  ;;  %2862 = vmatmul.mubr.bf16.vlgmr.msra.gmra.mrb[144].mxu0 %v4437_v28 }
 0x204   : > { %2869 = vmatprep.mubr.bf16.mxu0 %v4443_v35 }
 0x205   : > { %1781 = vmatmul.mubr.bf16.gmra.mrb[76].mxu1 %v4379_v25 }
 0x206   : > { %3747 = vmatpush3.bf16.msra.mxu1 %v4828_v11  ;;  %1990 = vmatprep.mubr.bf16.mxu1 %v4382_v26 }
 0x207   : > { %3748 = vmatprep.subr.bf16.mxu1 %v4923_v17 }
 0x20a   : > { %3749 = vmatpush3.bf16.msra.mxu1 %v4821_v4 }
 0x20b   : > { %3814 = vmatprep.subr.bf16.mxu1 %v4850_v45  ;;  %2870 = vmatmul.mubr.bf16.gmra.mrb[148].mxu0 %v4445_v39  ;;  %v4406_v39 = vld [vmem:[%s5769_s4 + $0x28c] ss:$16 sps:$4 sm:$0xff]  }
 0x20c   : > { %2877 = vmatprep.mubr.bf16.mxu0 %v4449_v48 }
 0x20d   : > { %1991 = vmatmul.mubr.bf16.vlgmr.msra.gmra.mrb[80].mxu1 %v4380_v30 }
 0x20e   : > { %3815 = vmatpush3.bf16.msra.mxu1 %v4744_v41  ;;  %1998 = vmatprep.mubr.bf16.mxu1 %v4383_v31  ;;  %v4403_v31 = vld [vmem:[%s5769_s4 + $0x268] ss:$16 sps:$4 sm:$0xff]  }
 0x20f   : > { %3816 = vmatprep.subr.bf16.mxu1 %v4846_v38 }
 0x212   : > { %3817 = vmatpush3.bf16.msra.mxu1 %v4736_v37 }
 0x213   : > { %3818 = vmatprep.subr.bf16.mxu1 %v4876_v16  ;;  %2878 = vmatmul.mubr.bf16.gmra.mrb[152].mxu0 %v4451_v50 }
 0x214   : > { %2885 = vmatprep.mubr.bf16.mxu0 %v4455_v57 }
 0x215   : > { %1999 = vmatmul.mubr.bf16.gmra.mrb[84].mxu1 %v4385_v43 }
 0x216   : > { %3819 = vmatpush3.bf16.msra.mxu1 %v4772_v7  ;;  %2006 = vmatprep.mubr.bf16.mxu1 %v4386_v47 }
 0x217   : > { %3820 = vmatprep.subr.bf16.mxu1 %v4871_v6 }
 0x21a   : > { %3821 = vmatpush3.bf16.msra.mxu1 %v4765_v3 }
 0x21b   : > { %3822 = vmatprep.subr.bf16.mxu1 %v4902_v49  ;;  %2886 = vmatmul.mubr.bf16.gmra.mrb[156].mxu0 %v4457_v59 }
 0x21d   : > { %2007 = vmatmul.mubr.bf16.gmra.mrb[88].mxu1 %v4388_v52 }
 0x21e   : > { %3823 = vmatpush3.bf16.msra.mxu1 %v4800_v40  ;;  %2014 = vmatprep.mubr.bf16.mxu1 %v4389_v54  ;;  %v4404_v54 = vld [vmem:[%s5769_s4 + $0x288] ss:$16 sps:$4 sm:$0xff]  }
 0x21f   : > { %3824 = vmatprep.subr.bf16.mxu1 %v4897_v46 }
 0x220   : > { %v3470_v58 = vpop.f32.mrb[0].mxu1  ;;  %v3630_v25 = vpop.f32.mrb[64].mxu0 }
 0x221   : > { %v3471_v62 = vpop.f32.mrb[1].mxu1  ;;  %v3631_v26 = vpop.f32.mrb[65].mxu0 }
 0x222   : > { %3825 = vmatpush3.bf16.msra.mxu1 %v4793_v34  ;;  %v5277_v1 = vadd.f32 %v3471_v62, %v3470_v58  ;;  %v3473_v2 = vpop.f32.mrb[2].mxu1  ;;  %v3633_v27 = vpop.f32.mrb[66].mxu0  ;;  %v5326_v28 = vadd.f32 %v3631_v26, %v3630_v25  ;;  %v4407_v58 = vld [vmem:[%s5769_s4 + $0x2ac] ss:$16 sps:$4 sm:$0xff]  }
 0x223   : > { %3826 = vmatprep.subr.bf16.mxu1 %v4927_v44  ;;  %v3474_v5 = vpop.f32.mrb[3].mxu1  ;;  %v3634_v30 = vpop.f32.mrb[67].mxu0 }
 0x224   : > { %v5280_v8 = vadd.f32 %v3474_v5, %v3473_v2  ;;  %v5331_v35 = vadd.f32 %v3634_v30, %v3633_v27  ;;  %v4409_v5 = vld [vmem:[%s5769_s4 + $0x2a8] ss:$16 sps:$4 sm:$0xff]   ;;  %v4418_v30 = vld [vmem:[%s5769_s4 + $0x30c] ss:$16 sps:$4 sm:$0xff]  }
 0x225   : > { %2015 = vmatmul.mubr.bf16.gmra.mrb[92].mxu1 %v4391_v60 }
 0x226   : > { %3827 = vmatpush3.bf16.msra.mxu1 %v4828_v11  ;;  %2224 = vmatprep.mubr.bf16.mxu1 %v4394_v63 }
 0x227   : > { %3828 = vmatprep.subr.bf16.mxu1 %v4923_v17 }
 0x228   : > { %v3476_v42 = vpop.f32.mrb[4].mxu1  ;;  %v3636_v43 = vpop.f32.mrb[68].mxu0 }
 0x229   : > { %v3477_v19 = vpop.f32.mrb[5].mxu1  ;;  %v3637_v47 = vpop.f32.mrb[69].mxu0 }
 0x22a   : > { %3829 = vmatpush3.bf16.msra.mxu1 %v4821_v4  ;;  %v5291_v21 = vadd.f32 %v3477_v19, %v3476_v42  ;;  %v3479_v22 = vpop.f32.mrb[6].mxu1  ;;  %v3639_v48 = vpop.f32.mrb[70].mxu0  ;;  %v5340_v50 = vadd.f32 %v3637_v47, %v3636_v43 }
 0x22b   : > { %3894 = vmatprep.subr.bf16.mxu1 %v4850_v45  ;;  %v3480_v23 = vpop.f32.mrb[7].mxu1  ;;  %v3640_v52 = vpop.f32.mrb[71].mxu0 }
 0x22c   : > { %v5294_v0 = vadd.f32 %v3480_v23, %v3479_v22  ;;  %v5345_v57 = vadd.f32 %v3640_v52, %v3639_v48 }
 0x22d   : > { %2225 = vmatmul.mubr.bf16.vlgmr.msra.gmra.mrb[96].mxu1 %v4392_v13  ;;  %v4410_v13 = vld [vmem:[%s5769_s4 + $0x2cc] ss:$16 sps:$4 sm:$0xff]  }
 0x22e   : > { %3895 = vmatpush3.bf16.msra.mxu1 %v4744_v41  ;;  %2232 = vmatprep.mubr.bf16.mxu1 %v4395_v20 }
 0x22f   : > { %3896 = vmatprep.subr.bf16.mxu1 %v4846_v38 }
 0x230   : > { %v3482_v61 = vpop.f32.mrb[8].mxu1  ;;  %v3642_v59 = vpop.f32.mrb[72].mxu0 }
 0x231   : > { %v3483_v15 = vpop.f32.mrb[9].mxu1  ;;  %v3643_v60 = vpop.f32.mrb[73].mxu0 }
 0x232   : > { %3897 = vmatpush3.bf16.msra.mxu1 %v4736_v37  ;;  %v5305_v33 = vadd.f32 %v3483_v15, %v3482_v61  ;;  %v3485_v9 = vpop.f32.mrb[10].mxu1  ;;  %v3645_v62 = vpop.f32.mrb[74].mxu0  ;;  %v5354_v63 = vadd.f32 %v3643_v60, %v3642_v59 }
 0x233   : > { %3898 = vmatprep.subr.bf16.mxu1 %v4876_v16  ;;  %v3486_v56 = vpop.f32.mrb[11].mxu1  ;;  %v3646_v2 = vpop.f32.mrb[75].mxu0 }
 0x234   : > { %v5308_v53 = vadd.f32 %v3486_v56, %v3485_v9  ;;  %v5359_v42 = vadd.f32 %v3646_v2, %v3645_v62 }
 0x235   : > { %2233 = vmatmul.mubr.bf16.gmra.mrb[100].mxu1 %v4397_v18  ;;  %v4412_v18 = vld [vmem:[%s5769_s4 + $0x2c8] ss:$16 sps:$4 sm:$0xff]  }
 0x236   : > { %3899 = vmatpush3.bf16.msra.mxu1 %v4772_v7  ;;  %2240 = vmatprep.mubr.bf16.mxu1 %v4398_v36  ;;  %v4413_v36 = vld [vmem:[%s5769_s4 + $0x2ec] ss:$16 sps:$4 sm:$0xff]  }
 0x237   : > { %3900 = vmatprep.subr.bf16.mxu1 %v4871_v6 }
 0x238   : > { %v3488_v12 = vpop.f32.mrb[12].mxu1  ;;  %v3648_v19 = vpop.f32.mrb[76].mxu0 }
 0x239   : > { %v3489_v32 = vpop.f32.mrb[13].mxu1  ;;  %v3649_v20 = vpop.f32.mrb[77].mxu0 }
 0x23a   : > { %3901 = vmatpush3.bf16.msra.mxu1 %v4765_v3  ;;  %v5319_v55 = vadd.f32 %v3489_v32, %v3488_v12  ;;  %v3491_v10 = vpop.f32.mrb[14].mxu1  ;;  %v3651_v22 = vpop.f32.mrb[78].mxu0  ;;  %v5368_v23 = vadd.f32 %v3649_v20, %v3648_v19 }
 0x23b   : > { %3902 = vmatprep.subr.bf16.mxu1 %v4902_v49  ;;  %v3492_v14 = vpop.f32.mrb[15].mxu1  ;;  %v3652_v61 = vpop.f32.mrb[79].mxu0 }
 0x23c   : > { %v5322_v24 = vadd.f32 %v3492_v14, %v3491_v10  ;;  %v5373_v15 = vadd.f32 %v3652_v61, %v3651_v22  ;;  %v4415_v14 = vld [vmem:[%s5769_s4 + $0x2e8] ss:$16 sps:$4 sm:$0xff]  }
 0x23d   : > { %2241 = vmatmul.mubr.bf16.gmra.mrb[104].mxu1 %v4400_v29 }
 0x23e   : > { %3903 = vmatpush3.bf16.msra.mxu1 %v4800_v40  ;;  %2248 = vmatprep.mubr.bf16.mxu1 %v4401_v51 }
 0x23f   : > { %3904 = vmatprep.subr.bf16.mxu1 %v4897_v46 }
 0x240   : > { %v3710_v9 = vpop.f32.mrb[80].mxu0 }
 0x241   : > { %v3711_v56 = vpop.f32.mrb[81].mxu0 }
 0x242   : > { %3905 = vmatpush3.bf16.msra.mxu1 %v4793_v34  ;;  %v3713_v12 = vpop.f32.mrb[82].mxu0  ;;  %v5382_v32 = vadd.f32 %v3711_v56, %v3710_v9 }
 0x243   : > { %3906 = vmatprep.subr.bf16.mxu1 %v4927_v44  ;;  %v3714_v51 = vpop.f32.mrb[83].mxu0 }
 0x244   : > { %v5387_v25 = vadd.f32 %v3714_v51, %v3713_v12 }
 0x245   : > { %2249 = vmatmul.mubr.bf16.gmra.mrb[108].mxu1 %v4403_v31 }
 0x246   : > { %3907 = vmatpush3.bf16.msra.mxu1 %v4828_v11  ;;  %2458 = vmatprep.mubr.bf16.mxu1 %v4406_v39 }
 0x247   : > { %3908 = vmatprep.subr.bf16.mxu1 %v4923_v17 }
 0x248   : > { %v3716_v47 = vpop.f32.mrb[84].mxu0 }
 0x249   : > { %v3717_v52 = vpop.f32.mrb[85].mxu0 }
 0x24a   : > { %3909 = vmatpush3.bf16.msra.mxu1 %v4821_v4  ;;  %v5402_v59 = vadd.f32 %v3717_v52, %v3716_v47 }
 0x24b   : > { %3974 = vmatprep.subr.bf16.mxu1 %v4850_v45 }
 0x24d   : > { %2459 = vmatmul.mubr.bf16.vlgmr.msra.gmra.mrb[112].mxu1 %v4404_v54  ;;  %v3719_v54 = vpop.f32.mrb[86].mxu0 }
 0x24e   : > { %3975 = vmatpush3.bf16.msra.mxu1 %v4744_v41  ;;  %2466 = vmatprep.mubr.bf16.mxu1 %v4407_v58  ;;  %v3720_v60 = vpop.f32.mrb[87].mxu0 }
 0x24f   : > { %3976 = vmatprep.subr.bf16.mxu1 %v4846_v38  ;;  %v5407_v2 = vadd.f32 %v3720_v60, %v3719_v54 }
 0x250   : > { %v3722_v61 = vpop.f32.mrb[88].mxu0 }
 0x252   : > { %3977 = vmatpush3.bf16.msra.mxu1 %v4736_v37 }
 0x253   : > { %3978 = vmatprep.subr.bf16.mxu1 %v4876_v16 }
 0x255   : > { %2467 = vmatmul.mubr.bf16.gmra.mrb[116].mxu1 %v4409_v5 }
 0x256   : > { %3979 = vmatpush3.bf16.msra.mxu1 %v4772_v7  ;;  %2474 = vmatprep.mubr.bf16.mxu1 %v4410_v13  ;;  %v4422_v13 = vld [vmem:[%s5769_s4 + $0x32c] ss:$16 sps:$4 sm:$0xff]  }
 0x257   : > { %3980 = vmatprep.subr.bf16.mxu1 %v4871_v6 }
 0x25a   : > { %3981 = vmatpush3.bf16.msra.mxu1 %v4765_v3 }
 0x25b   : > { %3982 = vmatprep.subr.bf16.mxu1 %v4902_v49 }
 0x25d   : > { %2475 = vmatmul.mubr.bf16.gmra.mrb[120].mxu1 %v4412_v18 }
 0x25e   : > { %3983 = vmatpush3.bf16.msra.mxu1 %v4800_v40  ;;  %2482 = vmatprep.mubr.bf16.mxu1 %v4413_v36  ;;  %v3723_v36 = vpop.f32.mrb[89].mxu0 }
 0x25f   : > { %3984 = vmatprep.subr.bf16.mxu1 %v4897_v46  ;;  %v3725_v9 = vpop.f32.mrb[90].mxu0  ;;  %v5422_v12 = vadd.f32 %v3723_v36, %v3722_v61 }
 0x260   : > { %v3510_v29 = vpop.f32.mrb[16].mxu1 }
 0x261   : > { %v3511_v10 = vpop.f32.mrb[17].mxu1 }
 0x262   : > { %v3512_v26 = vadd.f32 %v3511_v10, %v3510_v29  ;;  %v3513_v27 = vpop.f32.mrb[18].mxu1  ;;  %3985 = vmatpush3.bf16.msra.mxu1 %v4793_v34 }
 0x263   : > { %v3514_v31 = vpop.f32.mrb[19].mxu1  ;;  %3986 = vmatprep.subr.bf16.mxu1 %v4927_v44 }
 0x264   : > { %v5395_v39 = vadd.f32 %v3512_v26, %v5277_v1  ;;  %v3515_v43 = vadd.f32 %v3514_v31, %v3513_v27  ;;  %v4416_v1 = vld [vmem:[%s5769_s4 + $0x308] ss:$16 sps:$4 sm:$0xff]  }
 0x265   : > { %2483 = vmatmul.mubr.bf16.gmra.mrb[124].mxu1 %v4415_v14 }
 0x266   : > { %v5398_v48 = vadd.f32 %v3515_v43, %v5280_v8  ;;  %3987 = vmatpush3.bf16.msra.mxu1 %v4828_v11  ;;  %2692 = vmatprep.mubr.bf16.mxu1 %v4418_v30 }
 0x267   : > { %3988 = vmatprep.subr.bf16.mxu1 %v4923_v17 }
 0x268   : > { %v3516_v58 = vpop.f32.mrb[20].mxu1 }
 0x269   : > { %v3517_v62 = vpop.f32.mrb[21].mxu1 }
 0x26a   : > { %v3518_v8 = vadd.f32 %v3517_v62, %v3516_v58  ;;  %v3519_v5 = vpop.f32.mrb[22].mxu1  ;;  %3989 = vmatpush3.bf16.msra.mxu1 %v4821_v4 }
 0x26b   : > { %v3520_v19 = vpop.f32.mrb[23].mxu1  ;;  %4054 = vmatprep.subr.bf16.mxu1 %v4850_v45  ;;  %v3726_v45 = vpop.f32.mrb[91].mxu0 }
 0x26c   : > { %v5415_v20 = vadd.f32 %v3518_v8, %v5291_v21  ;;  %v3521_v22 = vadd.f32 %v3520_v19, %v3519_v5  ;;  %v4424_v21 = vld [vmem:[%s5769_s4 + $0x328] ss:$16 sps:$4 sm:$0xff]   ;;  %v5427_v51 = vadd.f32 %v3726_v45, %v3725_v9  ;;  %v3728_v27 = vpop.f32.mrb[92].mxu0 }
 0x26d   : > { %2693 = vmatmul.mubr.bf16.vlgmr.msra.gmra.mrb[128].mxu1 %v4416_v1 }
 0x26e   : > { %v5418_v18 = vadd.f32 %v3521_v22, %v5294_v0  ;;  %4055 = vmatpush3.bf16.msra.mxu1 %v4744_v41  ;;  %2700 = vmatprep.mubr.bf16.mxu1 %v4422_v13  ;;  %v4428_v41 = vld [vmem:[%s5769_s4 + $0x34c] ss:$16 sps:$4 sm:$0xff]  }
 0x26f   : > { %4056 = vmatprep.subr.bf16.mxu1 %v4846_v38 }
 0x270   : > { %v3522_v56 = vpop.f32.mrb[24].mxu1 }
 0x271   : > { %v3523_v29 = vpop.f32.mrb[25].mxu1 }
 0x272   : > { %v3524_v0 = vadd.f32 %v3523_v29, %v3522_v56  ;;  %v3525_v10 = vpop.f32.mrb[26].mxu1  ;;  %4057 = vmatpush3.bf16.msra.mxu1 %v4736_v37  ;;  %v3729_v37 = vpop.f32.mrb[93].mxu0 }
 0x273   : > { %v3526_v38 = vpop.f32.mrb[27].mxu1  ;;  %4058 = vmatprep.subr.bf16.mxu1 %v4876_v16  ;;  %v3731_v31 = vpop.f32.mrb[94].mxu0  ;;  %v5442_v47 = vadd.f32 %v3729_v37, %v3728_v27 }
 0x274   : > { %v5435_v14 = vadd.f32 %v3524_v0, %v5305_v33  ;;  %v3527_v26 = vadd.f32 %v3526_v38, %v3525_v10  ;;  %v3732_v16 = vpop.f32.mrb[95].mxu0  ;;  %v4430_v33 = vld [vmem:[%s5769_s4 + $0x348] ss:$16 sps:$4 sm:$0xff]  }
 0x275   : > { %2701 = vmatmul.mubr.bf16.gmra.mrb[132].mxu1 %v4424_v21  ;;  %v5447_v54 = vadd.f32 %v3732_v16, %v3731_v31  ;;  %v3790_v1 = vpop.f32.mrb[96].mxu0 }
 0x276   : > { %v5438_v30 = vadd.f32 %v3527_v26, %v5308_v53  ;;  %4059 = vmatpush3.bf16.msra.mxu1 %v4772_v7  ;;  %2708 = vmatprep.mubr.bf16.mxu1 %v4428_v41  ;;  %v4434_v7 = vld [vmem:[%s5769_s4 + $0x36c] ss:$16 sps:$4 sm:$0xff]  }
 0x277   : > { %4060 = vmatprep.subr.bf16.mxu1 %v4871_v6 }
 0x278   : > { %v3528_v43 = vpop.f32.mrb[28].mxu1 }
 0x279   : > { %v3529_v52 = vpop.f32.mrb[29].mxu1 }
 0x27a   : > { %v3530_v53 = vadd.f32 %v3529_v52, %v3528_v43  ;;  %v3531_v58 = vpop.f32.mrb[30].mxu1  ;;  %4061 = vmatpush3.bf16.msra.mxu1 %v4765_v3  ;;  %v3791_v3 = vpop.f32.mrb[97].mxu0 }
 0x27b   : > { %v3532_v6 = vpop.f32.mrb[31].mxu1  ;;  %4062 = vmatprep.subr.bf16.mxu1 %v4902_v49  ;;  %v3793_v5 = vpop.f32.mrb[98].mxu0  ;;  %v5462_v19 = vadd.f32 %v3791_v3, %v3790_v1 }
 0x27c   : > { %v5455_v60 = vadd.f32 %v3530_v53, %v5319_v55  ;;  %v3533_v62 = vadd.f32 %v3532_v6, %v3531_v58  ;;  %v3794_v49 = vpop.f32.mrb[99].mxu0  ;;  %v4436_v55 = vld [vmem:[%s5769_s4 + $0x368] ss:$16 sps:$4 sm:$0xff]  }
 0x27d   : > { %2709 = vmatmul.mubr.bf16.gmra.mrb[136].mxu1 %v4430_v33  ;;  %v5467_v61 = vadd.f32 %v3794_v49, %v3793_v5  ;;  %v3796_v56 = vpop.f32.mrb[100].mxu0 }
 0x27e   : > { %v5458_v8 = vadd.f32 %v3533_v62, %v5322_v24  ;;  %4063 = vmatpush3.bf16.msra.mxu1 %v4800_v40  ;;  %2716 = vmatprep.mubr.bf16.mxu1 %v4434_v7  ;;  %v4442_v40 = vld [vmem:[%s5769_s4 + $0x38c] ss:$16 sps:$4 sm:$0xff]   ;;  %v3797_v45 = vpop.f32.mrb[101].mxu0 }
 0x27f   : > { %4064 = vmatprep.subr.bf16.mxu1 %v4897_v46  ;;  %v3799_v29 = vpop.f32.mrb[102].mxu0  ;;  %v4452_v62 = vld [vmem:[%s5769_s4 + $0x3cc] ss:$16 sps:$4 sm:$0xff]  }
 0x280   : > { %v3550_v13 = vpop.f32.mrb[32].mxu1  ;;  %v3800_v0 = vpop.f32.mrb[103].mxu0 }
 0x281   : > { %v3551_v22 = vpop.f32.mrb[33].mxu1  ;;  %v5485_v41 = vadd.f32 %v3800_v0, %v3799_v29  ;;  %v3802_v37 = vpop.f32.mrb[104].mxu0 }
 0x282   : > { %v5469_v24 = vadd.f32 %v3551_v22, %v3550_v13  ;;  %v3553_v36 = vpop.f32.mrb[34].mxu1  ;;  %4065 = vmatpush3.bf16.msra.mxu1 %v4793_v34  ;;  %v5480_v34 = vadd.f32 %v3797_v45, %v3796_v56  ;;  %v3803_v31 = vpop.f32.mrb[105].mxu0 }
 0x283   : > { %v3554_v46 = vpop.f32.mrb[35].mxu1  ;;  %4066 = vmatprep.subr.bf16.mxu1 %v4927_v44  ;;  %v4440_v44 = vld [vmem:[%s5769_s4 + $0x388] ss:$16 sps:$4 sm:$0xff]   ;;  %v3805_v43 = vpop.f32.mrb[106].mxu0  ;;  %v5495_v52 = vadd.f32 %v3803_v31, %v3802_v37 }
 0x284   : > { %v5476_v9 = vadd.f32 %v3554_v46, %v3553_v36  ;;  %v3806_v33 = vpop.f32.mrb[107].mxu0  ;;  %v4454_v46 = vld [vmem:[%s5769_s4 + $0x3c8] ss:$16 sps:$4 sm:$0xff]  }
 0x285   : > { %2717 = vmatmul.mubr.bf16.gmra.mrb[140].mxu1 %v4436_v55  ;;  %v5500_v58 = vadd.f32 %v3806_v33, %v3805_v43  ;;  %v3808_v5 = vpop.f32.mrb[108].mxu0 }
 0x286   : > { %4067 = vmatpush3.bf16.msra.mxu1 %v4828_v11  ;;  %2926 = vmatprep.mubr.bf16.mxu1 %v4442_v40  ;;  %v4446_v11 = vld [vmem:[%s5769_s4 + $0x3ac] ss:$16 sps:$4 sm:$0xff]   ;;  %v3809_v13 = vpop.f32.mrb[109].mxu0 }
 0x287   : > { %4068 = vmatprep.subr.bf16.mxu1 %v4923_v17  ;;  %v3811_v49 = vpop.f32.mrb[110].mxu0  ;;  %v5509_v55 = vadd.f32 %v3809_v13, %v3808_v5 }
 0x288   : > { %v3556_v21 = vpop.f32.mrb[36].mxu1  ;;  %v3812_v36 = vpop.f32.mrb[111].mxu0 }
 0x289   : > { %v3557_v10 = vpop.f32.mrb[37].mxu1  ;;  %v5514_v56 = vadd.f32 %v3812_v36, %v3811_v49 }
 0x28a   : > { %v5487_v38 = vadd.f32 %v3557_v10, %v3556_v21  ;;  %v3559_v26 = vpop.f32.mrb[38].mxu1  ;;  %4069 = vmatpush3.bf16.msra.mxu1 %v4821_v4  ;;  %v4448_v4 = vld [vmem:[%s5769_s4 + $0x3a8] ss:$16 sps:$4 sm:$0xff]   ;;  %v4458_v21 = vld [vmem:[%s5769_s4 + $0x3ec] ss:$16 sps:$4 sm:$0xff]  }
 0x28b   : > { %v3560_v17 = vpop.f32.mrb[39].mxu1 }
 0x28c   : > { %v5493_v27 = vadd.f32 %v3560_v17, %v3559_v26 }
 0x28d   : > { %2927 = vmatmul.mubr.bf16.vlgmr.msra.gmra.mrb[144].mxu1 %v4440_v44  ;;  %v3870_v44 = vpop.f32.mrb[112].mxu0 }
 0x28e   : > { %2934 = vmatprep.mubr.bf16.mxu1 %v4446_v11  ;;  %v3871_v26 = vpop.f32.mrb[113].mxu0 }
 0x28f   : > { %v3873_v11 = vpop.f32.mrb[114].mxu0  ;;  %v5523_v37 = vadd.f32 %v3871_v26, %v3870_v44 }
 0x290   : > { %v3562_v16 = vpop.f32.mrb[40].mxu1  ;;  %v3874_v31 = vpop.f32.mrb[115].mxu0 }
 0x291   : > { %v3563_v53 = vpop.f32.mrb[41].mxu1  ;;  %v5528_v33 = vadd.f32 %v3874_v31, %v3873_v11  ;;  %v3876_v5 = vpop.f32.mrb[116].mxu0 }
 0x292   : > { %v5502_v7 = vadd.f32 %v3563_v53, %v3562_v16  ;;  %v3565_v6 = vpop.f32.mrb[42].mxu1  ;;  %v4460_v16 = vld [vmem:[%s5769_s4 + $0x3e8] ss:$16 sps:$4 sm:$0xff]  }
 0x293   : > { %v3566_v1 = vpop.f32.mrb[43].mxu1 }
 0x294   : > { %v5507_v3 = vadd.f32 %v3566_v1, %v3565_v6 }
 0x295   : > { %2935 = vmatmul.mubr.bf16.gmra.mrb[148].mxu1 %v4448_v4 }
 0x296   : > { %2942 = vmatprep.mubr.bf16.mxu1 %v4452_v62 }
 0x298   : > { %v3568_v22 = vpop.f32.mrb[44].mxu1 }
 0x299   : > { %v3569_v40 = vpop.f32.mrb[45].mxu1 }
 0x29a   : > { %v5516_v45 = vadd.f32 %v3569_v40, %v3568_v22  ;;  %v3571_v29 = vpop.f32.mrb[46].mxu1  ;;  %v3877_v22 = vpop.f32.mrb[117].mxu0 }
 0x29b   : > { %v3572_v0 = vpop.f32.mrb[47].mxu1  ;;  %v3879_v36 = vpop.f32.mrb[118].mxu0 }
 0x29c   : > { %v5521_v10 = vadd.f32 %v3572_v0, %v3571_v29  ;;  %v5540_v29 = vadd.f32 %v3877_v22, %v3876_v5 }
 0x29d   : > { %2943 = vmatmul.mubr.bf16.gmra.mrb[152].mxu1 %v4454_v46 }
 0x29e   : > { %2950 = vmatprep.mubr.bf16.mxu1 %v4458_v21  ;;  %v3880_v21 = vpop.f32.mrb[119].mxu0 }
 0x29f   : > { %v5542_v0 = vadd.f32 %v3880_v21, %v3879_v36  ;;  %v3882_v31 = vpop.f32.mrb[120].mxu0 }
 0x2a0   : > { %v3590_v17 = vpop.f32.mrb[48].mxu1 }
 0x2a1   : > { %v3591_v43 = vpop.f32.mrb[49].mxu1 }
 0x2a2   : > { %v3592_v53 = vadd.f32 %v3591_v43, %v3590_v17  ;;  %v3593_v4 = vpop.f32.mrb[50].mxu1 }
 0x2a3   : > { %v3594_v6 = vpop.f32.mrb[51].mxu1 }
 0x2a4   : > { %v5531_v62 = vadd.f32 %v3592_v53, %v5469_v24  ;;  %v3595_v1 = vadd.f32 %v3594_v6, %v3593_v4  ;;  %v3883_v53 = vpop.f32.mrb[121].mxu0 }
 0x2a5   : > { %2951 = vmatmul.mubr.bf16.gmra.mrb[156].mxu1 %v4460_v16  ;;  %v3885_v4 = vpop.f32.mrb[122].mxu0  ;;  %v5554_v5 = vadd.f32 %v3883_v53, %v3882_v31 }
 0x2a6   : > { %v5536_v49 = vadd.f32 %v3595_v1, %v5476_v9  ;;  %v3886_v22 = vpop.f32.mrb[123].mxu0 }
 0x2a8   : > { %v3596_v46 = vpop.f32.mrb[52].mxu1 }
 0x2a9   : > { %v3597_v24 = vpop.f32.mrb[53].mxu1 }
 0x2aa   : > { %v3598_v44 = vadd.f32 %v3597_v24, %v3596_v46  ;;  %v3599_v26 = vpop.f32.mrb[54].mxu1 }
 0x2ab   : > { %v3600_v11 = vpop.f32.mrb[55].mxu1 }
 0x2ac   : > { %v5545_v17 = vadd.f32 %v3598_v44, %v5487_v38  ;;  %v3601_v9 = vadd.f32 %v3600_v11, %v3599_v26  ;;  %v5556_v38 = vadd.f32 %v3886_v22, %v3885_v4  ;;  %v3888_v26 = vpop.f32.mrb[124].mxu0 }
 0x2ad   : > { %v3889_v31 = vpop.f32.mrb[125].mxu0 }
 0x2ae   : > { %v5550_v16 = vadd.f32 %v3601_v9, %v5493_v27  ;;  %v3891_v53 = vpop.f32.mrb[126].mxu0 }
 0x2b0   : > { %v3602_v1 = vpop.f32.mrb[56].mxu1 }
 0x2b1   : > { %v3603_v36 = vpop.f32.mrb[57].mxu1 }
 0x2b2   : > { %v3604_v46 = vadd.f32 %v3603_v36, %v3602_v1  ;;  %v3605_v21 = vpop.f32.mrb[58].mxu1  ;;  %v5568_v1 = vadd.f32 %v3889_v31, %v3888_v26  ;;  %v3892_v36 = vpop.f32.mrb[127].mxu0 }
 0x2b3   : > { %v3606_v24 = vpop.f32.mrb[59].mxu1 }
 0x2b4   : > { %v5559_v44 = vadd.f32 %v3604_v46, %v5502_v7  ;;  %v3607_v27 = vadd.f32 %v3606_v24, %v3605_v21  ;;  %v5570_v7 = vadd.f32 %v3892_v36, %v3891_v53 }
 0x2b6   : > { %v5564_v9 = vadd.f32 %v3607_v27, %v5507_v3  ;;  %5772 = vst [vmem:[#allocation2_spill] sm:$0xff] %v5570_v7  ;;  %v3950_v27 = vpop.f32.mrb[128].mxu0 }
 0x2b7   : > { %v3951_v26 = vpop.f32.mrb[129].mxu0 }
 0x2b8   : > { %v3608_v22 = vpop.f32.mrb[60].mxu1  ;;  %v3953_v31 = vpop.f32.mrb[130].mxu0 }
 0x2b9   : > { %v3609_v6 = vpop.f32.mrb[61].mxu1 }
 0x2ba   : > { %v3610_v46 = vadd.f32 %v3609_v6, %v3608_v22  ;;  %v3611_v21 = vpop.f32.mrb[62].mxu1  ;;  %v5582_v6 = vadd.f32 %v3951_v26, %v3950_v27  ;;  %v3954_v22 = vpop.f32.mrb[131].mxu0 }
 0x2bb   : > { %v3612_v24 = vpop.f32.mrb[63].mxu1 }
 0x2bc   : > { %v5573_v11 = vadd.f32 %v3610_v46, %v5516_v45  ;;  %v3613_v3 = vadd.f32 %v3612_v24, %v3611_v21  ;;  %v5584_v45 = vadd.f32 %v3954_v22, %v3953_v31  ;;  %v5774_v31 = vmax.f32 %v5398_v48, %v5536_v49 }
 0x2be   : > { %v5578_v4 = vadd.f32 %v3613_v3, %v5521_v10  ;;  %v3956_v10 = vpop.f32.mrb[132].mxu0  ;;  %v5773_v3 = vmax.f32 %v5395_v39, %v5531_v62 }
 0x2bf   : > { %v3957_v27 = vpop.f32.mrb[133].mxu0 }
 0x2c0   : > { %v3670_v36 = vpop.f32.mrb[64].mxu1  ;;  %v3959_v26 = vpop.f32.mrb[134].mxu0 }
 0x2c1   : > { %v3671_v40 = vpop.f32.mrb[65].mxu1 }
 0x2c2   : > { %v3672_v46 = vadd.f32 %v3671_v40, %v3670_v36  ;;  %v3673_v21 = vpop.f32.mrb[66].mxu1  ;;  %v5598_v36 = vadd.f32 %v3957_v27, %v3956_v10  ;;  %v5776_v27 = vmax.f32 %v5418_v18, %v5550_v16 }
 0x2c3   : > { %v3674_v24 = vpop.f32.mrb[67].mxu1 }
 0x2c4   : > { %v1759_v43 = vadd.f32 %v3672_v46, %v5326_v28  ;;  %v3675_v13 = vadd.f32 %v3674_v24, %v3673_v21  ;;  %v3960_v28 = vpop.f32.mrb[135].mxu0 }
 0x2c5   : > { %v5600_v21 = vadd.f32 %v3960_v28, %v3959_v26 }
 0x2c6   : > { %v5590_v7 = vmax.f32 %v5773_v3, %v1759_v43  ;;  %v1762_v53 = vadd.f32 %v3675_v13, %v5331_v35  ;;  %v3962_v13 = vpop.f32.mrb[136].mxu0  ;;  %v5775_v3 = vmax.f32 %v5415_v20, %v5545_v17 }
 0x2c8   : > { %v5596_v22 = vmax.f32 %v5774_v31, %v1762_v53  ;;  %v3676_v40 = vpop.f32.mrb[68].mxu1  ;;  %v3963_v53 = vpop.f32.mrb[137].mxu0 }
 0x2c9   : > { %v3677_v46 = vpop.f32.mrb[69].mxu1  ;;  %v3965_v10 = vpop.f32.mrb[138].mxu0 }
 0x2ca   : > { %v3678_v24 = vadd.f32 %v3677_v46, %v3676_v40  ;;  %v3679_v39 = vpop.f32.mrb[70].mxu1  ;;  %v5614_v40 = vadd.f32 %v3963_v53, %v3962_v13 }
 0x2cb   : > { %v3680_v62 = vpop.f32.mrb[71].mxu1 }
 0x2cc   : > { %v1767_v43 = vadd.f32 %v3678_v24, %v5340_v50  ;;  %v3681_v35 = vadd.f32 %v3680_v62, %v3679_v39  ;;  %v3966_v50 = vpop.f32.mrb[139].mxu0 }
 0x2cd   : > { %v5616_v46 = vadd.f32 %v3966_v50, %v3965_v10 }
 0x2ce   : > { %v5606_v48 = vmax.f32 %v5775_v3, %v1767_v43  ;;  %v1770_v49 = vadd.f32 %v3681_v35, %v5345_v57  ;;  %v3968_v62 = vpop.f32.mrb[140].mxu0  ;;  %v5777_v43 = vmax.f32 %v5435_v14, %v5559_v44  ;;  %v5778_v3 = vmax.f32 %v5438_v30, %v5564_v9 }
 0x2cf   : > { %v3969_v35 = vpop.f32.mrb[141].mxu0 }
 0x2d0   : > { %v5612_v26 = vmax.f32 %v5776_v27, %v1770_v49  ;;  %v3682_v31 = vpop.f32.mrb[72].mxu1  ;;  %v3971_v13 = vpop.f32.mrb[142].mxu0  ;;  %v5630_v10 = vadd.f32 %v3969_v35, %v3968_v62 }
 0x2d1   : > { %v3683_v28 = vpop.f32.mrb[73].mxu1 }
 0x2d2   : > { %v3684_v24 = vadd.f32 %v3683_v28, %v3682_v31  ;;  %v3685_v20 = vpop.f32.mrb[74].mxu1 }
 0x2d3   : > { %v3686_v17 = vpop.f32.mrb[75].mxu1 }
 0x2d4   : > { %v1775_v39 = vadd.f32 %v3684_v24, %v5354_v63  ;;  %v3687_v57 = vadd.f32 %v3686_v17, %v3685_v20  ;;  %v3972_v63 = vpop.f32.mrb[143].mxu0  ;;  %v5779_v20 = vmax.f32 %v5455_v60, %v5573_v11 }
 0x2d5   : > { %v5632_v31 = vadd.f32 %v3972_v63, %v3971_v13 }
 0x2d6   : > { %v5622_v18 = vmax.f32 %v5777_v43, %v1775_v39  ;;  %v1778_v16 = vadd.f32 %v3687_v57, %v5359_v42  ;;  %v4030_v24 = vpop.f32.mrb[144].mxu0  ;;  %v5780_v57 = vmax.f32 %v5458_v8, %v5578_v4 }
 0x2d7   : > { %v4031_v17 = vpop.f32.mrb[145].mxu0 }
 0x2d8   : > { %v5628_v49 = vmax.f32 %v5778_v3, %v1778_v16  ;;  %v3688_v53 = vpop.f32.mrb[76].mxu1  ;;  %v4033_v39 = vpop.f32.mrb[146].mxu0  ;;  %v5646_v16 = vadd.f32 %v4031_v17, %v4030_v24 }
 0x2d9   : > { %v3689_v27 = vpop.f32.mrb[77].mxu1 }
 0x2da   : > { %v3690_v50 = vadd.f32 %v3689_v27, %v3688_v53  ;;  %v3691_v14 = vpop.f32.mrb[78].mxu1 }
 0x2db   : > { %v3692_v44 = vpop.f32.mrb[79].mxu1 }
 0x2dc   : > { %v1783_v28 = vadd.f32 %v3690_v50, %v5368_v23  ;;  %v3693_v42 = vadd.f32 %v3692_v44, %v3691_v14  ;;  %v4034_v23 = vpop.f32.mrb[147].mxu0 }
 0x2dd   : > { %v5648_v13 = vadd.f32 %v4034_v23, %v4033_v39 }
 0x2de   : > { %v5638_v30 = vmax.f32 %v5779_v20, %v1783_v28  ;;  %v1786_v9 = vadd.f32 %v3693_v42, %v5373_v15  ;;  %v4036_v63 = vpop.f32.mrb[148].mxu0 }
 0x2df   : > { %v4037_v27 = vpop.f32.mrb[149].mxu0 }
 0x2e0   : > { %v5644_v62 = vmax.f32 %v5780_v57, %v1786_v9  ;;  %v3750_v43 = vpop.f32.mrb[80].mxu1  ;;  %v4039_v50 = vpop.f32.mrb[150].mxu0  ;;  %v5657_v24 = vadd.f32 %v4037_v27, %v4036_v63 }
 0x2e1   : > { %v3751_v35 = vpop.f32.mrb[81].mxu1  ;;  %v4040_v28 = vpop.f32.mrb[151].mxu0 }
 0x2e2   : > { %v3752_v3 = vadd.f32 %v3751_v35, %v3750_v43  ;;  %v3753_v60 = vpop.f32.mrb[82].mxu1  ;;  %v5659_v20 = vadd.f32 %v4040_v28, %v4039_v50 }
 0x2e3   : > { %v3754_v11 = vpop.f32.mrb[83].mxu1 }
 0x2e4   : > { %v5651_v53 = vadd.f32 %v3752_v3, %v5382_v32  ;;  %v3755_v15 = vadd.f32 %v3754_v11, %v3753_v60 }
 0x2e6   : > { %v2023_v8 = vmax.f32 %v5590_v7, %v5651_v53  ;;  %v1996_v4 = vadd.f32 %v3755_v15, %v5387_v25  ;;  %v4042_v7 = vpop.f32.mrb[152].mxu0 }
 0x2e7   : > { %v4043_v23 = vpop.f32.mrb[153].mxu0 }
 0x2e8   : > { %v2024_v14 = vmax.f32 %v5596_v22, %v1996_v4  ;;  %v3756_v44 = vpop.f32.mrb[84].mxu1  ;;  %v4045_v22 = vpop.f32.mrb[154].mxu0  ;;  %v5665_v53 = vadd.f32 %v4043_v23, %v4042_v7 }
 0x2e9   : > { %v3757_v42 = vpop.f32.mrb[85].mxu1  ;;  %v4046_v60 = vpop.f32.mrb[155].mxu0 }
 0x2ea   : > { %v3758_v32 = vadd.f32 %v3757_v42, %v3756_v44  ;;  %v3759_v9 = vpop.f32.mrb[86].mxu1  ;;  %v5667_v15 = vadd.f32 %v4046_v60, %v4045_v22 }
 0x2eb   : > { %v3760_v17 = vpop.f32.mrb[87].mxu1 }
 0x2ec   : > { %v2001_v39 = vadd.f32 %v3758_v32, %v5402_v59  ;;  %v3761_v57 = vadd.f32 %v3760_v17, %v3759_v9 }
 0x2ee   : > { %v2025_v25 = vmax.f32 %v5606_v48, %v2001_v39  ;;  %v2004_v43 = vadd.f32 %v3761_v57, %v5407_v2  ;;  %v4048_v48 = vpop.f32.mrb[156].mxu0 }
 0x2ef   : > { %v4049_v28 = vpop.f32.mrb[157].mxu0 }
 0x2f0   : > { %v2026_v35 = vmax.f32 %v5612_v26, %v2004_v43  ;;  %v3762_v3 = vpop.f32.mrb[88].mxu1  ;;  %v4051_v26 = vpop.f32.mrb[158].mxu0  ;;  %v5673_v39 = vadd.f32 %v4049_v28, %v4048_v48  ;;  %v4463_v48 = vld [vmem:[%s5770_s5] sm:$0xff]  }
 0x2f1   : > { %v3763_v11 = vpop.f32.mrb[89].mxu1  ;;  %v4052_v9 = vpop.f32.mrb[159].mxu0  ;;  %4194 = vmatprep.mubr.msk.bf16.mxu0 %vm2985_vm0, %v4463_v48 }
 0x2f2   : > { %v3764_v63 = vadd.f32 %v3763_v11, %v3762_v3  ;;  %v3765_v4 = vpop.f32.mrb[90].mxu1  ;;  %v5675_v57 = vadd.f32 %v4052_v9, %v4051_v26 }
 0x2f3   : > { %v3766_v59 = vpop.f32.mrb[91].mxu1 }
 0x2f4   : > { %v2009_v27 = vadd.f32 %v3764_v63, %v5422_v12  ;;  %v3767_v50 = vadd.f32 %v3766_v59, %v3765_v4 }
 0x2f6   : > { %v2027_v2 = vmax.f32 %v5622_v18, %v2009_v27  ;;  %v2012_v44 = vadd.f32 %v3767_v50, %v5427_v51 }
 0x2f8   : > { %v2028_v42 = vmax.f32 %v5628_v49, %v2012_v44  ;;  %v3768_v32 = vpop.f32.mrb[92].mxu1 }
 0x2f9   : > { %v3769_v17 = vpop.f32.mrb[93].mxu1 }
 0x2fa   : > { %v3770_v7 = vadd.f32 %v3769_v17, %v3768_v32  ;;  %v3771_v43 = vpop.f32.mrb[94].mxu1 }
 0x2fb   : > { %v3772_v12 = vpop.f32.mrb[95].mxu1 }
 0x2fc   : > { %v2017_v23 = vadd.f32 %v3770_v7, %v5442_v47  ;;  %v3773_v22 = vadd.f32 %v3772_v12, %v3771_v43  ;;  %v4461_v47 = vld [vmem:[%s5770_s5 + $0x10] sm:$0xff]  }
 0x2fd   : > { %4206 = vmatprep.mubr.msk.bf16.mxu1 %vm2985_vm0, %v4461_v47 }
 0x2fe   : > { %v2029_v18 = vmax.f32 %v5638_v30, %v2017_v23  ;;  %v2020_v51 = vadd.f32 %v3773_v22, %v5447_v54 }
 0x300   : > { %v2030_v3 = vmax.f32 %v5644_v62, %v2020_v51  ;;  %v3830_v49 = vpop.f32.mrb[96].mxu1 }
 0x301   : > { %v3831_v60 = vpop.f32.mrb[97].mxu1 }
 0x302   : > { %v3832_v11 = vadd.f32 %v3831_v60, %v3830_v49  ;;  %v3833_v63 = vpop.f32.mrb[98].mxu1 }
 0x303   : > { %v3834_v4 = vpop.f32.mrb[99].mxu1 }
 0x304   : > { %v2227_v59 = vadd.f32 %v3832_v11, %v5462_v19  ;;  %v3835_v27 = vadd.f32 %v3834_v4, %v3833_v63 }
 0x306   : > { %v5685_v50 = vmax.f32 %v2023_v8, %v2227_v59  ;;  %v2230_v30 = vadd.f32 %v3835_v27, %v5467_v61 }
 0x308   : > { %v5689_v54 = vmax.f32 %v2024_v14, %v2230_v30  ;;  %v3836_v62 = vpop.f32.mrb[100].mxu1 }
 0x309   : > { %v3837_v19 = vpop.f32.mrb[101].mxu1 }
 0x30a   : > { %v3838_v44 = vadd.f32 %v3837_v19, %v3836_v62  ;;  %v3839_v28 = vpop.f32.mrb[102].mxu1 }
 0x30b   : > { %v3840_v26 = vpop.f32.mrb[103].mxu1 }
 0x30c   : > { %v2235_v8 = vadd.f32 %v3838_v44, %v5480_v34  ;;  %v3841_v32 = vadd.f32 %v3840_v26, %v3839_v28 }
 0x30e   : > { %v5696_v9 = vmax.f32 %v2025_v25, %v2235_v8  ;;  %v2238_v61 = vadd.f32 %v3841_v32, %v5485_v41 }
 0x310   : > { %v5699_v14 = vmax.f32 %v2026_v35, %v2238_v61  ;;  %v3842_v17 = vpop.f32.mrb[104].mxu1 }
 0x311   : > { %v3843_v7 = vpop.f32.mrb[105].mxu1 }
 0x312   : > { %v3844_v43 = vadd.f32 %v3843_v7, %v3842_v17  ;;  %v3845_v12 = vpop.f32.mrb[106].mxu1 }
 0x313   : > { %v3846_v23 = vpop.f32.mrb[107].mxu1 }
 0x314   : > { %v2243_v22 = vadd.f32 %v3844_v43, %v5495_v52  ;;  %v3847_v51 = vadd.f32 %v3846_v23, %v3845_v12 }
 0x316   : > { %v5702_v49 = vmax.f32 %v2027_v2, %v2243_v22  ;;  %v2246_v60 = vadd.f32 %v3847_v51, %v5500_v58 }
 0x318   : > { %v5705_v34 = vmax.f32 %v2028_v42, %v2246_v60  ;;  %v3848_v25 = vpop.f32.mrb[108].mxu1 }
 0x319   : > { %v3849_v11 = vpop.f32.mrb[109].mxu1 }
 0x31a   : > { %v3850_v63 = vadd.f32 %v3849_v11, %v3848_v25  ;;  %v3851_v41 = vpop.f32.mrb[110].mxu1 }
 0x31b   : > { %v3852_v35 = vpop.f32.mrb[111].mxu1 }
 0x31c   : > { %v2251_v4 = vadd.f32 %v3850_v63, %v5509_v55  ;;  %v3853_v59 = vadd.f32 %v3852_v35, %v3851_v41 }
 0x31e   : > { %v5708_v27 = vmax.f32 %v2029_v18, %v2251_v4  ;;  %v2254_v47 = vadd.f32 %v3853_v59, %v5514_v56  ;;  %v5781_v4 = vld [vmem:[#allocation2_spill] sm:$0xff] }
 0x320   : > { %v5711_v52 = vmax.f32 %v2030_v3, %v2254_v47  ;;  %v3910_v2 = vpop.f32.mrb[112].mxu1 }
 0x321   : > { %v3911_v30 = vpop.f32.mrb[113].mxu1 }
 0x322   : > { %v3912_v62 = vadd.f32 %v3911_v30, %v3910_v2  ;;  %v3913_v58 = vpop.f32.mrb[114].mxu1 }
 0x323   : > { %v3914_v42 = vpop.f32.mrb[115].mxu1 }
 0x324   : > { %v2461_v48 = vadd.f32 %v3912_v62, %v5523_v37  ;;  %v3915_v19 = vadd.f32 %v3914_v42, %v3913_v58 }
 0x326   : > { %v2491_v44 = vmax.f32 %v5685_v50, %v2461_v48  ;;  %v2464_v28 = vadd.f32 %v3915_v19, %v5528_v33 }
 0x328   : > { %v2492_v55 = vmax.f32 %v5689_v54, %v2464_v28  ;;  %v3916_v18 = vpop.f32.mrb[116].mxu1 }
 0x329   : > { %v3917_v26 = vpop.f32.mrb[117].mxu1 }
 0x32a   : > { %v3918_v8 = vadd.f32 %v3917_v26, %v3916_v18  ;;  %v3919_v56 = vpop.f32.mrb[118].mxu1 }
 0x32b   : > { %v3920_v3 = vpop.f32.mrb[119].mxu1 }
 0x32c   : > { %v2469_v32 = vadd.f32 %v3918_v8, %v5540_v29  ;;  %v3921_v61 = vadd.f32 %v3920_v3, %v3919_v56 }
 0x32e   : > { %v2493_v17 = vmax.f32 %v5696_v9, %v2469_v32  ;;  %v2472_v7 = vadd.f32 %v3921_v61, %v5542_v0 }
 0x330   : > { %v2494_v37 = vmax.f32 %v5699_v14, %v2472_v7  ;;  %v3922_v43 = vpop.f32.mrb[120].mxu1 }
 0x331   : > { %v3923_v50 = vpop.f32.mrb[121].mxu1 }
 0x332   : > { %v3924_v12 = vadd.f32 %v3923_v50, %v3922_v43  ;;  %v3925_v33 = vpop.f32.mrb[122].mxu1 }
 0x333   : > { %v3926_v23 = vpop.f32.mrb[123].mxu1 }
 0x334   : > { %v2477_v54 = vadd.f32 %v3924_v12, %v5554_v5  ;;  %v3927_v22 = vadd.f32 %v3926_v23, %v3925_v33 }
 0x336   : > { %v2495_v51 = vmax.f32 %v5702_v49, %v2477_v54  ;;  %v2480_v60 = vadd.f32 %v3927_v22, %v5556_v38 }
 0x338   : > { %v2496_v29 = vmax.f32 %v5705_v34, %v2480_v60  ;;  %v3928_v25 = vpop.f32.mrb[124].mxu1 }
 0x339   : > { %v3929_v9 = vpop.f32.mrb[125].mxu1 }
 0x33a   : > { %v3930_v11 = vadd.f32 %v3929_v9, %v3928_v25  ;;  %v3931_v0 = vpop.f32.mrb[126].mxu1 }
 0x33b   : > { %v3932_v63 = vpop.f32.mrb[127].mxu1 }
 0x33c   : > { %v2485_v14 = vadd.f32 %v3930_v11, %v5568_v1  ;;  %v3933_v41 = vadd.f32 %v3932_v63, %v3931_v0 }
 0x33e   : > { %v2497_v35 = vmax.f32 %v5708_v27, %v2485_v14  ;;  %v2488_v59 = vadd.f32 %v3933_v41, %v5781_v4 }
 0x340   : > { %v2498_v5 = vmax.f32 %v5711_v52, %v2488_v59  ;;  %v3990_v47 = vpop.f32.mrb[128].mxu1 }
 0x341   : > { %v3991_v49 = vpop.f32.mrb[129].mxu1 }
 0x342   : > { %v3992_v2 = vadd.f32 %v3991_v49, %v3990_v47  ;;  %v3993_v38 = vpop.f32.mrb[130].mxu1 }
 0x343   : > { %v3994_v30 = vpop.f32.mrb[131].mxu1 }
 0x344   : > { %v2695_v34 = vadd.f32 %v3992_v2, %v5582_v6  ;;  %v3995_v62 = vadd.f32 %v3994_v30, %v3993_v38 }
 0x346   : > { %v2725_v58 = vmax.f32 %v2491_v44, %v2695_v34  ;;  %v2698_v42 = vadd.f32 %v3995_v62, %v5584_v45 }
 0x348   : > { %v2726_v48 = vmax.f32 %v2492_v55, %v2698_v42  ;;  %v3996_v1 = vpop.f32.mrb[132].mxu1 }
 0x349   : > { %v3997_v19 = vpop.f32.mrb[133].mxu1 }
 0x34a   : > { %v3998_v28 = vadd.f32 %v3997_v19, %v3996_v1  ;;  %v3999_v27 = vpop.f32.mrb[134].mxu1 }
 0x34b   : > { %v4000_v18 = vpop.f32.mrb[135].mxu1 }
 0x34c   : > { %v2703_v26 = vadd.f32 %v3998_v28, %v5598_v36  ;;  %v4001_v52 = vadd.f32 %v4000_v18, %v3999_v27 }
 0x34e   : > { %v2727_v8 = vmax.f32 %v2493_v17, %v2703_v26  ;;  %v2706_v56 = vadd.f32 %v4001_v52, %v5600_v21 }
 0x350   : > { %v2728_v3 = vmax.f32 %v2494_v37, %v2706_v56  ;;  %v4002_v32 = vpop.f32.mrb[136].mxu1 }
 0x351   : > { %v4003_v61 = vpop.f32.mrb[137].mxu1 }
 0x352   : > { %v4004_v6 = vadd.f32 %v4003_v61, %v4002_v32  ;;  %v4005_v7 = vpop.f32.mrb[138].mxu1 }
 0x353   : > { %v4006_v44 = vpop.f32.mrb[139].mxu1 }
 0x354   : > { %v2711_v45 = vadd.f32 %v4004_v6, %v5614_v40  ;;  %v4007_v55 = vadd.f32 %v4006_v44, %v4005_v7 }
 0x356   : > { %v2729_v43 = vmax.f32 %v2495_v51, %v2711_v45  ;;  %v2714_v50 = vadd.f32 %v4007_v55, %v5616_v46 }
 0x358   : > { %v2730_v12 = vmax.f32 %v2496_v29, %v2714_v50  ;;  %v4008_v33 = vpop.f32.mrb[140].mxu1 }
 0x359   : > { %v4009_v23 = vpop.f32.mrb[141].mxu1 }
 0x35a   : > { %v4010_v36 = vadd.f32 %v4009_v23, %v4008_v33  ;;  %v4011_v54 = vpop.f32.mrb[142].mxu1 }
 0x35b   : > { %v4012_v17 = vpop.f32.mrb[143].mxu1 }
 0x35c   : > { %v2719_v21 = vadd.f32 %v4010_v36, %v5630_v10  ;;  %v4013_v37 = vadd.f32 %v4012_v17, %v4011_v54 }
 0x35e   : > { %v2731_v22 = vmax.f32 %v2497_v35, %v2719_v21  ;;  %v2722_v60 = vadd.f32 %v4013_v37, %v5632_v31 }
 0x360   : > { %v2732_v25 = vmax.f32 %v2498_v5, %v2722_v60  ;;  %v4070_v9 = vpop.f32.mrb[144].mxu1 }
 0x361   : > { %v4071_v11 = vpop.f32.mrb[145].mxu1 }
 0x362   : > { %v4072_v40 = vadd.f32 %v4071_v11, %v4070_v9  ;;  %v4073_v0 = vpop.f32.mrb[146].mxu1 }
 0x363   : > { %v4074_v51 = vpop.f32.mrb[147].mxu1 }
 0x364   : > { %v2929_v46 = vadd.f32 %v4072_v40, %v5646_v16  ;;  %v4075_v29 = vadd.f32 %v4074_v51, %v4073_v0 }
 0x366   : > { %v2959_v63 = vmax.f32 %v2725_v58, %v2929_v46  ;;  %v2932_v14 = vadd.f32 %v4075_v29, %v5648_v13 }
 0x368   : > { %v2960_v41 = vmax.f32 %v2726_v48, %v2932_v14  ;;  %v4076_v4 = vpop.f32.mrb[148].mxu1 }
 0x369   : > { %v4077_v59 = vpop.f32.mrb[149].mxu1 }
 0x36a   : > { %v2967_v10 = vpack.c.bf16 %v2960_v41, %v2959_v63  ;;  %v4078_v47 = vadd.f32 %v4077_v59, %v4076_v4  ;;  %v4079_v35 = vpop.f32.mrb[150].mxu1 }
 0x36b   : > { %v4080_v49 = vpop.f32.mrb[151].mxu1 }
 0x36c   : > { %v2937_v31 = vadd.f32 %v4078_v47, %v5657_v24  ;;  %v4081_v5 = vadd.f32 %v4080_v49, %v4079_v35  ;;  %4186 = vmatprep.subr.bf16.mxu0 %v2967_v10  ;;  %4198 = vmatprep.subr.bf16.mxu1 %v2967_v10 }
 0x36d   : > { %4187 = vmatpush3.bf16.msra.mxu0 %v2967_v10  ;;  %4199 = vmatpush3.bf16.msra.mxu1 %v2967_v10 }
 0x36e   : > { %v2961_v2 = vmax.f32 %v2727_v8, %v2937_v31  ;;  %v2940_v16 = vadd.f32 %v4081_v5, %v5659_v20 }
 0x370   : > { %v2962_v38 = vmax.f32 %v2728_v3, %v2940_v16  ;;  %v4082_v30 = vpop.f32.mrb[152].mxu1 }
 0x371   : > { %v4083_v13 = vpop.f32.mrb[153].mxu1 }
 0x372   : > { %v2968_v34 = vpack.c.bf16 %v2962_v38, %v2961_v2  ;;  %v4084_v62 = vadd.f32 %v4083_v13, %v4082_v30  ;;  %v4085_v58 = vpop.f32.mrb[154].mxu1 }
 0x373   : > { %v4086_v42 = vpop.f32.mrb[155].mxu1 }
 0x374   : > { %v2945_v48 = vadd.f32 %v4084_v62, %v5665_v53  ;;  %v4087_v1 = vadd.f32 %v4086_v42, %v4085_v58  ;;  %4188 = vmatprep.subr.bf16.mxu0 %v2968_v34  ;;  %4200 = vmatprep.subr.bf16.mxu1 %v2968_v34 }
 0x375   : > { %4189 = vmatpush3.bf16.msra.mxu0 %v2968_v34  ;;  %4201 = vmatpush3.bf16.msra.mxu1 %v2968_v34 }
 0x376   : > { %v2963_v24 = vmax.f32 %v2729_v43, %v2945_v48  ;;  %v2948_v19 = vadd.f32 %v4087_v1, %v5667_v15  ;;  %v4462_v15 = vld [vmem:[%s5770_s5 + $0x18] sm:$0xff]  }
 0x378   : > { %v2964_v28 = vmax.f32 %v2730_v12, %v2948_v19  ;;  %v4088_v27 = vpop.f32.mrb[156].mxu1 }
 0x379   : > { %v4089_v20 = vpop.f32.mrb[157].mxu1 }
 0x37a   : > { %v2969_v18 = vpack.c.bf16 %v2964_v28, %v2963_v24  ;;  %v4090_v26 = vadd.f32 %v4089_v20, %v4088_v27  ;;  %v4091_v52 = vpop.f32.mrb[158].mxu1 }
 0x37b   : > { %v4092_v8 = vpop.f32.mrb[159].mxu1 }
 0x37c   : > { %v2953_v56 = vadd.f32 %v4090_v26, %v5673_v39  ;;  %v4093_v3 = vadd.f32 %v4092_v8, %v4091_v52  ;;  %4190 = vmatprep.subr.bf16.mxu0 %v2969_v18  ;;  %4202 = vmatprep.subr.bf16.mxu1 %v2969_v18  ;;  %v4464_v39 = vld [vmem:[%s5770_s5 + $0x8] sm:$0xff]  }
 0x37d   : > { %4191 = vmatpush3.bf16.msra.mxu0 %v2969_v18  ;;  %4203 = vmatpush3.bf16.msra.mxu1 %v2969_v18 }
 0x37e   : > { %v2965_v53 = vmax.f32 %v2731_v22, %v2953_v56  ;;  %v2956_v32 = vadd.f32 %v4093_v3, %v5675_v57 }
 0x380   : > { %v2966_v61 = vmax.f32 %v2732_v25, %v2956_v32 }
 0x382   : > { %v2970_v6 = vpack.c.bf16 %v2966_v61, %v2965_v53 }
 0x384   : > { %4192 = vmatprep.subr.bf16.mxu0 %v2970_v6  ;;  %4204 = vmatprep.subr.bf16.mxu1 %v2970_v6 }
 0x385   : > { %4193 = vmatpush3.bf16.msra.mxu0 %v2970_v6  ;;  %4205 = vmatpush3.bf16.msra.mxu1 %v2970_v6 }
 0x388   : > { %4207 = vmatmul.mubr.msk.bf16.vlgmr.msra.gmra.mrb[160].mxu1 %vm2985_vm0, %v4462_v15  ;;  %4195 = vmatmul.mubr.msk.bf16.vlgmr.msra.gmra.mrb[160].mxu0 %vm2985_vm0, %v4464_v39 }
 0x45b   : > { %v4208_v57 = vpop.f32.mrb[160].mxu1  ;;  %v4196_v7 = vpop.f32.mrb[160].mxu0 }
 0x45c   : > { %v3095_v44 = vpop.f32.mrb[161].mxu1  ;;  %v3026_v45 = vpop.f32.mrb[161].mxu0 }
 0x45d   : > { %v4209_v55 = vpop.f32.mrb[162].mxu1  ;;  %v4197_v43 = vpop.f32.mrb[162].mxu0 }
 0x45e   : > { %v4224_v50 = vpack.i.bf16 %v4209_v55, %v4208_v57  ;;  %v3098_v12 = vpop.f32.mrb[163].mxu1  ;;  %v3029_v33 = vpop.f32.mrb[163].mxu0 }
 0x45f   : > { %v4219_v23 = vpack.i.bf16 %v3098_v12, %v3095_v44 }
 0x461   : > { %4220 = vrot.lane.b32.xlu0 %v4219_v23, %s4473_s26 }
 0x465   : > { %4225 = vrot.lane.b32.xlu0 %v4224_v50, %s4473_s26 }
 0x4d3   : > { %v4221_v36 = vpop.permute.xlu0 %4220 }
 0x4d4   : > { %v4223_v54 = vunpack.i.h.bf16 %v4221_v36  ;;  %v4222_v17 = vunpack.i.l.bf16 %v4221_v36 }
 0x4d6   : > { %v3126_v21 = vsel %vm2985_vm0, %v3026_v45, %v4222_v17  ;;  %v3127_v37 = vsel %vm2985_vm0, %v3029_v33, %v4223_v54 }
 0x4d7   : > { %v4226_v22 = vpop.permute.xlu0 %4225  ;;  %v3406_v60 = vpack.c.bf16 %v3127_v37, %v3126_v21 }
 0x4d8   : > { %v4228_v25 = vunpack.i.h.bf16 %v4226_v22  ;;  %v4227_v9 = vunpack.i.l.bf16 %v4226_v22 }
 0x4d9   : > { %3407 = vst [vmem:[%s253_s7] sm:$0xff] %v3406_v60  }
 0x4da   : > { %v3128_v11 = vsel %vm2985_vm0, %v4196_v7, %v4227_v9  ;;  %v3129_v40 = vsel %vm2985_vm0, %v4197_v43, %v4228_v25 }
 0x4db   : > { %v3411_v0 = vpack.c.bf16 %v3129_v40, %v3128_v11 }
 0x4dd   : > { %3413 = vst [vmem:[%s253_s7 + $0x8] sm:$0xff] %v3411_v0  }
 0x4de PF: > { %s16_s21 = sadd.s32 1, %s4471_s21  }
 0x4df   : > { %p13_p5 = scmp.ge.s32.totalorder %s16_s21, 4  }
 0x4e1   :  { %15 = sbr.rel (!%p13_p5) target bundleno = 1 (0x1), region = 74 }

</bundles_post_ra>
